<compile_context>
chip_gen: v5e
topology: v5e:2x2
jax: 0.10.0
libtpu: 0.0.40
codegen_flags: <defaults>
</compile_context>

<pallas_src>
import jax
import jax.numpy as jnp
from jax.experimental import pallas as pl
from jax.experimental.pallas import tpu as pltpu

EMB = 32                      # embeddings_size
H1, H2, H3, OUT = 1024, 256, 64, 2
BN_EPS = 1e-5
K_AUG = 48                    # EMB + 1 (bias column), zero-padded to a 16-multiple


def _round_up(x, m):
    return ((x + m - 1) // m) * m


def _tpu_flavor():
    """(is_v5e, has_two_tensorcores) from the device kind; safe defaults."""
    try:
        kind = jax.devices()[0].device_kind.lower()
    except Exception:
        kind = ""
    is_v5e = "v5" in kind
    two_cores = "7" in kind          # v7x-class parts: 2 TensorCores per chip
    return is_v5e, two_cores


def _pick_tb(batch, m_align, max_tile, two_cores):
    """Batch-tile size: large tiles to amortize grid overhead, MXU-M aligned,
    >=2 (even) tiles on two-TensorCore parts, padding bounded by ~1 M-block/tile."""
    if batch <= m_align:
        return _round_up(batch, 16)          # tiny batch: one small tile
    n_tiles = pl.cdiv(batch, max_tile)
    if two_cores:
        n_tiles = _round_up(max(n_tiles, 2), 2)
    return _round_up(pl.cdiv(batch, n_tiles), m_align)


def _make_kernel(tb, chunk):
    """Fused MLP over one (tb, K_AUG) batch tile, processed in `chunk`-row
    sub-tiles so successive chunks' MXU matmuls overlap VPU epilogues."""
    n_sub = tb // chunk

    def kernel(x_ref,
               w1_ref,            # (K_AUG, H1): BN-folded W1, bias as row EMB
               w2_ref, b2_ref,
               w3_ref, b3_ref,
               w4_ref, b4_ref,
               out_ref):
        act = b2_ref.dtype        # epilogue dtype: bf16 on v6e/v7x, f32 on v5e

        for c in range(n_sub):    # static unrolled loop -> independent chunks
            rows = pl.ds(c * chunk, chunk)
            xc = x_ref[rows, :]                                   # bf16 (chunk, K_AUG)

            # L1: Linear+BN (folded), bias rides the MXU; ReLU epilogue.
            a1 = jnp.dot(xc, w1_ref[...], preferred_element_type=jnp.float32)
            h1 = jnp.maximum(a1.astype(act), 0).astype(jnp.bfloat16)

            # L2 / L3: Linear(+folded BN) -> bias add + ReLU in `act` dtype.
            a2 = jnp.dot(h1, w2_ref[...], preferred_element_type=jnp.float32)
            h2 = jnp.maximum(a2.astype(act) + b2_ref[...], 0).astype(jnp.bfloat16)

            a3 = jnp.dot(h2, w3_ref[...], preferred_element_type=jnp.float32)
            h3 = jnp.maximum(a3.astype(act) + b3_ref[...], 0).astype(jnp.bfloat16)

            # Head: Linear(64, 2), f32 epilogue.
            logits = jnp.dot(h3, w4_ref[...],
                             preferred_element_type=jnp.float32) + b4_ref[...]

            # 2-class log_softmax, closed form (no cross-lane reductions).
            l0 = logits[:, 0:1]
            l1 = logits[:, 1:2]
            m = jnp.maximum(l0, l1)
            lse = m + jnp.log(jnp.exp(l0 - m) + jnp.exp(l1 - m))
            out_ref[rows, :] = (logits - lse).astype(out_ref.dtype)

    return kernel


def corenet_forward(x, params, *, tb=None, sub=None):
    """x: (B, EMB) float. params from init_params(). Returns (B, 2) f32 log-probs."""
    B, E = x.shape
    assert E == EMB
    w1 = params[0]
    k_aug = w1.shape[0]

    is_v5e, two_cores = _tpu_flavor()
    m_align = 128 if is_v5e else 256            # MXU M block
    max_tile = 1024 if two_cores else 2048      # v7x: 64 MiB VMEM + 2-tile minimum

    if tb is None:
        tb = _pick_tb(B, m_align, max_tile, two_cores)
    tb = _round_up(tb, 16)                      # bf16 sublane packing

    # In-kernel sub-chunk size (MXU-M sized); at most 4 chunks per tile so the
    # unrolled loop stays small. chunk must divide tb and stay a 16-multiple.
    if sub is None:
        sub = m_align
    n_sub = min(4, max(1, tb // sub))
    while tb % n_sub != 0 or (tb // n_sub) % 16 != 0:
        n_sub -= 1
    chunk = tb // n_sub

    # Augment x with the bias column (+ zero pad to K_AUG) and pad the batch.
    ones = jnp.ones((B, 1), jnp.float32)
    zpad = jnp.zeros((B, k_aug - E - 1), jnp.float32)
    xa = jnp.concatenate([x.astype(jnp.float32), ones, zpad],
                         axis=1).astype(jnp.bfloat16)
    B_pad = _round_up(B, tb)
    if B_pad != B:
        xa = jnp.pad(xa, ((0, B_pad - B), (0, 0)))

    kernel = _make_kernel(tb, chunk)

    def _build(single_buffer_weights):
        def rep(arr):  # weight/bias block: same block for every batch tile
            nd = arr.ndim
            kwargs = ({"pipeline_mode": pl.Buffered(1)}
                      if single_buffer_weights else {})
            return pl.BlockSpec(arr.shape, lambda i, _nd=nd: (0,) * _nd, **kwargs)

        in_specs = [pl.BlockSpec((tb, k_aug), lambda i: (i, 0))]   # x tile
        in_specs += [rep(p) for p in params]
        out_specs = pl.BlockSpec((tb, OUT), lambda i: (i, 0))

        return pl.pallas_call(
            kernel,
            out_shape=jax.ShapeDtypeStruct((B_pad, OUT), jnp.float32),
            grid_spec=pltpu.PrefetchScalarGridSpec(
                num_scalar_prefetch=0,
                grid=(B_pad // tb,),
                in_specs=in_specs,
                out_specs=out_specs,
            ),
            compiler_params=pltpu.CompilerParams(
                dimension_semantics=("parallel",),   # shard batch tiles across TCs
                vmem_limit_bytes=48 * 1024 * 1024,   # safe on v5e/v6e (128MiB) & v7x (64MiB)
            ),
        )

    try:
        out = jax.block_until_ready(_build(True)(xa, *params))
    except Exception:
        # pl.Buffered(1) single-buffering of the resident weights is only a
        # small VMEM saving; fall back to default buffering if rejected.
        out = _build(False)(xa, *params)

    return out[:B] if B_pad != B else out


def init_params(key, act_dtype=jnp.bfloat16):
    """Synthetic PyTorch-Linear-like params with eval-mode BN folded in.

    Layer 1 is stored augmented: (K_AUG, H1) with the BN-folded bias as row EMB
    and zero rows up to K_AUG, so the bias add happens on the MXU via the
    constant-1 input column. Other weights are (in, out) bf16; layer-2/3 biases
    are stored in `act_dtype` (bf16 on v6e/v7x, f32 on v5e), head bias in f32.
    """
    dims = [(EMB, H1), (H1, H2), (H2, H3), (H3, OUT)]
    params = []
    ks = jax.random.split(key, 2 * len(dims))
    for li, (din, dout) in enumerate(dims):
        bound = 1.0 / float(din) ** 0.5
        w = jax.random.uniform(ks[2 * li], (din, dout), jnp.float32, -bound, bound)
        b = jax.random.uniform(ks[2 * li + 1], (1, dout), jnp.float32, -bound, bound)
        if li < 3:  # fold eval-mode BatchNorm1d (gamma=1, beta=0, mean=0, var=1)
            gamma = jnp.ones((1, dout), jnp.float32)
            beta = jnp.zeros((1, dout), jnp.float32)
            run_mean = jnp.zeros((1, dout), jnp.float32)
            run_var = jnp.ones((1, dout), jnp.float32)
            scale = gamma / jnp.sqrt(run_var + BN_EPS)
            shift = beta - run_mean * scale
            w = w * scale                      # column-wise fold into the weight
            b = b * scale + shift
        if li == 0:
            w_aug = jnp.zeros((K_AUG, dout), jnp.float32)
            w_aug = w_aug.at[:din, :].set(w)
            w_aug = w_aug.at[din, :].set(b[0])   # bias rides the MXU
            params.append(w_aug.astype(jnp.bfloat16))
        else:
            params.append(w.astype(jnp.bfloat16))
            params.append(b.astype(act_dtype if li < 3 else jnp.float32))
    return tuple(params)


def corenet_reference(x, params):
    """Pure-JAX reference matching the kernel's precision choices exactly."""
    w1, w2, b2, w3, b3, w4, b4 = params
    act = b2.dtype
    B = x.shape[0]
    ones = jnp.ones((B, 1), jnp.float32)
    zpad = jnp.zeros((B, w1.shape[0] - x.shape[1] - 1), jnp.float32)
    xa = jnp.concatenate([x.astype(jnp.float32), ones, zpad],
                         axis=1).astype(jnp.bfloat16)
    a1 = jnp.dot(xa, w1, preferred_element_type=jnp.float32)
    h1 = jnp.maximum(a1.astype(act), 0).astype(jnp.bfloat16)
    a2 = jnp.dot(h1, w2, preferred_element_type=jnp.float32)
    h2 = jnp.maximum(a2.astype(act) + b2, 0).astype(jnp.bfloat16)
    a3 = jnp.dot(h2, w3, preferred_element_type=jnp.float32)
    h3 = jnp.maximum(a3.astype(act) + b3, 0).astype(jnp.bfloat16)
    logits = jnp.dot(h3, w4, preferred_element_type=jnp.float32) + b4
    return jax.nn.log_softmax(logits, axis=1)


if __name__ == "__main__":
    key = jax.random.PRNGKey(0)
    kx, kp = jax.random.split(key)

    is_v5e, _ = _tpu_flavor()
    act_dtype = jnp.float32 if is_v5e else jnp.bfloat16

    B = 64
    x = jax.random.normal(kx, (B, EMB), jnp.float32)
    params = init_params(kp, act_dtype=act_dtype)

    ref = corenet_reference(x, params)

    # Default tile (single grid step at this small batch).
    out = jax.block_until_ready(corenet_forward(x, params))
    assert out.shape == (B, OUT)
    assert jnp.allclose(out, ref, atol=2e-2, rtol=2e-2), "mismatch vs JAX reference"

    # Multi-step grid + in-kernel sub-chunking (tb=32 -> 2 tiles; sub=16 -> 2 chunks/tile).
    out2 = jax.block_until_ready(corenet_forward(x, params, tb=32, sub=16))
    assert out2.shape == (B, OUT)
    assert jnp.allclose(out2, ref, atol=2e-2, rtol=2e-2), "mismatch vs JAX reference (tiled)"

    # Padded-batch path (tb=48 -> B_pad=96, last tile half padded rows discarded).
    out3 = jax.block_until_ready(corenet_forward(x, params, tb=48))
    assert out3.shape == (B, OUT)
    assert jnp.allclose(out3, ref, atol=2e-2, rtol=2e-2), "mismatch vs JAX reference (padded)"

    print("KERNEL_OK")
</pallas_src>

<mosaic_0001>
module attributes {stable_mosaic.version = 11 : i64} {
  func.func @kernel(%arg0: i32, %arg1: memref<64x48xbf16, #tpu.memory_space<vmem>>, %arg2: memref<48x1024xbf16, #tpu.memory_space<vmem>>, %arg3: memref<1024x256xbf16, #tpu.memory_space<vmem>>, %arg4: memref<1x256xbf16, #tpu.memory_space<vmem>>, %arg5: memref<256x64xbf16, #tpu.memory_space<vmem>>, %arg6: memref<1x64xbf16, #tpu.memory_space<vmem>>, %arg7: memref<64x2xbf16, #tpu.memory_space<vmem>>, %arg8: memref<1x2xf32, #tpu.memory_space<vmem>>, %arg9: memref<64x2xf32, #tpu.memory_space<vmem>>) attributes {dimension_semantics = [#tpu.dimension_semantics<parallel>], iteration_bounds = array<i64: 1>, scalar_prefetch = 0 : i64, scratch_operands = 0 : i64, tpu.core_type = #tpu.core_type<tc>, window_params = [{transform_indices = @transform_0, window_bounds = array<i64: 64, 48>}, {pipeline_mode = #tpu.pipeline_mode<synchronous>, transform_indices = @transform_1, window_bounds = array<i64: 48, 1024>}, {pipeline_mode = #tpu.pipeline_mode<synchronous>, transform_indices = @transform_2, window_bounds = array<i64: 1024, 256>}, {pipeline_mode = #tpu.pipeline_mode<synchronous>, transform_indices = @transform_3, window_bounds = array<i64: 1, 256>}, {pipeline_mode = #tpu.pipeline_mode<synchronous>, transform_indices = @transform_4, window_bounds = array<i64: 256, 64>}, {pipeline_mode = #tpu.pipeline_mode<synchronous>, transform_indices = @transform_5, window_bounds = array<i64: 1, 64>}, {pipeline_mode = #tpu.pipeline_mode<synchronous>, transform_indices = @transform_6, window_bounds = array<i64: 64, 2>}, {pipeline_mode = #tpu.pipeline_mode<synchronous>, transform_indices = @transform_7, window_bounds = array<i64: 1, 2>}, {transform_indices = @transform_8, window_bounds = array<i64: 64, 2>}]} {
    %c0 = arith.constant 0 : index
    %c0_0 = arith.constant 0 : index
    %0 = vector.load %arg1[%c0, %c0_0] : memref<64x48xbf16, #tpu.memory_space<vmem>>, vector<64x48xbf16>
    %c0_1 = arith.constant 0 : index
    %c0_2 = arith.constant 0 : index
    %1 = vector.load %arg2[%c0_1, %c0_2] : memref<48x1024xbf16, #tpu.memory_space<vmem>>, vector<48x1024xbf16>
    %cst = arith.constant dense<0.000000e+00> : vector<64x1024xf32>
    %2 = tpu.matmul %0, %1, %cst {dimension_numbers = #tpu.dot_dimension_numbers<[1], [0], [0], [1], [0, 0, 1, 1], [], []>} : vector<64x48xbf16>, vector<48x1024xbf16>, vector<64x1024xf32> -> vector<64x1024xf32>
    %3 = arith.truncf %2 : vector<64x1024xf32> to vector<64x1024xbf16>
    %cst_3 = arith.constant 0.000000e+00 : bf16
    %4 = vector.broadcast %cst_3 : bf16 to vector<64x1024xbf16>
    %5 = arith.maximumf %3, %4 : vector<64x1024xbf16>
    %c0_4 = arith.constant 0 : index
    %c0_5 = arith.constant 0 : index
    %6 = vector.load %arg3[%c0_4, %c0_5] : memref<1024x256xbf16, #tpu.memory_space<vmem>>, vector<1024x256xbf16>
    %cst_6 = arith.constant dense<0.000000e+00> : vector<64x256xf32>
    %7 = tpu.matmul %5, %6, %cst_6 {dimension_numbers = #tpu.dot_dimension_numbers<[1], [0], [0], [1], [0, 0, 1, 1], [], []>} : vector<64x1024xbf16>, vector<1024x256xbf16>, vector<64x256xf32> -> vector<64x256xf32>
    %8 = arith.truncf %7 : vector<64x256xf32> to vector<64x256xbf16>
    %c0_7 = arith.constant 0 : index
    %c0_8 = arith.constant 0 : index
    %9 = vector.load %arg4[%c0_7, %c0_8] : memref<1x256xbf16, #tpu.memory_space<vmem>>, vector<1x256xbf16>
    %10 = vector.broadcast %9 : vector<1x256xbf16> to vector<64x256xbf16>
    %11 = arith.addf %8, %10 : vector<64x256xbf16>
    %cst_9 = arith.constant 0.000000e+00 : bf16
    %12 = vector.broadcast %cst_9 : bf16 to vector<64x256xbf16>
    %13 = arith.maximumf %11, %12 : vector<64x256xbf16>
    %c0_10 = arith.constant 0 : index
    %c0_11 = arith.constant 0 : index
    %14 = vector.load %arg5[%c0_10, %c0_11] : memref<256x64xbf16, #tpu.memory_space<vmem>>, vector<256x64xbf16>
    %cst_12 = arith.constant dense<0.000000e+00> : vector<64x64xf32>
    %15 = tpu.matmul %13, %14, %cst_12 {dimension_numbers = #tpu.dot_dimension_numbers<[1], [0], [0], [1], [0, 0, 1, 1], [], []>} : vector<64x256xbf16>, vector<256x64xbf16>, vector<64x64xf32> -> vector<64x64xf32>
    %16 = arith.truncf %15 : vector<64x64xf32> to vector<64x64xbf16>
    %c0_13 = arith.constant 0 : index
    %c0_14 = arith.constant 0 : index
    %17 = vector.load %arg6[%c0_13, %c0_14] : memref<1x64xbf16, #tpu.memory_space<vmem>>, vector<1x64xbf16>
    %18 = vector.broadcast %17 : vector<1x64xbf16> to vector<64x64xbf16>
    %19 = arith.addf %16, %18 : vector<64x64xbf16>
    %cst_15 = arith.constant 0.000000e+00 : bf16
    %20 = vector.broadcast %cst_15 : bf16 to vector<64x64xbf16>
    %21 = arith.maximumf %19, %20 : vector<64x64xbf16>
    %c0_16 = arith.constant 0 : index
    %c0_17 = arith.constant 0 : index
    %22 = vector.load %arg7[%c0_16, %c0_17] : memref<64x2xbf16, #tpu.memory_space<vmem>>, vector<64x2xbf16>
    %cst_18 = arith.constant dense<0.000000e+00> : vector<64x2xf32>
    %23 = tpu.matmul %21, %22, %cst_18 {dimension_numbers = #tpu.dot_dimension_numbers<[1], [0], [0], [1], [0, 0, 1, 1], [], []>} : vector<64x64xbf16>, vector<64x2xbf16>, vector<64x2xf32> -> vector<64x2xf32>
    %c0_19 = arith.constant 0 : index
    %c0_20 = arith.constant 0 : index
    %24 = vector.load %arg8[%c0_19, %c0_20] : memref<1x2xf32, #tpu.memory_space<vmem>>, vector<1x2xf32>
    %25 = vector.broadcast %24 : vector<1x2xf32> to vector<64x2xf32>
    %26 = arith.addf %23, %25 : vector<64x2xf32>
    %27 = vector.extract_strided_slice %26 {offsets = [0, 0], sizes = [64, 1], strides = [1, 1]} : vector<64x2xf32> to vector<64x1xf32>
    %28 = vector.extract_strided_slice %26 {offsets = [0, 1], sizes = [64, 1], strides = [1, 1]} : vector<64x2xf32> to vector<64x1xf32>
    %29 = arith.maximumf %27, %28 : vector<64x1xf32>
    %30 = arith.subf %27, %29 : vector<64x1xf32>
    %31 = math.exp %30 : vector<64x1xf32>
    %32 = arith.subf %28, %29 : vector<64x1xf32>
    %33 = math.exp %32 : vector<64x1xf32>
    %34 = arith.addf %31, %33 : vector<64x1xf32>
    %35 = math.log %34 : vector<64x1xf32>
    %36 = arith.addf %29, %35 : vector<64x1xf32>
    %37 = vector.broadcast %36 : vector<64x1xf32> to vector<64x2xf32>
    %38 = arith.subf %26, %37 : vector<64x2xf32>
    %c0_21 = arith.constant 0 : index
    %c0_22 = arith.constant 0 : index
    %39 = vector.load %arg9[%c0_21, %c0_22] : memref<64x2xf32, #tpu.memory_space<vmem>>, vector<64x2xf32>
    tpu.vector_store %arg9[%c0_21, %c0_22], %38 {strides = array<i32>} : memref<64x2xf32, #tpu.memory_space<vmem>>, vector<64x2xf32>,
    return
  }
  func.func @transform_0(%arg0: i32) -> (i32, i32) {
    %c0_i32 = arith.constant 0 : i32
    %c0_i32_0 = arith.constant 0 : i32
    return %arg0, %c0_i32 : i32, i32
  }
  func.func @transform_1(%arg0: i32) -> (i32, i32) {
    %c0_i32 = arith.constant 0 : i32
    %c0_i32_0 = arith.constant 0 : i32
    %c0_i32_1 = arith.constant 0 : i32
    return %c0_i32, %c0_i32_0 : i32, i32
  }
  func.func @transform_2(%arg0: i32) -> (i32, i32) {
    %c0_i32 = arith.constant 0 : i32
    %c0_i32_0 = arith.constant 0 : i32
    %c0_i32_1 = arith.constant 0 : i32
    return %c0_i32, %c0_i32_0 : i32, i32
  }
  func.func @transform_3(%arg0: i32) -> (i32, i32) {
    %c0_i32 = arith.constant 0 : i32
    %c0_i32_0 = arith.constant 0 : i32
    %c0_i32_1 = arith.constant 0 : i32
    return %c0_i32, %c0_i32_0 : i32, i32
  }
  func.func @transform_4(%arg0: i32) -> (i32, i32) {
    %c0_i32 = arith.constant 0 : i32
    %c0_i32_0 = arith.constant 0 : i32
    %c0_i32_1 = arith.constant 0 : i32
    return %c0_i32, %c0_i32_0 : i32, i32
  }
  func.func @transform_5(%arg0: i32) -> (i32, i32) {
    %c0_i32 = arith.constant 0 : i32
    %c0_i32_0 = arith.constant 0 : i32
    %c0_i32_1 = arith.constant 0 : i32
    return %c0_i32, %c0_i32_0 : i32, i32
  }
  func.func @transform_6(%arg0: i32) -> (i32, i32) {
    %c0_i32 = arith.constant 0 : i32
    %c0_i32_0 = arith.constant 0 : i32
    %c0_i32_1 = arith.constant 0 : i32
    return %c0_i32, %c0_i32_0 : i32, i32
  }
  func.func @transform_7(%arg0: i32) -> (i32, i32) {
    %c0_i32 = arith.constant 0 : i32
    %c0_i32_0 = arith.constant 0 : i32
    %c0_i32_1 = arith.constant 0 : i32
    return %c0_i32, %c0_i32_0 : i32, i32
  }
  func.func @transform_8(%arg0: i32) -> (i32, i32) {
    %c0_i32 = arith.constant 0 : i32
    %c0_i32_0 = arith.constant 0 : i32
    return %arg0, %c0_i32 : i32, i32
  }
}

module attributes {stable_mosaic.version = 11 : i64} {
  func.func @kernel(%arg0: i32, %arg1: memref<64x48xbf16, #tpu.memory_space<vmem>>, %arg2: memref<48x1024xbf16, #tpu.memory_space<vmem>>, %arg3: memref<1024x256xbf16, #tpu.memory_space<vmem>>, %arg4: memref<1x256xbf16, #tpu.memory_space<vmem>>, %arg5: memref<256x64xbf16, #tpu.memory_space<vmem>>, %arg6: memref<1x64xbf16, #tpu.memory_space<vmem>>, %arg7: memref<64x2xbf16, #tpu.memory_space<vmem>>, %arg8: memref<1x2xf32, #tpu.memory_space<vmem>>, %arg9: memref<64x2xf32, #tpu.memory_space<vmem>>) attributes {dimension_semantics = [#tpu.dimension_semantics<parallel>], iteration_bounds = array<i64: 1>, scalar_prefetch = 0 : i64, scratch_operands = 0 : i64, tpu.core_type = #tpu.core_type<tc>, window_params = [{transform_indices = @transform_0, window_bounds = array<i64: 64, 48>}, {pipeline_mode = #tpu.pipeline_mode<synchronous>, transform_indices = @transform_1, window_bounds = array<i64: 48, 1024>}, {pipeline_mode = #tpu.pipeline_mode<synchronous>, transform_indices = @transform_2, window_bounds = array<i64: 1024, 256>}, {pipeline_mode = #tpu.pipeline_mode<synchronous>, transform_indices = @transform_3, window_bounds = array<i64: 1, 256>}, {pipeline_mode = #tpu.pipeline_mode<synchronous>, transform_indices = @transform_4, window_bounds = array<i64: 256, 64>}, {pipeline_mode = #tpu.pipeline_mode<synchronous>, transform_indices = @transform_5, window_bounds = array<i64: 1, 64>}, {pipeline_mode = #tpu.pipeline_mode<synchronous>, transform_indices = @transform_6, window_bounds = array<i64: 64, 2>}, {pipeline_mode = #tpu.pipeline_mode<synchronous>, transform_indices = @transform_7, window_bounds = array<i64: 1, 2>}, {transform_indices = @transform_8, window_bounds = array<i64: 64, 2>}]} {
    %c0 = arith.constant 0 : index
    %c0_0 = arith.constant 0 : index
    %0 = vector.load %arg1[%c0, %c0_0] : memref<64x48xbf16, #tpu.memory_space<vmem>>, vector<64x48xbf16>
    %c0_1 = arith.constant 0 : index
    %c0_2 = arith.constant 0 : index
    %1 = vector.load %arg2[%c0_1, %c0_2] : memref<48x1024xbf16, #tpu.memory_space<vmem>>, vector<48x1024xbf16>
    %cst = arith.constant dense<0.000000e+00> : vector<64x1024xf32>
    %2 = tpu.matmul %0, %1, %cst {dimension_numbers = #tpu.dot_dimension_numbers<[1], [0], [0], [1], [0, 0, 1, 1], [], []>} : vector<64x48xbf16>, vector<48x1024xbf16>, vector<64x1024xf32> -> vector<64x1024xf32>
    %3 = arith.truncf %2 : vector<64x1024xf32> to vector<64x1024xbf16>
    %cst_3 = arith.constant 0.000000e+00 : bf16
    %4 = vector.broadcast %cst_3 : bf16 to vector<64x1024xbf16>
    %5 = arith.maximumf %3, %4 : vector<64x1024xbf16>
    %c0_4 = arith.constant 0 : index
    %c0_5 = arith.constant 0 : index
    %6 = vector.load %arg3[%c0_4, %c0_5] : memref<1024x256xbf16, #tpu.memory_space<vmem>>, vector<1024x256xbf16>
    %cst_6 = arith.constant dense<0.000000e+00> : vector<64x256xf32>
    %7 = tpu.matmul %5, %6, %cst_6 {dimension_numbers = #tpu.dot_dimension_numbers<[1], [0], [0], [1], [0, 0, 1, 1], [], []>} : vector<64x1024xbf16>, vector<1024x256xbf16>, vector<64x256xf32> -> vector<64x256xf32>
    %8 = arith.truncf %7 : vector<64x256xf32> to vector<64x256xbf16>
    %c0_7 = arith.constant 0 : index
    %c0_8 = arith.constant 0 : index
    %9 = vector.load %arg4[%c0_7, %c0_8] : memref<1x256xbf16, #tpu.memory_space<vmem>>, vector<1x256xbf16>
    %10 = vector.broadcast %9 : vector<1x256xbf16> to vector<64x256xbf16>
    %11 = arith.addf %8, %10 : vector<64x256xbf16>
    %cst_9 = arith.constant 0.000000e+00 : bf16
    %12 = vector.broadcast %cst_9 : bf16 to vector<64x256xbf16>
    %13 = arith.maximumf %11, %12 : vector<64x256xbf16>
    %c0_10 = arith.constant 0 : index
    %c0_11 = arith.constant 0 : index
    %14 = vector.load %arg5[%c0_10, %c0_11] : memref<256x64xbf16, #tpu.memory_space<vmem>>, vector<256x64xbf16>
    %cst_12 = arith.constant dense<0.000000e+00> : vector<64x64xf32>
    %15 = tpu.matmul %13, %14, %cst_12 {dimension_numbers = #tpu.dot_dimension_numbers<[1], [0], [0], [1], [0, 0, 1, 1], [], []>} : vector<64x256xbf16>, vector<256x64xbf16>, vector<64x64xf32> -> vector<64x64xf32>
    %16 = arith.truncf %15 : vector<64x64xf32> to vector<64x64xbf16>
    %c0_13 = arith.constant 0 : index
    %c0_14 = arith.constant 0 : index
    %17 = vector.load %arg6[%c0_13, %c0_14] : memref<1x64xbf16, #tpu.memory_space<vmem>>, vector<1x64xbf16>
    %18 = vector.broadcast %17 : vector<1x64xbf16> to vector<64x64xbf16>
    %19 = arith.addf %16, %18 : vector<64x64xbf16>
    %cst_15 = arith.constant 0.000000e+00 : bf16
    %20 = vector.broadcast %cst_15 : bf16 to vector<64x64xbf16>
    %21 = arith.maximumf %19, %20 : vector<64x64xbf16>
    %c0_16 = arith.constant 0 : index
    %c0_17 = arith.constant 0 : index
    %22 = vector.load %arg7[%c0_16, %c0_17] : memref<64x2xbf16, #tpu.memory_space<vmem>>, vector<64x2xbf16>
    %cst_18 = arith.constant dense<0.000000e+00> : vector<64x2xf32>
    %23 = tpu.matmul %21, %22, %cst_18 {dimension_numbers = #tpu.dot_dimension_numbers<[1], [0], [0], [1], [0, 0, 1, 1], [], []>} : vector<64x64xbf16>, vector<64x2xbf16>, vector<64x2xf32> -> vector<64x2xf32>
    %c0_19 = arith.constant 0 : index
    %c0_20 = arith.constant 0 : index
    %24 = vector.load %arg8[%c0_19, %c0_20] : memref<1x2xf32, #tpu.memory_space<vmem>>, vector<1x2xf32>
    %25 = vector.broadcast %24 : vector<1x2xf32> to vector<64x2xf32>
    %26 = arith.addf %23, %25 : vector<64x2xf32>
    %27 = vector.extract_strided_slice %26 {offsets = [0, 0], sizes = [64, 1], strides = [1, 1]} : vector<64x2xf32> to vector<64x1xf32>
    %28 = vector.extract_strided_slice %26 {offsets = [0, 1], sizes = [64, 1], strides = [1, 1]} : vector<64x2xf32> to vector<64x1xf32>
    %29 = arith.maximumf %27, %28 : vector<64x1xf32>
    %30 = arith.subf %27, %29 : vector<64x1xf32>
    %31 = math.exp %30 : vector<64x1xf32>
    %32 = arith.subf %28, %29 : vector<64x1xf32>
    %33 = math.exp %32 : vector<64x1xf32>
    %34 = arith.addf %31, %33 : vector<64x1xf32>
    %35 = math.log %34 : vector<64x1xf32>
    %36 = arith.addf %29, %35 : vector<64x1xf32>
    %37 = vector.broadcast %36 : vector<64x1xf32> to vector<64x2xf32>
    %38 = arith.subf %26, %37 : vector<64x2xf32>
    %c0_21 = arith.constant 0 : index
    %c0_22 = arith.constant 0 : index
    %39 = vector.load %arg9[%c0_21, %c0_22] : memref<64x2xf32, #tpu.memory_space<vmem>>, vector<64x2xf32>
    tpu.vector_store %arg9[%c0_21, %c0_22], %38 {strides = array<i32>} : memref<64x2xf32, #tpu.memory_space<vmem>>, vector<64x2xf32>,
    return
  }
  func.func @transform_0(%arg0: i32) -> (i32, i32) {
    %c0_i32 = arith.constant 0 : i32
    %c0_i32_0 = arith.constant 0 : i32
    return %arg0, %c0_i32 : i32, i32
  }
  func.func @transform_1(%arg0: i32) -> (i32, i32) {
    %c0_i32 = arith.constant 0 : i32
    %c0_i32_0 = arith.constant 0 : i32
    %c0_i32_1 = arith.constant 0 : i32
    return %c0_i32, %c0_i32_0 : i32, i32
  }
  func.func @transform_2(%arg0: i32) -> (i32, i32) {
    %c0_i32 = arith.constant 0 : i32
    %c0_i32_0 = arith.constant 0 : i32
    %c0_i32_1 = arith.constant 0 : i32
    return %c0_i32, %c0_i32_0 : i32, i32
  }
  func.func @transform_3(%arg0: i32) -> (i32, i32) {
    %c0_i32 = arith.constant 0 : i32
    %c0_i32_0 = arith.constant 0 : i32
    %c0_i32_1 = arith.constant 0 : i32
    return %c0_i32, %c0_i32_0 : i32, i32
  }
  func.func @transform_4(%arg0: i32) -> (i32, i32) {
    %c0_i32 = arith.constant 0 : i32
    %c0_i32_0 = arith.constant 0 : i32
    %c0_i32_1 = arith.constant 0 : i32
    return %c0_i32, %c0_i32_0 : i32, i32
  }
  func.func @transform_5(%arg0: i32) -> (i32, i32) {
    %c0_i32 = arith.constant 0 : i32
    %c0_i32_0 = arith.constant 0 : i32
    %c0_i32_1 = arith.constant 0 : i32
    return %c0_i32, %c0_i32_0 : i32, i32
  }
  func.func @transform_6(%arg0: i32) -> (i32, i32) {
    %c0_i32 = arith.constant 0 : i32
    %c0_i32_0 = arith.constant 0 : i32
    %c0_i32_1 = arith.constant 0 : i32
    return %c0_i32, %c0_i32_0 : i32, i32
  }
  func.func @transform_7(%arg0: i32) -> (i32, i32) {
    %c0_i32 = arith.constant 0 : i32
    %c0_i32_0 = arith.constant 0 : i32
    %c0_i32_1 = arith.constant 0 : i32
    return %c0_i32, %c0_i32_0 : i32, i32
  }
  func.func @transform_8(%arg0: i32) -> (i32, i32) {
    %c0_i32 = arith.constant 0 : i32
    %c0_i32_0 = arith.constant 0 : i32
    return %arg0, %c0_i32 : i32, i32
  }
}

</mosaic_0001>

<bundles_post_ra>
// kernel: tpu_custom_call.1
= control target key start
LH: loop header
LB: loop body
LE: loop exit
PB: predicated region body
PF: predicated region fallthrough
CT: control target
= control target key end

     0   :  { %13 = vsyncpa [#allocation3], 0  ;;  %s3565_s30 = smov [#allocation2]   ;;  %s3566_s10 = smov 128   ;;  %s4419_s0 = inlined_call_operand.vmem [shape: bf16[64,48], index: 0, kind: input, shape index: {}]   ;;  %s4420_s1 = inlined_call_operand.vmem [shape: bf16[48,1024], index: 1, kind: input, shape index: {}]   ;;  %s4421_s2 = inlined_call_operand.hbm [shape: bf16[1024,256], index: 2, kind: input, shape index: {}]   ;;  %s4422_s3 = inlined_call_operand.vmem [shape: bf16[1,256], index: 3, kind: input, shape index: {}]   ;;  %s4423_s4 = inlined_call_operand.vmem [shape: bf16[256,64], index: 4, kind: input, shape index: {}]   ;;  %s4424_s5 = inlined_call_operand.vmem [shape: bf16[1,64], index: 5, kind: input, shape index: {}]   ;;  %s4425_s6 = inlined_call_operand.vmem [shape: bf16[64,2], index: 6, kind: input, shape index: {}]   ;;  %s4426_s7 = inlined_call_operand.vmem [shape: f32[1,2], index: 7, kind: input, shape index: {}]   ;;  %s4427_s8 = inlined_call_operand.vmem [shape: f32[64,2], index: 8, kind: output, shape index: {}]  }
   0x1   :  { %s22_s29 = sshll.u32 %s4421_s2, 4  ;;  %s24_s9 = sshll.u32 %s3565_s30, 4  ;;  %s23_s29 = int_to_ptr.hbm [resolvable:$true] %s22_s29  ;;  %s25_s9 = int_to_ptr.vmem [resolvable:$true] %s24_s9 }
   0x2   :  { %s3567_s11 = smov 8  }
   0x3   :  { %30 = dma.hbm_to_vmem [thread:$0]  %s23_s29, 16384, %s25_s9, [#allocation3], %s3566_s10, %s3566_s10, %s3567_s11  }
   0x4   :  { %3563 = dma.done.wait [#allocation3], 16384  }
   0x5   :  { %3564 = vsyncadd [#allocation3], 4294950912  ;;  %v2638_v0 = vld [vmem:[%s4420_s1 + $0x80] sm:$0xf]  ;;  %v2646_v2 = vld [vmem:[%s4420_s1 + $0x88] sm:$0xf] }
   0x6   :  { %v3320_v1 = vld [vmem:[%s4420_s1 + $0x9c] sm:$0xf0]  ;;  %v3321_v4 = vld [vmem:[%s4420_s1 + $0xa4] sm:$0xf0]  ;;  %v3316_v14 = vld [vmem:[%s4420_s1 + $0x84] sm:$0xf] }
   0x7   :  { %v2639_v3 = vor.u32 %v3320_v1, %v2638_v0  ;;  %v2606_v5 = vld [vmem:[%s4420_s1 + $0x40] sm:$0xf]  ;;  %v2647_v7 = vor.u32 %v3321_v4, %v2646_v2  ;;  %v2614_v8 = vld [vmem:[%s4420_s1 + $0x48] sm:$0xf]  ;;  %v2640_v15 = vld [vmem:[%s4420_s1 + $0xa0] sm:$0xf0] }
   0x8   :  { %v3312_v6 = vld [vmem:[%s4420_s1 + $0x5c] sm:$0xf0]  ;;  %v3313_v9 = vld [vmem:[%s4420_s1 + $0x64] sm:$0xf0]  ;;  %v2643_v18 = vor.u32 %v3316_v14, %v2640_v15  ;;  %v3317_v19 = vld [vmem:[%s4420_s1 + $0x8c] sm:$0xf] }
   0x9   :  { %236 = vmatpush.bf16.msra.mxu0 %v2639_v3  ;;  %v2607_v10 = vor.u32 %v3312_v6, %v2606_v5  ;;  %v2574_v11 = vld [vmem:[%s4420_s1] sm:$0xf]  ;;  %294 = vmatpush.bf16.msra.mxu2 %v2647_v7  ;;  %v2615_v12 = vor.u32 %v3313_v9, %v2614_v8  ;;  %v2582_v16 = vld [vmem:[%s4420_s1 + $0x8] sm:$0xf]  ;;  %v2648_v20 = vld [vmem:[%s4420_s1 + $0xa8] sm:$0xf0] }
   0xa   :  { %3475 = vmatpush.bf16.msra.mxu3 %v2647_v7  ;;  %v3304_v13 = vld [vmem:[%s4420_s1 + $0x1c] sm:$0xf0]  ;;  %v3305_v17 = vld [vmem:[%s4420_s1 + $0x24] sm:$0xf0]  ;;  %v3308_v22 = vld [vmem:[%s4420_s1 + $0x44] sm:$0xf]  ;;  %3472 = vmatpush.bf16.msra.mxu1 %v2643_v18  ;;  %v2651_v25 = vor.u32 %v3317_v19, %v2648_v20 }
   0xb   :  { %v2575_v21 = vor.u32 %v3304_v13, %v2574_v11  ;;  %v2583_v23 = vor.u32 %v3305_v17, %v2582_v16  ;;  %v2608_v24 = vld [vmem:[%s4420_s1 + $0x60] sm:$0xf0]  ;;  %v3309_v28 = vld [vmem:[%s4420_s1 + $0x4c] sm:$0xf]  ;;  %vm218_vm0 = vcmask 392192   ;;  %v3687_v30 = vld [vmem:[%s4419_s0 + $0x18] sm:$0xff] }
   0xc   :  { %v2611_v26 = vor.u32 %v3308_v22, %v2608_v24  ;;  %v3676_v27 = vld [vmem:[%s4419_s0] sm:$0xff]  ;;  %v2616_v29 = vld [vmem:[%s4420_s1 + $0x68] sm:$0xf0]  ;;  %v2654_v34 = vld [vmem:[%s4420_s1 + $0x90] sm:$0xf]  ;;  %vm2268_vm1 = vcmask 523264  }
   0xd   :  { %237 = vmatpush.bf16.msra.mxu0 %v2607_v10  ;;  %295 = vmatpush.bf16.msra.mxu2 %v2615_v12  ;;  %v2619_v31 = vor.u32 %v3309_v28, %v2616_v29  ;;  %v3301_v32 = vld [vmem:[%s4420_s1 + $0xc] sm:$0xf]  ;;  %v3322_v35 = vld [vmem:[%s4420_s1 + $0xac] sm:$0xf0]  ;;  %v3300_v36 = vld [vmem:[%s4420_s1 + $0x4] sm:$0xf] }
   0xe   :  { %3476 = vmatpush.bf16.msra.mxu3 %v2615_v12  ;;  %3473 = vmatpush.bf16.msra.mxu1 %v2611_v26  ;;  %v2584_v33 = vld [vmem:[%s4420_s1 + $0x28] sm:$0xf0]  ;;  %v2576_v37 = vld [vmem:[%s4420_s1 + $0x20] sm:$0xf0]  ;;  %v2655_v40 = vor.u32 %v3322_v35, %v2654_v34  ;;  %v2622_v41 = vld [vmem:[%s4420_s1 + $0x50] sm:$0xf] }
   0xf   :  { %v2579_v38 = vor.u32 %v3300_v36, %v2576_v37  ;;  %v2587_v39 = vor.u32 %v3301_v32, %v2584_v33  ;;  %v3314_v42 = vld [vmem:[%s4420_s1 + $0x6c] sm:$0xf0]  ;;  %v3722_v43 = vld [vmem:[%s4419_s0 + $0x8] sm:$0xff]  ;;  %v2662_v45 = vld [vmem:[%s4420_s1 + $0x98] sm:$0xf]  ;;  %s3568_s15 = smov 127  }
  0x10   :  { %v2623_v44 = vor.u32 %v3314_v42, %v2622_v41  ;;  %v3323_v46 = vld [vmem:[%s4420_s1 + $0xb4] sm:$0xf0]  ;;  %v3753_v53 = vld [vmem:[%s4419_s0 + $0x10] sm:$0xff]  ;;  %v3319_v60 = vld [vmem:[%s4420_s1 + $0x9c] sm:$0xf]  ;;  %vm2542_vm2 = vcmask 15360  }
  0x11   :  { %238 = vmatpush.bf16.msra.mxu0 %v2575_v21  ;;  %296 = vmatpush.bf16.msra.mxu2 %v2583_v23  ;;  %v2630_v47 = vld [vmem:[%s4420_s1 + $0x58] sm:$0xf]  ;;  %v2663_v48 = vor.u32 %v3323_v46, %v2662_v45  ;;  %v2590_v55 = vld [vmem:[%s4420_s1 + $0x10] sm:$0xf]  ;;  %v3318_v58 = vld [vmem:[%s4420_s1 + $0x94] sm:$0xf] }
  0x12   :  { %3477 = vmatpush.bf16.msra.mxu3 %v2583_v23  ;;  %3474 = vmatpush.bf16.msra.mxu1 %v2579_v38  ;;  %v3315_v49 = vld [vmem:[%s4420_s1 + $0x74] sm:$0xf0]  ;;  %v3306_v56 = vld [vmem:[%s4420_s1 + $0x2c] sm:$0xf0]  ;;  %v2656_v59 = vld [vmem:[%s4420_s1 + $0xb0] sm:$0xf0] }
  0x13   :  { %v2631_v50 = vor.u32 %v3315_v49, %v2630_v47  ;;  %v2598_v51 = vld [vmem:[%s4420_s1 + $0x18] sm:$0xf]  ;;  %v2591_v57 = vor.u32 %v3306_v56, %v2590_v55  ;;  %v2659_v61 = vor.u32 %v3318_v58, %v2656_v59  ;;  %v2664_v62 = vld [vmem:[%s4420_s1 + $0xb8] sm:$0xf0]  ;;  %v3310_v0 = vld [vmem:[%s4420_s1 + $0x54] sm:$0xf] }
  0x14   :  { %2668 = vmatmul.msk.bf16.vlgmr.msra.gmra.mxu0 %vm218_vm0, %v3676_v27  ;;  %2676 = vmatmul.msk.bf16.vlgmr.msra.gmra.mxu2 %vm218_vm0, %v3676_v27  ;;  %v3307_v52 = vld [vmem:[%s4420_s1 + $0x34] sm:$0xf0]  ;;  %v2667_v63 = vor.u32 %v3319_v60, %v2664_v62  ;;  %v2624_v1 = vld [vmem:[%s4420_s1 + $0x70] sm:$0xf0]  ;;  %v3311_v2 = vld [vmem:[%s4420_s1 + $0x5c] sm:$0xf] }
  0x15   :  { %265 = vmatpush.bf16.msrb.mxu0 %v2643_v18  ;;  %2679 = vmatmul.msk.bf16.vlgmr.msra.gmra.mxu3 %vm218_vm0, %v3687_v30  ;;  %v2599_v54 = vor.u32 %v3307_v52, %v2598_v51  ;;  %v2627_v3 = vor.u32 %v3310_v0, %v2624_v1  ;;  %v2632_v4 = vld [vmem:[%s4420_s1 + $0x78] sm:$0xf0]  ;;  %v2758_v5 = vld [vmem:[#allocation2 + $0x70] sm:$0xf]  ;;  %v3339_v6 = vld [vmem:[#allocation2 + $0x74] sm:$0xf0] }
  0x16   :  { %323 = vmatpush.bf16.msrb.mxu3 %v2651_v25  ;;  %2673 = vmatmul.msk.bf16.vlgmr.msra.gmra.mxu1 %vm218_vm0, %v3722_v43  ;;  %v2635_v7 = vor.u32 %v3311_v2, %v2632_v4  ;;  %v2759_v8 = vor.u32 %v3339_v6, %v2758_v5  ;;  %v3303_v9 = vld [vmem:[%s4420_s1 + $0x1c] sm:$0xf]  ;;  %v2750_v11 = vld [vmem:[#allocation2 + $0x60] sm:$0xf]  ;;  %v3337_v12 = vld [vmem:[#allocation2 + $0x64] sm:$0xf0] }
  0x17   :  { %410 = vmatpush.bf16.msrb.mxu2 %v2663_v48  ;;  %381 = vmatpush.bf16.msrb.mxu1 %v2659_v61  ;;  %v2600_v10 = vld [vmem:[%s4420_s1 + $0x38] sm:$0xf0]  ;;  %v3302_v13 = vld [vmem:[%s4420_s1 + $0x14] sm:$0xf]  ;;  %v2751_v16 = vor.u32 %v3337_v12, %v2750_v11  ;;  %v2886_v18 = vld [vmem:[#allocation2 + $0x170] sm:$0xf] }
  0x18   :  { %v2592_v14 = vld [vmem:[%s4420_s1 + $0x30] sm:$0xf0]  ;;  %v2603_v15 = vor.u32 %v3303_v9, %v2600_v10  ;;  %v3371_v19 = vld [vmem:[#allocation2 + $0x174] sm:$0xf0]  ;;  %v2742_v21 = vld [vmem:[#allocation2 + $0x50] sm:$0xf] }
  0x19   :  { %266 = vmatpush.bf16.msrb.mxu0 %v2611_v26  ;;  %v2595_v17 = vor.u32 %v3302_v13, %v2592_v14  ;;  %v2887_v20 = vor.u32 %v3371_v19, %v2886_v18  ;;  %v3335_v22 = vld [vmem:[#allocation2 + $0x54] sm:$0xf0]  ;;  %v2878_v23 = vld [vmem:[#allocation2 + $0x160] sm:$0xf]  ;;  %v3369_v25 = vld [vmem:[#allocation2 + $0x164] sm:$0xf0] }
  0x1a   :  { %324 = vmatpush.bf16.msrb.mxu3 %v2619_v31  ;;  %v2743_v24 = vor.u32 %v3335_v22, %v2742_v21  ;;  %v2734_v26 = vld [vmem:[#allocation2 + $0x40] sm:$0xf]  ;;  %v3333_v28 = vld [vmem:[#allocation2 + $0x44] sm:$0xf0]  ;;  %v2879_v29 = vor.u32 %v3369_v25, %v2878_v23  ;;  %v2870_v31 = vld [vmem:[#allocation2 + $0x150] sm:$0xf] }
  0x1b   :  { %411 = vmatpush.bf16.msrb.mxu2 %v2631_v50  ;;  %382 = vmatpush.bf16.msrb.mxu1 %v2627_v3  ;;  %v3367_v32 = vld [vmem:[#allocation2 + $0x154] sm:$0xf0]  ;;  %v2735_v33 = vor.u32 %v3333_v28, %v2734_v26  ;;  %v2726_v34 = vld [vmem:[#allocation2 + $0x30] sm:$0xf]  ;;  %v2718_v41 = vld [vmem:[#allocation2 + $0x20] sm:$0xf] }
  0x1c   :  { %v3331_v35 = vld [vmem:[#allocation2 + $0x34] sm:$0xf0]  ;;  %v2871_v36 = vor.u32 %v3367_v32, %v2870_v31  ;;  %v3329_v42 = vld [vmem:[#allocation2 + $0x24] sm:$0xf0]  ;;  %v2854_v45 = vld [vmem:[#allocation2 + $0x130] sm:$0xf] }
  0x1d   :  { %267 = vmatpush.bf16.msrb.mxu0 %v2579_v38  ;;  %v2727_v37 = vor.u32 %v3331_v35, %v2726_v34  ;;  %v2862_v38 = vld [vmem:[#allocation2 + $0x140] sm:$0xf]  ;;  %v3363_v46 = vld [vmem:[#allocation2 + $0x134] sm:$0xf0]  ;;  %v2710_v48 = vld [vmem:[#allocation2 + $0x10] sm:$0xf] }
  0x1e   :  { %325 = vmatpush.bf16.msrb.mxu3 %v2587_v39  ;;  %v3365_v39 = vld [vmem:[#allocation2 + $0x144] sm:$0xf0]  ;;  %v2855_v47 = vor.u32 %v3363_v46, %v2854_v45  ;;  %v3327_v49 = vld [vmem:[#allocation2 + $0x14] sm:$0xf0]  ;;  %v2846_v51 = vld [vmem:[#allocation2 + $0x120] sm:$0xf] }
  0x1f   :  { %412 = vmatpush.bf16.msrb.mxu2 %v2599_v54  ;;  %383 = vmatpush.bf16.msrb.mxu1 %v2595_v17  ;;  %v2711_v50 = vor.u32 %v3327_v49, %v2710_v48  ;;  %v3361_v52 = vld [vmem:[#allocation2 + $0x124] sm:$0xf0]  ;;  %v2702_v55 = vld [vmem:[#allocation2] sm:$0xf]  ;;  %v2838_v58 = vld [vmem:[#allocation2 + $0x110] sm:$0xf] }
  0x20   :  { %v2847_v54 = vor.u32 %v3361_v52, %v2846_v51  ;;  %v3325_v56 = vld [vmem:[#allocation2 + $0x4] sm:$0xf0]  ;;  %v3359_v59 = vld [vmem:[#allocation2 + $0x114] sm:$0xf0]  ;;  %v2950_v60 = vld [vmem:[#allocation2 + $0x1f0] sm:$0xf] }
  0x21   :  { %352 = vmatpush.bf16.msra.mxu0 %v2655_v40  ;;  %v3387_v61 = vld [vmem:[#allocation2 + $0x1f4] sm:$0xf0]  ;;  %v2839_v62 = vor.u32 %v3359_v59, %v2838_v58  ;;  %v2822_v0 = vld [vmem:[#allocation2 + $0xf0] sm:$0xf]  ;;  %v2830_v3 = vld [vmem:[#allocation2 + $0x100] sm:$0xf] }
  0x22   :  { %3478 = vmatpush.bf16.msra.mxu3 %v2655_v40  ;;  %v2863_v40 = vor.u32 %v3365_v39, %v2862_v38  ;;  %v3355_v1 = vld [vmem:[#allocation2 + $0xf4] sm:$0xf0]  ;;  %v3357_v4 = vld [vmem:[#allocation2 + $0x104] sm:$0xf0]  ;;  %v2942_v6 = vld [vmem:[#allocation2 + $0x1e0] sm:$0xf] }
  0x23   :  { %1481 = vmatpush.bf16.msra.mxu2 %v2887_v20  ;;  %v2823_v2 = vor.u32 %v3355_v1, %v2822_v0  ;;  %v2831_v5 = vor.u32 %v3357_v4, %v2830_v3  ;;  %v3353_v10 = vld [vmem:[#allocation2 + $0xe4] sm:$0xf0]  ;;  %v2934_v12 = vld [vmem:[#allocation2 + $0x1d0] sm:$0xf]  ;;  %v3383_v13 = vld [vmem:[#allocation2 + $0x1d4] sm:$0xf0] }
  0x24   :  { %2669 = vmatmul.msk.bf16.gmra.mxu0 %vm218_vm0, %v3722_v43  ;;  %2677 = vmatmul.msk.bf16.gmra.mxu2 %vm218_vm0, %v3722_v43  ;;  %v2935_v14 = vor.u32 %v3383_v13, %v2934_v12  ;;  %v2926_v18 = vld [vmem:[#allocation2 + $0x1c0] sm:$0xf]  ;;  %v3381_v19 = vld [vmem:[#allocation2 + $0x1c4] sm:$0xf0]  ;;  %v2918_v21 = vld [vmem:[#allocation2 + $0x1b0] sm:$0xf] }
  0x25   :  { %353 = vmatpush.bf16.msra.mxu0 %v2623_v44  ;;  %2680 = vmatmul.msk.bf16.vlgmr.msrb.gmra.mxu3 %vm218_vm0, %v3676_v27  ;;  %v3379_v22 = vld [vmem:[#allocation2 + $0x1b4] sm:$0xf0]  ;;  %v3349_v25 = vld [vmem:[#allocation2 + $0xc4] sm:$0xf0]  ;;  %v2910_v28 = vld [vmem:[#allocation2 + $0x1a0] sm:$0xf] }
  0x26   :  { %3479 = vmatpush.bf16.msra.mxu3 %v2623_v44  ;;  %2674 = vmatmul.msk.bf16.gmra.mxu1 %vm218_vm0, %v3753_v53  ;;  %v2719_v44 = vor.u32 %v3329_v42, %v2718_v41  ;;  %v2919_v23 = vor.u32 %v3379_v22, %v2918_v21  ;;  %v3375_v38 = vld [vmem:[#allocation2 + $0x194] sm:$0xf0]  ;;  %v2894_v45 = vld [vmem:[#allocation2 + $0x180] sm:$0xf]  ;;  %v3373_v46 = vld [vmem:[#allocation2 + $0x184] sm:$0xf0] }
  0x27   :  { %1482 = vmatpush.bf16.msra.mxu2 %v2879_v29  ;;  %1452 = vmatpush.bf16.msra.mxu1 %v2823_v2  ;;  %v3377_v29 = vld [vmem:[#allocation2 + $0x1a4] sm:$0xf0]  ;;  %v3347_v41 = vld [vmem:[#allocation2 + $0xb4] sm:$0xf0]  ;;  %v2895_v49 = vor.u32 %v3373_v46, %v2894_v45  ;;  %v3126_v4 = vld [vmem:[#allocation2 + $0x350] sm:$0xf] }
  0x28   :  { %v3345_v58 = vld [vmem:[#allocation2 + $0xa4] sm:$0xf0] }
  0x29   :  { %354 = vmatpush.bf16.msra.mxu0 %v2591_v57  ;;  %v3401_v21 = vld [vmem:[#allocation2 + $0x264] sm:$0xf0] }
  0x2a   :  { %3480 = vmatpush.bf16.msra.mxu3 %v2591_v57  ;;  %v2703_v57 = vor.u32 %v3325_v56, %v2702_v55  ;;  %v3435_v55 = vld [vmem:[#allocation2 + $0x374] sm:$0xf0] }
  0x2b   :  { %1483 = vmatpush.bf16.msra.mxu2 %v2871_v36 }
  0x2e   :  { %439 = vmatpush.bf16.msrb.mxu3 %v2667_v63  ;;  %v2951_v63 = vor.u32 %v3387_v61, %v2950_v60  ;;  %v3134_v60 = vld [vmem:[#allocation2 + $0x360] sm:$0xf]  ;;  %v3433_v61 = vld [vmem:[#allocation2 + $0x364] sm:$0xf0] }
  0x2f   :  { %1484 = vmatpush.bf16.msra.mxu2 %v2863_v40  ;;  %v3135_v0 = vor.u32 %v3433_v61, %v3134_v60  ;;  %v3078_v60 = vld [vmem:[#allocation2 + $0x2f0] sm:$0xf]  ;;  %v3419_v61 = vld [vmem:[#allocation2 + $0x2f4] sm:$0xf0] }
  0x32   :  { %440 = vmatpush.bf16.msrb.mxu3 %v2635_v7  ;;  %v3385_v7 = vld [vmem:[#allocation2 + $0x1e4] sm:$0xf0] }
  0x33   :  { %1485 = vmatpush.bf16.msra.mxu2 %v2855_v47  ;;  %v2943_v9 = vor.u32 %v3385_v7, %v2942_v6  ;;  %v3014_v7 = vld [vmem:[#allocation2 + $0x270] sm:$0xf] }
  0x34   :  { %2670 = vmatmul.msk.bf16.gmra.mxu0 %vm218_vm0, %v3753_v53  ;;  %2678 = vmatmul.msk.bf16.gmra.mxu2 %vm218_vm0, %v3753_v53 }
  0x35   :  { %2681 = vmatmul.msk.bf16.gmra.mxu3 %vm218_vm0, %v3722_v43 }
  0x36   :  { %2675 = vmatmul.msk.bf16.gmra.mxu1 %vm218_vm0, %v3687_v30  ;;  %441 = vmatpush.bf16.msrb.mxu3 %v2603_v15  ;;  %v2806_v15 = vld [vmem:[#allocation2 + $0xd0] sm:$0xf] }
  0x37   :  { %1486 = vmatpush.bf16.msra.mxu2 %v2847_v54  ;;  %v3142_v54 = vld [vmem:[#allocation2 + $0x370] sm:$0xf] }
  0x38   :  { %v3143_v56 = vor.u32 %v3435_v55, %v3142_v54  ;;  %v3451_v54 = vld [vmem:[#allocation2 + $0x3f4] sm:$0xf0] }
  0x3b   :  { %1487 = vmatpush.bf16.msra.mxu2 %v2839_v62 }
  0x3f   :  { %1488 = vmatpush.bf16.msra.mxu2 %v2831_v5  ;;  %v3431_v5 = vld [vmem:[#allocation2 + $0x354] sm:$0xf0] }
  0x44   :  { %2671 = vmatmul.msk.bf16.gmra.mxu0 %vm218_vm0, %v3687_v30  ;;  %2692 = vmatmul.msk.bf16.vlgmr.msrb.gmra.mxu2 %vm218_vm0, %v3676_v27 }
  0x45   :  { %2682 = vmatmul.msk.bf16.gmra.mxu3 %vm218_vm0, %v3753_v53  ;;  %1597 = vmatpush.bf16.msrb.mxu2 %v3143_v56 }
  0x46   :  { %2688 = vmatmul.msk.bf16.vlgmr.msrb.gmra.mxu1 %vm218_vm0, %v3676_v27 }
  0x49   :  { %1598 = vmatpush.bf16.msrb.mxu2 %v3135_v0 }
  0x54   :  { %2672 = vmatmul.msk.bf16.vlgmr.msrb.gmra.mxu0 %vm218_vm0, %v3676_v27  ;;  %2693 = vmatmul.msk.bf16.gmra.mxu2 %vm218_vm0, %v3722_v43 }
  0x55   :  { %2683 = vmatmul.msk.bf16.gmra.mxu3 %vm218_vm0, %v3687_v30  ;;  %1423 = vmatpush.bf16.msrb.mxu0 %v2759_v8  ;;  %v2814_v8 = vld [vmem:[#allocation2 + $0xe0] sm:$0xf] }
  0x56   :  { %2689 = vmatmul.msk.bf16.gmra.mxu1 %vm218_vm0, %v3722_v43  ;;  %v2815_v11 = vor.u32 %v3353_v10, %v2814_v8  ;;  %v3403_v8 = vld [vmem:[#allocation2 + $0x274] sm:$0xf0] }
  0x57   :  { %v3343_v10 = vld [vmem:[#allocation2 + $0x94] sm:$0xf0] }
  0x58   :  { %1453 = vmatpush.bf16.msra.mxu1 %v2815_v11  ;;  %v3015_v11 = vor.u32 %v3403_v8, %v3014_v7 }
  0x59   :  { %1424 = vmatpush.bf16.msrb.mxu0 %v2751_v16  ;;  %v3351_v16 = vld [vmem:[#allocation2 + $0xd4] sm:$0xf0] }
  0x5a   :  { %v2807_v17 = vor.u32 %v3351_v16, %v2806_v15  ;;  %v3429_v15 = vld [vmem:[#allocation2 + $0x344] sm:$0xf0] }
  0x5c   :  { %1454 = vmatpush.bf16.msra.mxu1 %v2807_v17 }
  0x5d   :  { %1425 = vmatpush.bf16.msrb.mxu0 %v2743_v24  ;;  %v2798_v24 = vld [vmem:[#allocation2 + $0xc0] sm:$0xf] }
  0x5e   :  { %v2799_v26 = vor.u32 %v3349_v25, %v2798_v24  ;;  %v3110_v24 = vld [vmem:[#allocation2 + $0x330] sm:$0xf]  ;;  %v3427_v25 = vld [vmem:[#allocation2 + $0x334] sm:$0xf0] }
  0x60   :  { %1455 = vmatpush.bf16.msra.mxu1 %v2799_v26  ;;  %v3111_v26 = vor.u32 %v3427_v25, %v3110_v24 }
  0x61   :  { %1426 = vmatpush.bf16.msrb.mxu0 %v2735_v33  ;;  %v2911_v33 = vor.u32 %v3377_v29, %v2910_v28  ;;  %v2766_v28 = vld [vmem:[#allocation2 + $0x80] sm:$0xf]  ;;  %v3341_v29 = vld [vmem:[#allocation2 + $0x84] sm:$0xf0] }
  0x64   :  { %2684 = vmatmul.msk.bf16.vlgmr.msra.gmra.mxu0 %vm218_vm0, %v3676_v27  ;;  %2694 = vmatmul.msk.bf16.gmra.mxu2 %vm218_vm0, %v3753_v53 }
  0x65   :  { %2686 = vmatmul.msk.bf16.vlgmr.msra.gmra.mxu3 %vm218_vm0, %v3753_v53  ;;  %1427 = vmatpush.bf16.msrb.mxu0 %v2727_v37  ;;  %v2902_v37 = vld [vmem:[#allocation2 + $0x190] sm:$0xf] }
  0x66   :  { %1510 = vmatpush.bf16.msra.mxu3 %v2951_v63  ;;  %2690 = vmatmul.msk.bf16.gmra.mxu1 %vm218_vm0, %v3753_v53  ;;  %v2903_v39 = vor.u32 %v3375_v38, %v2902_v37  ;;  %v3425_v37 = vld [vmem:[#allocation2 + $0x324] sm:$0xf0] }
  0x69   :  { %1428 = vmatpush.bf16.msrb.mxu0 %v2719_v44 }
  0x6a   :  { %1511 = vmatpush.bf16.msra.mxu3 %v2943_v9  ;;  %v2774_v9 = vld [vmem:[#allocation2 + $0x90] sm:$0xf] }
  0x6b   :  { %v2775_v13 = vor.u32 %v3343_v10, %v2774_v9  ;;  %v3393_v10 = vld [vmem:[#allocation2 + $0x224] sm:$0xf0] }
  0x6d   :  { %1429 = vmatpush.bf16.msrb.mxu0 %v2711_v50 }
  0x6e   :  { %1512 = vmatpush.bf16.msra.mxu3 %v2935_v14  ;;  %v3118_v14 = vld [vmem:[#allocation2 + $0x340] sm:$0xf] }
  0x71   :  { %1430 = vmatpush.bf16.msrb.mxu0 %v2703_v57  ;;  %v2782_v57 = vld [vmem:[#allocation2 + $0xa0] sm:$0xf] }
  0x72   :  { %v2783_v59 = vor.u32 %v3345_v58, %v2782_v57  ;;  %v2982_v57 = vld [vmem:[#allocation2 + $0x230] sm:$0xf]  ;;  %v3395_v58 = vld [vmem:[#allocation2 + $0x234] sm:$0xf0] }
  0x74   :  { %2685 = vmatmul.msk.bf16.gmra.mxu0 %vm218_vm0, %v3722_v43  ;;  %2695 = vmatmul.msk.bf16.gmra.mxu2 %vm218_vm0, %v3687_v30 }
  0x75   :  { %2687 = vmatmul.msk.bf16.gmra.mxu3 %vm218_vm0, %v3687_v30  ;;  %1539 = vmatpush.bf16.msra.mxu0 %v3015_v11 }
  0x76   :  { %2691 = vmatmul.msk.bf16.gmra.mxu1 %vm218_vm0, %v3687_v30 }
  0x85   :  { %2696 = vmatmul.msk.bf16.vlgmr.msrb.gmra.mxu3 %vm218_vm0, %v3676_v27  ;;  %v2927_v27 = vor.u32 %v3381_v19, %v2926_v18  ;;  %v3119_v18 = vor.u32 %v3429_v15, %v3118_v14  ;;  %v3198_v15 = vld [vmem:[#allocation2 + $0x3e0] sm:$0xf] }
  0x87   :  { %1513 = vmatpush.bf16.msra.mxu3 %v2927_v27 }
  0x8b   :  { %1514 = vmatpush.bf16.msra.mxu3 %v2919_v23 }
  0x8f   :  { %1515 = vmatpush.bf16.msra.mxu3 %v2911_v33  ;;  %v2767_v33 = vor.u32 %v3341_v29, %v2766_v28  ;;  %v2958_v28 = vld [vmem:[#allocation2 + $0x200] sm:$0xf]  ;;  %v3389_v29 = vld [vmem:[#allocation2 + $0x204] sm:$0xf0] }
  0x91   :  { %v240_v20 = vpop.f32.mrf.mxu0 }
  0x92   :  { %v559_v35 = vmax.f32 %v240_v20, 0.0  ;;  %v3006_v20 = vld [vmem:[#allocation2 + $0x260] sm:$0xf] }
  0x93   :  { %1516 = vmatpush.bf16.msra.mxu3 %v2903_v39  ;;  %v3007_v22 = vor.u32 %v3401_v21, %v3006_v20  ;;  %v3878_v14 = vpop.f32.mrf.mxu1  ;;  %v3391_v20 = vld [vmem:[#allocation2 + $0x214] sm:$0xf0] }
  0x95   :  { %2697 = vmatmul.msk.bf16.gmra.mxu3 %vm218_vm0, %v3722_v43  ;;  %v2790_v43 = vld [vmem:[#allocation2 + $0xb0] sm:$0xf]  ;;  %1540 = vmatpush.bf16.msra.mxu0 %v3007_v22 }
  0x96   :  { %v2791_v44 = vor.u32 %v3347_v41, %v2790_v43 }
  0x97   :  { %v298_v31 = vpop.f32.mrf.mxu2  ;;  %1517 = vmatpush.bf16.msra.mxu3 %v2895_v49  ;;  %v3423_v49 = vld [vmem:[#allocation2 + $0x314] sm:$0xf0] }
  0x98   :  { %v3843_v32 = vpop.f32.mrf.mxu3  ;;  %v561_v42 = vmax.f32 %v298_v31, 0.0  ;;  %1456 = vmatpush.bf16.msra.mxu1 %v2791_v44  ;;  %v2998_v31 = vld [vmem:[#allocation2 + $0x250] sm:$0xf] }
  0x99   :  { %v242_v34 = vpop.f32.mrf.mxu0 }
  0x9a   :  { %v567_v36 = vmax.f32 %v242_v34, 0.0  ;;  %v3399_v34 = vld [vmem:[#allocation2 + $0x254] sm:$0xf0] }
  0x9c   :  { %v3845_v40 = vpack.c.bf16 %v567_v36, %v559_v35  ;;  %1457 = vmatpush.bf16.msra.mxu1 %v2783_v59  ;;  %v2999_v35 = vor.u32 %v3399_v34, %v2998_v31  ;;  %v3102_v36 = vld [vmem:[#allocation2 + $0x320] sm:$0xf]  ;;  %v2959_v34 = vor.u32 %v3389_v29, %v2958_v28 }
  0x9d   :  { %v3103_v43 = vor.u32 %v3425_v37, %v3102_v36  ;;  %v3190_v36 = vld [vmem:[#allocation2 + $0x3d0] sm:$0xf]  ;;  %v3447_v37 = vld [vmem:[#allocation2 + $0x3d4] sm:$0xf0]  ;;  %v3038_v28 = vld [vmem:[#allocation2 + $0x2a0] sm:$0xf] }
  0x9e   :  { %1431 = vmatmul.bf16.vlgmr.msrb.gmra.mxu0 %v3845_v40 }
  0x9f   :  { %v300_v47 = vpop.f32.mrf.mxu2  ;;  %1541 = vmatpush.bf16.msra.mxu0 %v2999_v35 }
  0xa0   :  { %v3848_v48 = vpop.f32.mrf.mxu3  ;;  %v569_v50 = vmax.f32 %v300_v47, 0.0  ;;  %1458 = vmatpush.bf16.msra.mxu1 %v2775_v13  ;;  %v3094_v47 = vld [vmem:[#allocation2 + $0x310] sm:$0xf] }
  0xa1   :  { %v245_v51 = vpop.f32.mrf.mxu0  ;;  %v3095_v55 = vor.u32 %v3423_v49, %v3094_v47 }
  0xa2   :  { %v3850_v52 = vpack.c.bf16 %v569_v50, %v561_v42  ;;  %v575_v2 = vmax.f32 %v245_v51, 0.0  ;;  %v2990_v42 = vld [vmem:[#allocation2 + $0x240] sm:$0xf]  ;;  %v3206_v51 = vld [vmem:[#allocation2 + $0x3f0] sm:$0xf] }
  0xa3   :  { %v3207_v56 = vor.u32 %v3451_v54, %v3206_v51 }
  0xa4   :  { %1489 = vmatmul.bf16.vlgmr.msra.gmra.mxu2 %v3850_v52  ;;  %1459 = vmatpush.bf16.msra.mxu1 %v2767_v33 }
  0xa5   :  { %2698 = vmatmul.msk.bf16.gmra.mxu3 %vm218_vm0, %v3753_v53  ;;  %v3127_v53 = vor.u32 %v3431_v5, %v3126_v4  ;;  %v3421_v4 = vld [vmem:[#allocation2 + $0x304] sm:$0xf0] }
  0xa6   :  { %1626 = vmatpush.bf16.msrb.mxu3 %v3207_v56 }
  0xa7   :  { %v303_v62 = vpop.f32.mrf.mxu2  ;;  %1599 = vmatpush.bf16.msrb.mxu2 %v3127_v53 }
  0xa8   :  { %v3855_v63 = vpop.f32.mrf.mxu3  ;;  %v577_v12 = vmax.f32 %v303_v62, 0.0  ;;  %v2983_v62 = vor.u32 %v3395_v58, %v2982_v57  ;;  %v3054_v57 = vld [vmem:[#allocation2 + $0x2c0] sm:$0xf]  ;;  %v3413_v58 = vld [vmem:[#allocation2 + $0x2c4] sm:$0xf0] }
  0xa9   :  { %v247_v1 = vpop.f32.mrf.mxu0  ;;  %v562_v59 = vmax.f32 %v3855_v63, 0.0  ;;  %v2974_v63 = vld [vmem:[#allocation2 + $0x220] sm:$0xf] }
  0xaa   :  { %v583_v3 = vmax.f32 %v247_v1, 0.0  ;;  %v2975_v11 = vor.u32 %v3393_v10, %v2974_v63  ;;  %v3411_v63 = vld [vmem:[#allocation2 + $0x2b4] sm:$0xf0] }
  0xab   :  { %1600 = vmatpush.bf16.msrb.mxu2 %v3119_v18 }
  0xac   :  { %v3857_v6 = vpack.c.bf16 %v583_v3, %v575_v2  ;;  %v3079_v2 = vor.u32 %v3419_v61, %v3078_v60  ;;  %v3086_v3 = vld [vmem:[#allocation2 + $0x300] sm:$0xf]  ;;  %v3055_v60 = vor.u32 %v3413_v58, %v3054_v57 }
  0xad   :  { %v3087_v7 = vor.u32 %v3421_v4, %v3086_v3  ;;  %v3174_v4 = vld [vmem:[#allocation2 + $0x3b0] sm:$0xf] }
  0xae   :  { %1436 = vmatmul.bf16.gmra.mxu0 %v3857_v6  ;;  %1568 = vmatpush.bf16.msrb.mxu1 %v3079_v2 }
  0xaf   :  { %v305_v16 = vpop.f32.mrf.mxu2  ;;  %1601 = vmatpush.bf16.msrb.mxu2 %v3111_v26 }
  0xb0   :  { %v3860_v17 = vpop.f32.mrf.mxu3  ;;  %v585_v19 = vmax.f32 %v305_v16, 0.0  ;;  %v3449_v16 = vld [vmem:[#allocation2 + $0x3e4] sm:$0xf0] }
  0xb1   :  { %v250_v27 = vpop.f32.mrf.mxu0  ;;  %v570_v0 = vmax.f32 %v3860_v17, 0.0  ;;  %v3070_v17 = vld [vmem:[#allocation2 + $0x2e0] sm:$0xf]  ;;  %v3199_v18 = vor.u32 %v3449_v16, %v3198_v15 }
  0xb2   :  { %v3862_v23 = vpack.c.bf16 %v585_v19, %v577_v12  ;;  %v591_v44 = vmax.f32 %v250_v27, 0.0  ;;  %v3417_v19 = vld [vmem:[#allocation2 + $0x2e4] sm:$0xf0]  ;;  %v2966_v27 = vld [vmem:[#allocation2 + $0x210] sm:$0xf] }
  0xb3   :  { %1602 = vmatpush.bf16.msrb.mxu2 %v3103_v43  ;;  %v3874_v12 = vpack.c.bf16 %v570_v0, %v562_v59  ;;  %v3071_v21 = vor.u32 %v3417_v19, %v3070_v17  ;;  %v2967_v22 = vor.u32 %v3391_v20, %v2966_v27  ;;  %1627 = vmatpush.bf16.msrb.mxu3 %v3199_v18 }
  0xb4   :  { %1494 = vmatmul.bf16.gmra.mxu2 %v3862_v23  ;;  %v3191_v43 = vor.u32 %v3447_v37, %v3190_v36  ;;  %v2880_v36 = vld [vmem:[#allocation2 + $0x168] sm:$0xf0]  ;;  %v576_v37 = vmax.f32 %v3878_v14, 0.0 }
  0xb5   :  { %2699 = vmatmul.msk.bf16.gmra.mxu3 %vm218_vm0, %v3687_v30  ;;  %v3397_v30 = vld [vmem:[#allocation2 + $0x244] sm:$0xf0]  ;;  %1569 = vmatpush.bf16.msrb.mxu1 %v3071_v21  ;;  %v3370_v21 = vld [vmem:[#allocation2 + $0x174] sm:$0xf] }
  0xb6   :  { %v2991_v46 = vor.u32 %v3397_v30, %v2990_v42  ;;  %v3062_v42 = vld [vmem:[#allocation2 + $0x2d0] sm:$0xf]  ;;  %v3415_v30 = vld [vmem:[#allocation2 + $0x2d4] sm:$0xf0] }
  0xb7   :  { %v308_v38 = vpop.f32.mrf.mxu2  ;;  %1603 = vmatpush.bf16.msrb.mxu2 %v3095_v55  ;;  %1628 = vmatpush.bf16.msrb.mxu3 %v3191_v43  ;;  %v3063_v47 = vor.u32 %v3415_v30, %v3062_v42 }
  0xb8   :  { %v3867_v39 = vpop.f32.mrf.mxu3  ;;  %1542 = vmatpush.bf16.msra.mxu0 %v2991_v46  ;;  %v593_v1 = vmax.f32 %v308_v38, 0.0  ;;  %v3886_v38 = vpop.f32.mrf.mxu1 }
  0xb9   :  { %v252_v41 = vpop.f32.mrf.mxu0  ;;  %1570 = vmatpush.bf16.msrb.mxu1 %v3063_v47  ;;  %v584_v43 = vmax.f32 %v3886_v38, 0.0 }
  0xba   :  { %v599_v45 = vmax.f32 %v252_v41, 0.0  ;;  %v609_v41 = vmax.f32 %v3843_v32, 0.0  ;;  %v3182_v32 = vld [vmem:[#allocation2 + $0x3c0] sm:$0xf] }
  0xbb   :  { %1604 = vmatpush.bf16.msrb.mxu2 %v3087_v7  ;;  %v3926_v38 = vpack.c.bf16 %v584_v43, %v576_v37  ;;  %v2744_v37 = vld [vmem:[#allocation2 + $0x58] sm:$0xf0] }
  0xbc   :  { %v3869_v50 = vpack.c.bf16 %v599_v45, %v591_v44  ;;  %1543 = vmatpush.bf16.msra.mxu0 %v2983_v62  ;;  %v617_v44 = vmax.f32 %v3848_v48, 0.0  ;;  %v578_v45 = vmax.f32 %v3867_v39, 0.0  ;;  %v3445_v48 = vld [vmem:[#allocation2 + $0x3c4] sm:$0xf0] }
  0xbd   :  { %v3183_v39 = vor.u32 %v3445_v48, %v3182_v32  ;;  %1571 = vmatpush.bf16.msrb.mxu1 %v3055_v60  ;;  %v3338_v60 = vld [vmem:[#allocation2 + $0x74] sm:$0xf] }
  0xbe   :  { %1441 = vmatmul.bf16.gmra.mxu0 %v3869_v50  ;;  %v3894_v56 = vpack.c.bf16 %v617_v44, %v609_v41 }
  0xbf   :  { %v310_v5 = vpop.f32.mrf.mxu2  ;;  %1629 = vmatpush.bf16.msrb.mxu3 %v3183_v39 }
  0xc0   :  { %v334_v53 = vpop.f32.mrf.mxu3  ;;  %v601_v8 = vmax.f32 %v310_v5, 0.0  ;;  %1544 = vmatpush.bf16.msra.mxu0 %v2975_v11  ;;  %v3898_v59 = vpop.f32.mrf.mxu1  ;;  %v3443_v5 = vld [vmem:[#allocation2 + $0x3b4] sm:$0xf0] }
  0xc1   :  { %v255_v9 = vpop.f32.mrf.mxu0  ;;  %v586_v46 = vmax.f32 %v334_v53, 0.0 }
  0xc2   :  { %v3876_v13 = vpack.c.bf16 %v601_v8, %v593_v1  ;;  %v607_v31 = vmax.f32 %v255_v9, 0.0  ;;  %v3175_v8 = vor.u32 %v3443_v5, %v3174_v4  ;;  %v3046_v9 = vld [vmem:[#allocation2 + $0x2b0] sm:$0xf]  ;;  %v3407_v5 = vld [vmem:[#allocation2 + $0x294] sm:$0xf0] }
  0xc3   :  { %v3892_v55 = vpack.c.bf16 %v586_v46, %v578_v45  ;;  %v3047_v15 = vor.u32 %v3411_v63, %v3046_v9  ;;  %v3158_v45 = vld [vmem:[#allocation2 + $0x390] sm:$0xf]  ;;  %v3439_v46 = vld [vmem:[#allocation2 + $0x394] sm:$0xf0]  ;;  %v3437_v9 = vld [vmem:[#allocation2 + $0x384] sm:$0xf0] }
  0xc4   :  { %1499 = vmatmul.bf16.gmra.mxu2 %v3876_v13  ;;  %1545 = vmatpush.bf16.msra.mxu0 %v2967_v22  ;;  %v2888_v22 = vld [vmem:[#allocation2 + $0x178] sm:$0xf0]  ;;  %v3030_v4 = vld [vmem:[#allocation2 + $0x290] sm:$0xf]  ;;  %v3364_v63 = vld [vmem:[#allocation2 + $0x144] sm:$0xf] }
  0xc5   :  { %1518 = vmatmul.bf16.vlgmr.msra.gmra.mxu3 %v3874_v12  ;;  %1572 = vmatpush.bf16.msrb.mxu1 %v3047_v15 }
  0xc6   :  { %1630 = vmatpush.bf16.msrb.mxu3 %v3175_v8  ;;  %v3150_v8 = vld [vmem:[#allocation2 + $0x380] sm:$0xf] }
  0xc7   :  { %v414_v25 = vpop.f32.mrf.mxu2 }
  0xc8   :  { %v3882_v24 = vpop.f32.mrf.mxu3  ;;  %1546 = vmatpush.bf16.msra.mxu0 %v2959_v34  ;;  %v565_v53 = vmax.f32 %v414_v25, 0.0  ;;  %v3912_v19 = vpop.f32.mrf.mxu1  ;;  %v2891_v25 = vor.u32 %v3370_v21, %v2888_v22  ;;  %v3368_v34 = vld [vmem:[#allocation2 + $0x164] sm:$0xf] }
  0xc9   :  { %v257_v26 = vpop.f32.mrf.mxu0  ;;  %v594_v10 = vmax.f32 %v3882_v24, 0.0  ;;  %v3166_v24 = vld [vmem:[#allocation2 + $0x3a0] sm:$0xf]  ;;  %v2883_v30 = vor.u32 %v3368_v34, %v2880_v36 }
  0xca   :  { %v615_v33 = vmax.f32 %v257_v26, 0.0  ;;  %v3441_v26 = vld [vmem:[#allocation2 + $0x3a4] sm:$0xf0]  ;;  %1713 = vmatpush.bf16.msra.mxu2 %v2891_v25  ;;  %v3362_v25 = vld [vmem:[#allocation2 + $0x134] sm:$0xf] }
  0xcb   :  { %v3167_v29 = vor.u32 %v3441_v26, %v3166_v24  ;;  %v2856_v24 = vld [vmem:[#allocation2 + $0x138] sm:$0xf0] }
  0xcc   :  { %v3884_v35 = vpack.c.bf16 %v615_v33, %v607_v31  ;;  %v3409_v31 = vld [vmem:[#allocation2 + $0x2a4] sm:$0xf0]  ;;  %v2859_v26 = vor.u32 %v3362_v25, %v2856_v24 }
  0xcd   :  { %v3039_v33 = vor.u32 %v3409_v31, %v3038_v28  ;;  %1631 = vmatpush.bf16.msrb.mxu3 %v3167_v29  ;;  %v3022_v29 = vld [vmem:[#allocation2 + $0x280] sm:$0xf]  ;;  %v3405_v31 = vld [vmem:[#allocation2 + $0x284] sm:$0xf0] }
  0xce   :  { %1446 = vmatmul.bf16.gmra.mxu0 %v3884_v35  ;;  %1714 = vmatpush.bf16.msra.mxu2 %v2883_v30  ;;  %v3023_v36 = vor.u32 %v3405_v31, %v3022_v29  ;;  %v2848_v30 = vld [vmem:[#allocation2 + $0x128] sm:$0xf0] }
  0xcf   :  { %v416_v51 = vpop.f32.mrf.mxu2  ;;  %1573 = vmatpush.bf16.msrb.mxu1 %v3039_v33  ;;  %v3334_v33 = vld [vmem:[#allocation2 + $0x54] sm:$0xf]  ;;  %v2720_v29 = vld [vmem:[#allocation2 + $0x28] sm:$0xf0] }
  0xd0   :  { %v339_v49 = vpop.f32.mrf.mxu3  ;;  %v573_v7 = vmax.f32 %v416_v51, 0.0  ;;  %v3366_v51 = vld [vmem:[#allocation2 + $0x154] sm:$0xf]  ;;  %v3922_v32 = vpop.f32.mrf.mxu1  ;;  %v2747_v43 = vor.u32 %v3334_v33, %v2744_v37  ;;  %v3384_v33 = vld [vmem:[#allocation2 + $0x1e4] sm:$0xf] }
  0xd1   :  { %v269_v54 = vpop.f32.mrf.mxu0  ;;  %v602_v11 = vmax.f32 %v339_v49, 0.0  ;;  %v3159_v49 = vor.u32 %v3439_v46, %v3158_v45  ;;  %v600_v45 = vmax.f32 %v3912_v19, 0.0  ;;  %v3358_v19 = vld [vmem:[#allocation2 + $0x114] sm:$0xf] }
  0xd2   :  { %v560_v1 = vmax.f32 %v269_v54, 0.0  ;;  %v3910_v17 = vpack.c.bf16 %v573_v7, %v565_v53  ;;  %v2872_v54 = vld [vmem:[#allocation2 + $0x158] sm:$0xf0]  ;;  %v3031_v7 = vor.u32 %v3407_v5, %v3030_v4 }
  0xd3   :  { %v3914_v20 = vpack.c.bf16 %v602_v11, %v594_v10  ;;  %v2875_v48 = vor.u32 %v3366_v51, %v2872_v54  ;;  %1632 = vmatpush.bf16.msrb.mxu3 %v3159_v49  ;;  %v3151_v10 = vor.u32 %v3437_v9, %v3150_v8  ;;  %v2864_v11 = vld [vmem:[#allocation2 + $0x148] sm:$0xf0]  ;;  %v3332_v54 = vld [vmem:[#allocation2 + $0x44] sm:$0xf]  ;;  %v2840_v4 = vld [vmem:[#allocation2 + $0x118] sm:$0xf0] }
  0xd4   :  { %1504 = vmatmul.bf16.gmra.mxu2 %v3894_v56  ;;  %1574 = vmatpush.bf16.msrb.mxu1 %v3031_v7  ;;  %v2843_v7 = vor.u32 %v3358_v19, %v2840_v4  ;;  %v3330_v8 = vld [vmem:[#allocation2 + $0x34] sm:$0xf]  ;;  %v2728_v9 = vld [vmem:[#allocation2 + $0x38] sm:$0xf0] }
  0xd5   :  { %1523 = vmatmul.bf16.gmra.mxu3 %v3892_v55  ;;  %1715 = vmatpush.bf16.msra.mxu2 %v2875_v48  ;;  %v2736_v48 = vld [vmem:[#allocation2 + $0x48] sm:$0xf0]  ;;  %v3382_v19 = vld [vmem:[#allocation2 + $0x1d4] sm:$0xf]  ;;  %v2936_v4 = vld [vmem:[#allocation2 + $0x1d8] sm:$0xf0] }
  0xd7   :  { %v3902_v62 = vpop.f32.mrf.mxu2  ;;  %1633 = vmatpush.bf16.msrb.mxu3 %v3151_v10  ;;  %v2824_v10 = vld [vmem:[#allocation2 + $0xf8] sm:$0xf0] }
  0xd8   :  { %v3900_v61 = vpop.f32.mrf.mxu3  ;;  %v581_v39 = vmax.f32 %v3902_v62, 0.0  ;;  %v3943_v28 = vpop.f32.mrf.mxu1  ;;  %1575 = vmatpush.bf16.msrb.mxu1 %v3023_v36  ;;  %v3352_v36 = vld [vmem:[#allocation2 + $0xe4] sm:$0xf] }
  0xd9   :  { %v271_v0 = vpop.f32.mrf.mxu0 }
  0xda   :  { %v568_v2 = vmax.f32 %v271_v0, 0.0  ;;  %v2760_v0 = vld [vmem:[#allocation2 + $0x78] sm:$0xf0] }
  0xdb   :  { %v2763_v53 = vor.u32 %v3338_v60, %v2760_v0  ;;  %v3386_v60 = vld [vmem:[#allocation2 + $0x1f4] sm:$0xf]  ;;  %v2952_v0 = vld [vmem:[#allocation2 + $0x1f8] sm:$0xf0] }
  0xdc   :  { %v3904_v3 = vpack.c.bf16 %v568_v2, %v560_v1  ;;  %v610_v1 = vmax.f32 %v3900_v61, 0.0 }
  0xdd   :  { %1655 = vmatpush.bf16.msrb.mxu0 %v2763_v53 }
  0xde   :  { %1460 = vmatmul.bf16.vlgmr.msra.gmra.mxu1 %v3904_v3 }
  0xdf   :  { %v421_v27 = vpop.f32.mrf.mxu2 }
  0xe0   :  { %v3908_v16 = vpop.f32.mrf.mxu3  ;;  %v589_v58 = vmax.f32 %v421_v27, 0.0  ;;  %v2752_v27 = vld [vmem:[#allocation2 + $0x68] sm:$0xf0] }
  0xe1   :  { %v356_v18 = vpop.f32.mrf.mxu0  ;;  %v618_v2 = vmax.f32 %v3908_v16, 0.0  ;;  %v2867_v16 = vor.u32 %v3364_v63, %v2864_v11  ;;  %v3354_v63 = vld [vmem:[#allocation2 + $0xf4] sm:$0xf]  ;;  %v2731_v11 = vor.u32 %v3330_v8, %v2728_v9 }
  0xe2   :  { %v563_v41 = vmax.f32 %v356_v18, 0.0  ;;  %v3937_v61 = vpack.c.bf16 %v589_v58, %v581_v39  ;;  %v3336_v18 = vld [vmem:[#allocation2 + $0x64] sm:$0xf]  ;;  %v2739_v58 = vor.u32 %v3332_v54, %v2736_v48  ;;  %v616_v54 = vmax.f32 %v3943_v28, 0.0  ;;  %v3350_v28 = vld [vmem:[#allocation2 + $0xd4] sm:$0xf] }
  0xe3   :  { %v2755_v21 = vor.u32 %v3336_v18, %v2752_v27  ;;  %v3939_v22 = vpack.c.bf16 %v618_v2, %v610_v1  ;;  %1716 = vmatpush.bf16.msra.mxu2 %v2867_v16  ;;  %v2827_v16 = vor.u32 %v3354_v63, %v2824_v10  ;;  %v3356_v18 = vld [vmem:[#allocation2 + $0x104] sm:$0xf]  ;;  %v2832_v27 = vld [vmem:[#allocation2 + $0x108] sm:$0xf0] }
  0xe4   :  { %1605 = vmatmul.bf16.vlgmr.msrb.gmra.mxu2 %v3910_v17  ;;  %v2835_v25 = vor.u32 %v3356_v18, %v2832_v27  ;;  %v3380_v27 = vld [vmem:[#allocation2 + $0x1c4] sm:$0xf] }
  0xe5   :  { %1528 = vmatmul.bf16.gmra.mxu3 %v3914_v20  ;;  %1656 = vmatpush.bf16.msrb.mxu0 %v2755_v21 }
  0xe6   :  { %1684 = vmatpush.bf16.msra.mxu1 %v2827_v16 }
  0xe7   :  { %v3928_v57 = vpop.f32.mrf.mxu2  ;;  %1717 = vmatpush.bf16.msra.mxu2 %v2859_v26  ;;  %v3328_v26 = vld [vmem:[#allocation2 + $0x24] sm:$0xf] }
  0xe8   :  { %v3920_v42 = vpop.f32.mrf.mxu3  ;;  %v597_v5 = vmax.f32 %v3928_v57, 0.0  ;;  %v2723_v31 = vor.u32 %v3328_v26, %v2720_v29  ;;  %v2800_v29 = vld [vmem:[#allocation2 + $0xc8] sm:$0xf0] }
  0xe9   :  { %v358_v44 = vpop.f32.mrf.mxu0  ;;  %1657 = vmatpush.bf16.msrb.mxu0 %v2747_v43  ;;  %v2816_v43 = vld [vmem:[#allocation2 + $0xe8] sm:$0xf0] }
  0xea   :  { %v571_v47 = vmax.f32 %v358_v44, 0.0  ;;  %v592_v44 = vmax.f32 %v3898_v59, 0.0  ;;  %v2955_v59 = vor.u32 %v3386_v60, %v2952_v0  ;;  %v2704_v60 = vld [vmem:[#allocation2 + $0x8] sm:$0xf0] }
  0xec   :  { %v3924_v14 = vpack.c.bf16 %v571_v47, %v563_v41  ;;  %v3360_v41 = vld [vmem:[#allocation2 + $0x124] sm:$0xf]  ;;  %v3951_v2 = vpack.c.bf16 %v600_v45, %v592_v44  ;;  %1742 = vmatpush.bf16.msra.mxu3 %v2955_v59  ;;  %v2819_v44 = vor.u32 %v3352_v36, %v2816_v43 }
  0xed   :  { %v2851_v49 = vor.u32 %v3360_v41, %v2848_v30  ;;  %1658 = vmatpush.bf16.msrb.mxu0 %v2739_v58  ;;  %v3326_v41 = vld [vmem:[#allocation2 + $0x14] sm:$0xf]  ;;  %v2712_v30 = vld [vmem:[#allocation2 + $0x18] sm:$0xf0]  ;;  %v3324_v58 = vld [vmem:[#allocation2 + $0x4] sm:$0xf] }
  0xee   :  { %1465 = vmatmul.bf16.gmra.mxu1 %v3926_v38  ;;  %1547 = vmatmul.bf16.vlgmr.msra.gmra.mxu0 %v3924_v14  ;;  %v2715_v45 = vor.u32 %v3326_v41, %v2712_v30  ;;  %v2707_v59 = vor.u32 %v3324_v58, %v2704_v60  ;;  %v3378_v41 = vld [vmem:[#allocation2 + $0x1b4] sm:$0xf]  ;;  %v2920_v30 = vld [vmem:[#allocation2 + $0x1b8] sm:$0xf0] }
  0xef   :  { %v426_v34 = vpop.f32.mrf.mxu2  ;;  %1718 = vmatpush.bf16.msra.mxu2 %v2851_v49  ;;  %1685 = vmatpush.bf16.msra.mxu1 %v2819_v44  ;;  %v3434_v60 = vld [vmem:[#allocation2 + $0x374] sm:$0xf] }
  0xf0   :  { %v3935_v62 = vpop.f32.mrf.mxu3  ;;  %v605_v53 = vmax.f32 %v426_v34, 0.0  ;;  %v2944_v34 = vld [vmem:[#allocation2 + $0x1e8] sm:$0xf0] }
  0xf1   :  { %v361_v15 = vpop.f32.mrf.mxu0  ;;  %1659 = vmatpush.bf16.msrb.mxu0 %v2731_v11  ;;  %v2947_v37 = vor.u32 %v3384_v33, %v2944_v34  ;;  %v603_v49 = vmax.f32 %v3935_v62, 0.0  ;;  %v2939_v62 = vor.u32 %v3382_v19, %v2936_v4  ;;  %v3376_v19 = vld [vmem:[#allocation2 + $0x1a4] sm:$0xf]  ;;  %v2912_v4 = vld [vmem:[#allocation2 + $0x1a8] sm:$0xf0] }
  0xf2   :  { %v579_v46 = vmax.f32 %v361_v15, 0.0  ;;  %v3956_v15 = vpop.f32.mrf.mxu1  ;;  %v3960_v24 = vpack.c.bf16 %v605_v53, %v597_v5 }
  0xf3   :  { %1719 = vmatpush.bf16.msra.mxu2 %v2843_v7  ;;  %1743 = vmatpush.bf16.msra.mxu3 %v2947_v37  ;;  %v2808_v7 = vld [vmem:[#allocation2 + $0xd8] sm:$0xf0]  ;;  %v564_v36 = vmax.f32 %v3956_v15, 0.0 }
  0xf4   :  { %1610 = vmatmul.bf16.gmra.mxu2 %v3937_v61  ;;  %v2811_v9 = vor.u32 %v3350_v28, %v2808_v7  ;;  %v2792_v15 = vld [vmem:[#allocation2 + $0xb8] sm:$0xf0] }
  0xf5   :  { %1533 = vmatmul.bf16.gmra.mxu3 %v3939_v22  ;;  %1660 = vmatpush.bf16.msrb.mxu0 %v2723_v31 }
  0xf6   :  { %1686 = vmatpush.bf16.msra.mxu1 %v2811_v9  ;;  %v3432_v9 = vld [vmem:[#allocation2 + $0x364] sm:$0xf] }
  0xf7   :  { %v429_v21 = vpop.f32.mrf.mxu2  ;;  %1720 = vmatpush.bf16.msra.mxu2 %v2835_v25  ;;  %1744 = vmatpush.bf16.msra.mxu3 %v2939_v62  ;;  %v3348_v25 = vld [vmem:[#allocation2 + $0xc4] sm:$0xf] }
  0xf8   :  { %v3947_v47 = vpop.f32.mrf.mxu3  ;;  %v613_v53 = vmax.f32 %v429_v21, 0.0  ;;  %v2928_v21 = vld [vmem:[#allocation2 + $0x1c8] sm:$0xf0]  ;;  %v2803_v31 = vor.u32 %v3348_v25, %v2800_v29  ;;  %v3344_v62 = vld [vmem:[#allocation2 + $0xa4] sm:$0xf] }
  0xf9   :  { %v363_v51 = vpop.f32.mrf.mxu0  ;;  %1661 = vmatpush.bf16.msrb.mxu0 %v2715_v45  ;;  %v2931_v26 = vor.u32 %v3380_v27, %v2928_v21  ;;  %v611_v33 = vmax.f32 %v3947_v47, 0.0  ;;  %v3346_v47 = vld [vmem:[#allocation2 + $0xb4] sm:$0xf]  ;;  %v2904_v29 = vld [vmem:[#allocation2 + $0x198] sm:$0xf0] }
  0xfa   :  { %v587_v39 = vmax.f32 %v363_v51, 0.0  ;;  %v608_v51 = vmax.f32 %v3922_v32, 0.0  ;;  %1687 = vmatpush.bf16.msra.mxu1 %v2803_v31  ;;  %v3430_v31 = vld [vmem:[#allocation2 + $0x354] sm:$0xf] }
  0xfb   :  { %1745 = vmatpush.bf16.msra.mxu3 %v2931_v26  ;;  %v3374_v26 = vld [vmem:[#allocation2 + $0x194] sm:$0xf] }
  0xfc   :  { %v3949_v1 = vpack.c.bf16 %v587_v39, %v579_v46  ;;  %v595_v46 = vmax.f32 %v3920_v42, 0.0  ;;  %v387_v39 = vpop.f32.mrf.mxu1  ;;  %v3969_v42 = vpack.c.bf16 %v616_v54, %v608_v51  ;;  %v2795_v54 = vor.u32 %v3346_v47, %v2792_v15  ;;  %v3372_v15 = vld [vmem:[#allocation2 + $0x184] sm:$0xf] }
  0xfd   :  { %1662 = vmatpush.bf16.msrb.mxu0 %v2707_v59  ;;  %v572_v37 = vmax.f32 %v387_v39, 0.0 }
  0xfe   :  { %1470 = vmatmul.bf16.gmra.mxu1 %v3951_v2  ;;  %1552 = vmatmul.bf16.gmra.mxu0 %v3949_v1  ;;  %v3967_v5 = vpack.c.bf16 %v603_v49, %v595_v46  ;;  %v2923_v46 = vor.u32 %v3378_v41, %v2920_v30  ;;  %v3016_v41 = vld [vmem:[#allocation2 + $0x278] sm:$0xf0] }
  0xff   :  { %v431_v0 = vpop.f32.mrf.mxu2  ;;  %v3984_v45 = vpack.c.bf16 %v572_v37, %v564_v36  ;;  %1688 = vmatpush.bf16.msra.mxu1 %v2795_v54  ;;  %v3128_v36 = vld [vmem:[#allocation2 + $0x358] sm:$0xf0]  ;;  %v3428_v54 = vld [vmem:[#allocation2 + $0x344] sm:$0xf] }
 0x100   :  { %v3958_v57 = vpop.f32.mrf.mxu3  ;;  %v621_v32 = vmax.f32 %v431_v0, 0.0  ;;  %1746 = vmatpush.bf16.msra.mxu3 %v2923_v46  ;;  %v3144_v0 = vld [vmem:[#allocation2 + $0x378] sm:$0xf0]  ;;  %v3131_v37 = vor.u32 %v3430_v31, %v3128_v36  ;;  %v3104_v36 = vld [vmem:[#allocation2 + $0x328] sm:$0xf0] }
 0x101   :  { %v619_v34 = vmax.f32 %v3958_v57, 0.0  ;;  %v3147_v59 = vor.u32 %v3434_v60, %v3144_v0  ;;  %v2776_v46 = vld [vmem:[#allocation2 + $0x98] sm:$0xf0]  ;;  %v3120_v0 = vld [vmem:[#allocation2 + $0x348] sm:$0xf0] }
 0x102   :  { %v3973_v10 = vpack.c.bf16 %v621_v32, %v613_v53  ;;  %v2915_v53 = vor.u32 %v3376_v19, %v2912_v4  ;;  %v2784_v32 = vld [vmem:[#allocation2 + $0xa8] sm:$0xf0] }
 0x103   :  { %v3982_v44 = vpack.c.bf16 %v619_v34, %v611_v33  ;;  %1829 = vmatpush.bf16.msrb.mxu2 %v3147_v59  ;;  %v2907_v34 = vor.u32 %v3374_v26, %v2904_v29  ;;  %v3000_v29 = vld [vmem:[#allocation2 + $0x258] sm:$0xf0] }
 0x104   :  { %1615 = vmatmul.bf16.gmra.mxu2 %v3960_v24  ;;  %v390_v18 = vpop.f32.mrf.mxu1  ;;  %1747 = vmatpush.bf16.msra.mxu3 %v2915_v53  ;;  %v3008_v53 = vld [vmem:[#allocation2 + $0x268] sm:$0xf0] }
 0x108   :  { %v443_v48 = vpop.f32.mrf.mxu3  ;;  %1748 = vmatpush.bf16.msra.mxu3 %v2907_v34  ;;  %v3424_v34 = vld [vmem:[#allocation2 + $0x324] sm:$0xf] }
 0x109   :  { %v566_v8 = vmax.f32 %v443_v48, 0.0 }
 0x10c   :  { %v392_v51 = vpop.f32.mrf.mxu1 }
 0x10d   :  { %v588_v27 = vmax.f32 %v392_v51, 0.0 }
 0x10e   :  { %1475 = vmatmul.bf16.gmra.mxu1 %v3969_v42  ;;  %1557 = vmatmul.bf16.gmra.mxu0 %v3967_v5 }
 0x110   :  { %v445_v63 = vpop.f32.mrf.mxu3 }
 0x111   :  { %v574_v11 = vmax.f32 %v445_v63, 0.0  ;;  %v3136_v63 = vld [vmem:[#allocation2 + $0x368] sm:$0xf0] }
 0x113   :  { %v3975_v16 = vpack.c.bf16 %v574_v11, %v566_v8  ;;  %v2787_v8 = vor.u32 %v3344_v62, %v2784_v32  ;;  %v580_v11 = vmax.f32 %v390_v18, 0.0  ;;  %v3342_v18 = vld [vmem:[#allocation2 + $0x94] sm:$0xf]  ;;  %v3400_v62 = vld [vmem:[#allocation2 + $0x264] sm:$0xf] }
 0x114   :  { %1620 = vmatmul.bf16.gmra.mxu2 %v3973_v10  ;;  %v3996_v7 = vpop.f32.mrf.mxu1  ;;  %v2779_v47 = vor.u32 %v3342_v18, %v2776_v46  ;;  %v3011_v32 = vor.u32 %v3400_v62, %v3008_v53  ;;  %v3107_v18 = vor.u32 %v3424_v34, %v3104_v36  ;;  %v3396_v46 = vld [vmem:[#allocation2 + $0x244] sm:$0xf]  ;;  %v3418_v62 = vld [vmem:[#allocation2 + $0x2f4] sm:$0xf]  ;;  %v2976_v34 = vld [vmem:[#allocation2 + $0x228] sm:$0xf0] }
 0x115   :  { %1634 = vmatmul.bf16.vlgmr.msrb.gmra.mxu3 %v3975_v16  ;;  %1689 = vmatpush.bf16.msra.mxu1 %v2787_v8  ;;  %v4000_v33 = vpack.c.bf16 %v588_v27, %v580_v11  ;;  %v3340_v27 = vld [vmem:[#allocation2 + $0x84] sm:$0xf] }
 0x118   :  { %v448_v43 = vpop.f32.mrf.mxu3 }
 0x119   :  { %v582_v57 = vmax.f32 %v448_v43, 0.0  ;;  %v3402_v43 = vld [vmem:[#allocation2 + $0x274] sm:$0xf]  ;;  %1690 = vmatpush.bf16.msra.mxu1 %v2779_v47 }
 0x11a   :  { %v3019_v51 = vor.u32 %v3402_v43, %v3016_v41 }
 0x11b   :  { %v3986_v49 = vpop.f32.mrf.mxu0 }
 0x11c   :  { %1771 = vmatpush.bf16.msra.mxu0 %v3019_v51  ;;  %v397_v4 = vpop.f32.mrf.mxu1 }
 0x11d   :  { %v604_v43 = vmax.f32 %v397_v4, 0.0  ;;  %v3450_v4 = vld [vmem:[#allocation2 + $0x3f4] sm:$0xf] }
 0x11e   :  { %1562 = vmatmul.bf16.gmra.mxu0 %v3982_v44  ;;  %1576 = vmatmul.bf16.vlgmr.msrb.gmra.mxu1 %v3984_v45 }
 0x120   :  { %v450_v48 = vpop.f32.mrf.mxu3  ;;  %1772 = vmatpush.bf16.msra.mxu0 %v3011_v32 }
 0x121   :  { %v590_v39 = vmax.f32 %v450_v48, 0.0 }
 0x123   :  { %v3990_v58 = vpack.c.bf16 %v590_v39, %v582_v57  ;;  %v3994_v28 = vpop.f32.mrf.mxu0  ;;  %v2896_v57 = vld [vmem:[#allocation2 + $0x188] sm:$0xf0] }
 0x124   :  { %1721 = vmatmul.bf16.vlgmr.msra.gmra.mxu2 %v3850_v52  ;;  %v3139_v52 = vor.u32 %v3432_v9, %v3136_v63  ;;  %v2899_v60 = vor.u32 %v3372_v15, %v2896_v57  ;;  %v3426_v9 = vld [vmem:[#allocation2 + $0x334] sm:$0xf]  ;;  %v3112_v63 = vld [vmem:[#allocation2 + $0x338] sm:$0xf0]  ;;  %v400_v15 = vpop.f32.mrf.mxu1 }
 0x125   :  { %1639 = vmatmul.bf16.gmra.mxu3 %v3990_v58  ;;  %v3115_v11 = vor.u32 %v3426_v9, %v3112_v63  ;;  %v3422_v57 = vld [vmem:[#allocation2 + $0x314] sm:$0xf]  ;;  %v3080_v9 = vld [vmem:[#allocation2 + $0x2f8] sm:$0xf0]  ;;  %v3420_v63 = vld [vmem:[#allocation2 + $0x304] sm:$0xf] }
 0x126   :  { %1830 = vmatpush.bf16.msrb.mxu2 %v3139_v52  ;;  %1749 = vmatpush.bf16.msra.mxu3 %v2899_v60  ;;  %v3398_v52 = vld [vmem:[#allocation2 + $0x254] sm:$0xf] }
 0x127   :  { %v3998_v25 = vpop.f32.mrf.mxu2  ;;  %v3003_v31 = vor.u32 %v3398_v52, %v3000_v29  ;;  %v3083_v52 = vor.u32 %v3418_v62, %v3080_v9  ;;  %v2960_v62 = vld [vmem:[#allocation2 + $0x208] sm:$0xf0]  ;;  %v3446_v9 = vld [vmem:[#allocation2 + $0x3d4] sm:$0xf] }
 0x128   :  { %v453_v21 = vpop.f32.mrf.mxu3 }
 0x129   :  { %v598_v30 = vmax.f32 %v453_v21, 0.0  ;;  %v2768_v21 = vld [vmem:[#allocation2 + $0x88] sm:$0xf0]  ;;  %1773 = vmatpush.bf16.msra.mxu0 %v3003_v31  ;;  %v3392_v31 = vld [vmem:[#allocation2 + $0x224] sm:$0xf] }
 0x12a   :  { %1831 = vmatpush.bf16.msrb.mxu2 %v3131_v37  ;;  %v2771_v26 = vor.u32 %v3340_v27, %v2768_v21  ;;  %v596_v37 = vmax.f32 %v3996_v7, 0.0 }
 0x12b   :  { %v4006_v59 = vpop.f32.mrf.mxu0 }
 0x12c   :  { %1691 = vmatpush.bf16.msra.mxu1 %v2771_v26 }
 0x12e   :  { %1581 = vmatmul.bf16.gmra.mxu1 %v4000_v33  ;;  %1663 = vmatmul.bf16.vlgmr.msrb.gmra.mxu0 %v3845_v40  ;;  %v3123_v40 = vor.u32 %v3428_v54, %v3120_v0  ;;  %v3096_v54 = vld [vmem:[#allocation2 + $0x318] sm:$0xf0]  ;;  %v3394_v0 = vld [vmem:[#allocation2 + $0x234] sm:$0xf] }
 0x12f   :  { %v4004_v39 = vpop.f32.mrf.mxu2  ;;  %v3099_v60 = vor.u32 %v3422_v57, %v3096_v54 }
 0x130   :  { %v455_v48 = vpop.f32.mrf.mxu3  ;;  %1832 = vmatpush.bf16.msrb.mxu2 %v3123_v40  ;;  %v3208_v40 = vld [vmem:[#allocation2 + $0x3f8] sm:$0xf0]  ;;  %1800 = vmatpush.bf16.msrb.mxu1 %v3083_v52 }
 0x131   :  { %v606_v19 = vmax.f32 %v455_v48, 0.0  ;;  %v4017_v48 = vpack.c.bf16 %v604_v43, %v596_v37  ;;  %v3211_v32 = vor.u32 %v3450_v4, %v3208_v40  ;;  %v402_v43 = vpop.f32.mrf.mxu1  ;;  %v3388_v40 = vld [vmem:[#allocation2 + $0x204] sm:$0xf]  ;;  %v3064_v52 = vld [vmem:[#allocation2 + $0x2d8] sm:$0xf0] }
 0x133   :  { %v4008_v8 = vpack.c.bf16 %v606_v19, %v598_v30  ;;  %v4015_v47 = vpop.f32.mrf.mxu0  ;;  %v2984_v19 = vld [vmem:[#allocation2 + $0x238] sm:$0xf0]  ;;  %1858 = vmatpush.bf16.msrb.mxu3 %v3211_v32 }
 0x134   :  { %1726 = vmatmul.bf16.gmra.mxu2 %v3862_v23  ;;  %v2992_v23 = vld [vmem:[#allocation2 + $0x248] sm:$0xf0]  ;;  %v2987_v53 = vor.u32 %v3394_v0, %v2984_v19  ;;  %v612_v0 = vmax.f32 %v400_v15, 0.0  ;;  %v3414_v15 = vld [vmem:[#allocation2 + $0x2d4] sm:$0xf] }
 0x135   :  { %1644 = vmatmul.bf16.gmra.mxu3 %v4008_v8  ;;  %1833 = vmatpush.bf16.msrb.mxu2 %v3115_v11  ;;  %v2995_v51 = vor.u32 %v3396_v46, %v2992_v23  ;;  %v3088_v11 = vld [vmem:[#allocation2 + $0x308] sm:$0xf0]  ;;  %v3448_v46 = vld [vmem:[#allocation2 + $0x3e4] sm:$0xf] }
 0x136   :  { %v3091_v26 = vor.u32 %v3420_v63, %v3088_v11  ;;  %v3200_v23 = vld [vmem:[#allocation2 + $0x3e8] sm:$0xf0]  ;;  %v3192_v63 = vld [vmem:[#allocation2 + $0x3d8] sm:$0xf0] }
 0x137   :  { %v4013_v30 = vpop.f32.mrf.mxu2  ;;  %1774 = vmatpush.bf16.msra.mxu0 %v2995_v51  ;;  %v3416_v51 = vld [vmem:[#allocation2 + $0x2e4] sm:$0xf]  ;;  %v3203_v54 = vor.u32 %v3448_v46, %v3200_v23 }
 0x138   :  { %v458_v41 = vpop.f32.mrf.mxu3 }
 0x139   :  { %1834 = vmatpush.bf16.msrb.mxu2 %v3107_v18  ;;  %v614_v7 = vmax.f32 %v458_v41, 0.0  ;;  %v3390_v41 = vld [vmem:[#allocation2 + $0x214] sm:$0xf]  ;;  %v2968_v18 = vld [vmem:[#allocation2 + $0x218] sm:$0xf0]  ;;  %1859 = vmatpush.bf16.msrb.mxu3 %v3203_v54 }
 0x13a   :  { %v2971_v57 = vor.u32 %v3390_v41, %v2968_v18  ;;  %v3056_v41 = vld [vmem:[#allocation2 + $0x2c8] sm:$0xf0] }
 0x13b   :  { %1775 = vmatpush.bf16.msra.mxu0 %v2987_v53  ;;  %v4025_v37 = vpop.f32.mrf.mxu0 }
 0x13d   :  { %1835 = vmatpush.bf16.msrb.mxu2 %v3099_v60  ;;  %v3072_v60 = vld [vmem:[#allocation2 + $0x2e8] sm:$0xf0] }
 0x13e   :  { %1586 = vmatmul.bf16.gmra.mxu1 %v4017_v48  ;;  %1668 = vmatmul.bf16.gmra.mxu0 %v3857_v6  ;;  %v2979_v6 = vor.u32 %v3392_v31, %v2976_v34  ;;  %v3075_v4 = vor.u32 %v3416_v51, %v3072_v60  ;;  %v3444_v34 = vld [vmem:[#allocation2 + $0x3c4] sm:$0xf]  ;;  %v3176_v60 = vld [vmem:[#allocation2 + $0x3b8] sm:$0xf0] }
 0x13f   :  { %v4021_v21 = vpop.f32.mrf.mxu2 }
 0x140   :  { %v460_v27 = vpop.f32.mrf.mxu3  ;;  %1776 = vmatpush.bf16.msra.mxu0 %v2979_v6  ;;  %1801 = vmatpush.bf16.msrb.mxu1 %v3075_v4  ;;  %v3412_v6 = vld [vmem:[#allocation2 + $0x2c4] sm:$0xf]  ;;  %v3048_v4 = vld [vmem:[#allocation2 + $0x2b8] sm:$0xf0] }
 0x141   :  { %v622_v29 = vmax.f32 %v460_v27, 0.0  ;;  %1836 = vmatpush.bf16.msrb.mxu2 %v3091_v26  ;;  %v3195_v27 = vor.u32 %v3446_v9, %v3192_v63  ;;  %v3059_v18 = vor.u32 %v3412_v6, %v3056_v41  ;;  %v3168_v63 = vld [vmem:[#allocation2 + $0x3a8] sm:$0xf0] }
 0x143   :  { %v4023_v36 = vpack.c.bf16 %v622_v29, %v614_v7  ;;  %v620_v7 = vmax.f32 %v402_v43, 0.0  ;;  %v4035_v11 = vpop.f32.mrf.mxu0  ;;  %v3067_v29 = vor.u32 %v3414_v15, %v3064_v52  ;;  %1860 = vmatpush.bf16.msrb.mxu3 %v3195_v27  ;;  %v3408_v15 = vld [vmem:[#allocation2 + $0x2a4] sm:$0xf]  ;;  %v3040_v27 = vld [vmem:[#allocation2 + $0x2a8] sm:$0xf0] }
 0x144   :  { %1731 = vmatmul.bf16.gmra.mxu2 %v3876_v13  ;;  %1777 = vmatpush.bf16.msra.mxu0 %v2971_v57  ;;  %v2963_v13 = vor.u32 %v3388_v40, %v2960_v62 }
 0x145   :  { %1649 = vmatmul.bf16.gmra.mxu3 %v4023_v36  ;;  %v4031_v32 = vpack.c.bf16 %v620_v7, %v612_v0  ;;  %1802 = vmatpush.bf16.msrb.mxu1 %v3067_v29  ;;  %v3410_v0 = vld [vmem:[#allocation2 + $0x2b4] sm:$0xf] }
 0x146   :  { %v3051_v62 = vor.u32 %v3410_v0, %v3048_v4 }
 0x147   :  { %v4029_v19 = vpop.f32.mrf.mxu2 }
 0x148   :  { %v1519_v53 = vpop.f32.mrf.mxu3  ;;  %1778 = vmatpush.bf16.msra.mxu0 %v2963_v13 }
 0x149   :  { %1803 = vmatpush.bf16.msrb.mxu1 %v3059_v18 }
 0x14b   :  { %v4041_v46 = vpop.f32.mrf.mxu0 }
 0x14d   :  { %1804 = vmatpush.bf16.msrb.mxu1 %v3051_v62 }
 0x14e   :  { %1591 = vmatmul.bf16.gmra.mxu1 %v4031_v32  ;;  %1673 = vmatmul.bf16.gmra.mxu0 %v3869_v50  ;;  %v3184_v50 = vld [vmem:[#allocation2 + $0x3c8] sm:$0xf0] }
 0x14f   :  { %v4037_v26 = vpop.f32.mrf.mxu2  ;;  %v3187_v43 = vor.u32 %v3444_v34, %v3184_v50  ;;  %v3043_v34 = vor.u32 %v3408_v15, %v3040_v27 }
 0x150   :  { %v1521_v31 = vpop.f32.mrf.mxu3 }
 0x151   :  { %1861 = vmatpush.bf16.msrb.mxu3 %v3187_v43  ;;  %1805 = vmatpush.bf16.msrb.mxu1 %v3043_v34  ;;  %v3160_v43 = vld [vmem:[#allocation2 + $0x398] sm:$0xf0] }
 0x153   :  { %v4049_v13 = vpop.f32.mrf.mxu0 }
 0x154   :  { %1736 = vmatmul.bf16.gmra.mxu2 %v3894_v56 }
 0x155   :  { %1750 = vmatmul.bf16.vlgmr.msra.gmra.mxu3 %v3874_v12  ;;  %v3442_v12 = vld [vmem:[#allocation2 + $0x3b4] sm:$0xf] }
 0x156   :  { %v3179_v7 = vor.u32 %v3442_v12, %v3176_v60  ;;  %v3152_v12 = vld [vmem:[#allocation2 + $0x388] sm:$0xf0] }
 0x157   :  { %v4043_v23 = vpop.f32.mrf.mxu2 }
 0x158   :  { %v1524_v54 = vpop.f32.mrf.mxu3  ;;  %1862 = vmatpush.bf16.msrb.mxu3 %v3179_v7 }
 0x15b   :  { %v1461_v51 = vpop.f32.mrf.mxu1 }
 0x15c   :  { %v1462_v57 = vadd.f32 %v1461_v51, %v3986_v49  ;;  %v3032_v51 = vld [vmem:[#allocation2 + $0x298] sm:$0xf0] }
 0x15e   :  { %v1491_v56 = vadd.f32 %v3998_v25, %v1462_v57  ;;  %1678 = vmatmul.bf16.gmra.mxu0 %v3884_v35  ;;  %1692 = vmatmul.bf16.vlgmr.msra.gmra.mxu1 %v3904_v3  ;;  %v3440_v3 = vld [vmem:[#allocation2 + $0x3a4] sm:$0xf] }
 0x15f   :  { %v4051_v49 = vpop.f32.mrf.mxu2 }
 0x160   :  { %v1520_v40 = vadd.f32 %v1519_v53, %v1491_v56  ;;  %v3171_v53 = vor.u32 %v3440_v3, %v3168_v63  ;;  %v1526_v52 = vpop.f32.mrf.mxu3  ;;  %v3436_v56 = vld [vmem:[#allocation2 + $0x384] sm:$0xf] }
 0x161   :  { %v3155_v0 = vor.u32 %v3436_v56, %v3152_v12 }
 0x162   :  { %1863 = vmatpush.bf16.msrb.mxu3 %v3171_v53 }
 0x163   :  { %v1463_v9 = vpop.f32.mrf.mxu1 }
 0x164   :  { %v1464_v25 = vadd.f32 %v1463_v9, %v3994_v28  ;;  %1837 = vmatmul.bf16.vlgmr.msrb.gmra.mxu2 %v3910_v17  ;;  %v3438_v28 = vld [vmem:[#allocation2 + $0x394] sm:$0xf] }
 0x165   :  { %1755 = vmatmul.bf16.gmra.mxu3 %v3892_v55 }
 0x166   :  { %v1493_v35 = vadd.f32 %v4004_v39, %v1464_v25  ;;  %v3163_v39 = vor.u32 %v3438_v28, %v3160_v43 }
 0x167   :  { %v4062_v41 = vpop.f32.mrf.mxu2 }
 0x168   :  { %v4057_v29 = vadd.f32 %v1521_v31, %v1493_v35  ;;  %v3406_v31 = vld [vmem:[#allocation2 + $0x294] sm:$0xf]  ;;  %1864 = vmatpush.bf16.msrb.mxu3 %v3163_v39 }
 0x169   :  { %v3035_v57 = vor.u32 %v3406_v31, %v3032_v51 }
 0x16b   :  { %v1466_v50 = vpop.f32.mrf.mxu1  ;;  %v1548_v6 = vpop.f32.mrf.mxu0  ;;  %1806 = vmatpush.bf16.msrb.mxu1 %v3035_v57 }
 0x16c   :  { %v1467_v55 = vadd.f32 %v1466_v50, %v4006_v59  ;;  %v4060_v17 = vadd.f32 %v1548_v6, %v1520_v40  ;;  %v1529_v59 = vpop.f32.mrf.mxu3  ;;  %1865 = vmatpush.bf16.msrb.mxu3 %v3155_v0 }
 0x16e   :  { %v1496_v18 = vadd.f32 %v4013_v30, %v1467_v55  ;;  %1697 = vmatmul.bf16.gmra.mxu1 %v3926_v38  ;;  %1779 = vmatmul.bf16.vlgmr.msra.gmra.mxu0 %v3924_v14  ;;  %v3404_v38 = vld [vmem:[#allocation2 + $0x284] sm:$0xf]  ;;  %v3024_v30 = vld [vmem:[#allocation2 + $0x288] sm:$0xf0] }
 0x16f   :  { %v3027_v62 = vor.u32 %v3404_v38, %v3024_v30  ;;  %v1608_v9 = vpop.f32.mrf.mxu2 }
 0x170   :  { %v1525_v60 = vadd.f32 %v1524_v54, %v1496_v18 }
 0x171   :  { %1807 = vmatpush.bf16.msrb.mxu1 %v3027_v62 }
 0x173   :  { %v1468_v7 = vpop.f32.mrf.mxu1  ;;  %v1550_v4 = vpop.f32.mrf.mxu0 }
 0x174   :  { %v1469_v40 = vadd.f32 %v1468_v7, %v4015_v47  ;;  %1842 = vmatmul.bf16.gmra.mxu2 %v3937_v61  ;;  %v1531_v3 = vpop.f32.mrf.mxu3 }
 0x175   :  { %1760 = vmatmul.bf16.gmra.mxu3 %v3914_v20 }
 0x176   :  { %v1498_v14 = vadd.f32 %v4021_v21, %v1469_v40 }
 0x177   :  { %v1611_v61 = vpop.f32.mrf.mxu2 }
 0x178   :  { %v4071_v25 = vadd.f32 %v1526_v52, %v1498_v14 }
 0x17b   :  { %v1471_v54 = vpop.f32.mrf.mxu1  ;;  %v1553_v35 = vpop.f32.mrf.mxu0 }
 0x17c   :  { %v1472_v63 = vadd.f32 %v1471_v54, %v4025_v37  ;;  %v1554_v15 = vadd.f32 %v1553_v35, %v1525_v60  ;;  %v1534_v52 = vpop.f32.mrf.mxu3 }
 0x17e   :  { %v1501_v47 = vadd.f32 %v4029_v19, %v1472_v63  ;;  %1702 = vmatmul.bf16.gmra.mxu1 %v3951_v2  ;;  %1784 = vmatmul.bf16.gmra.mxu0 %v3949_v1 }
 0x17f   :  { %v1613_v1 = vpop.f32.mrf.mxu2 }
 0x180   :  { %v1530_v20 = vadd.f32 %v1529_v59, %v1501_v47 }
 0x183   :  { %v1473_v21 = vpop.f32.mrf.mxu1  ;;  %v1555_v53 = vpop.f32.mrf.mxu0 }
 0x184   :  { %v1474_v27 = vadd.f32 %v1473_v21, %v4035_v11  ;;  %1847 = vmatmul.bf16.gmra.mxu2 %v3960_v24  ;;  %v1536_v11 = vpop.f32.mrf.mxu3 }
 0x185   :  { %1765 = vmatmul.bf16.gmra.mxu3 %v3939_v22 }
 0x186   :  { %v1503_v37 = vadd.f32 %v4037_v26, %v1474_v27 }
 0x188   :  { %v1532_v34 = vadd.f32 %v1531_v3, %v1503_v37 }
 0x18b   :  { %v1476_v50 = vpop.f32.mrf.mxu1  ;;  %v1558_v19 = vpop.f32.mrf.mxu0 }
 0x18c   :  { %v1477_v2 = vadd.f32 %v1476_v50, %v4041_v46  ;;  %v1559_v6 = vadd.f32 %v1558_v19, %v1530_v20  ;;  %v1616_v46 = vpop.f32.mrf.mxu2 }
 0x18e   :  { %v1506_v28 = vadd.f32 %v4043_v23, %v1477_v2  ;;  %1707 = vmatmul.bf16.gmra.mxu1 %v3969_v42  ;;  %1789 = vmatmul.bf16.gmra.mxu0 %v3967_v5 }
 0x190   :  { %v1535_v22 = vadd.f32 %v1534_v52, %v1506_v28 }
 0x193   :  { %v1478_v43 = vpop.f32.mrf.mxu1  ;;  %v1560_v24 = vpop.f32.mrf.mxu0 }
 0x194   :  { %v1479_v55 = vadd.f32 %v1478_v43, %v4049_v13  ;;  %1852 = vmatmul.bf16.gmra.mxu2 %v3973_v10 }
 0x195   :  { %1866 = vmatmul.bf16.vlgmr.msrb.gmra.mxu3 %v3975_v16  ;;  %v1618_v16 = vpop.f32.mrf.mxu2 }
 0x196   :  { %v1508_v26 = vadd.f32 %v4051_v49, %v1479_v55  ;;  %v1551_v49 = vadd.f32 %v1550_v4, %v4057_v29  ;;  %v1556_v29 = vadd.f32 %v1555_v53, %v4071_v25  ;;  %v1561_v25 = vadd.f32 %v1560_v24, %v1532_v34 }
 0x198   :  { %v1635_v39 = vpop.f32.mrf.mxu3  ;;  %v1537_v18 = vadd.f32 %v1536_v11, %v1508_v26  ;;  %v3459_v11 = vld [vmem:[%s4423_s4 + $0x38] sm:$0xff] }
 0x199   :  { %2116 = vmatpush.bf16.msrb.mxu0 %v3459_v11  ;;  %v3452_v11 = vld [vmem:[%s4423_s4] sm:$0xff] }
 0x19b   :  { %v1563_v23 = vpop.f32.mrf.mxu0  ;;  %v1577_v31 = vpop.f32.mrf.mxu1 }
 0x19c   :  { %v1564_v42 = vadd.f32 %v1563_v23, %v1535_v22  ;;  %v1578_v5 = vadd.f32 %v1577_v31, %v4060_v17  ;;  %v3467_v22 = vld [vmem:[%s4423_s4 + $0x78] sm:$0xff]  ;;  %v3466_v23 = vld [vmem:[%s4423_s4 + $0x70] sm:$0xff] }
 0x19d   :  { %v1621_v0 = vpop.f32.mrf.mxu2  ;;  %2145 = vmatpush.bf16.msra.mxu1 %v3467_v22  ;;  %v3460_v22 = vld [vmem:[%s4423_s4 + $0x40] sm:$0xff] }
 0x19e   :  { %v1607_v51 = vadd.f32 %v4062_v41, %v1578_v5  ;;  %1794 = vmatmul.bf16.gmra.mxu0 %v3982_v44  ;;  %1808 = vmatmul.bf16.vlgmr.msrb.gmra.mxu1 %v3984_v45 }
 0x1a0   :  { %v4093_v13 = vadd.f32 %v1635_v39, %v1607_v51  ;;  %v1637_v10 = vpop.f32.mrf.mxu3 }
 0x1a1   :  { %2146 = vmatpush.bf16.msra.mxu1 %v3466_v23 }
 0x1a3   :  { %v1579_v57 = vpop.f32.mrf.mxu1  ;;  %v1565_v45 = vpop.f32.mrf.mxu0 }
 0x1a4   :  { %v1580_v56 = vadd.f32 %v1579_v57, %v1551_v49  ;;  %v1566_v2 = vadd.f32 %v1565_v45, %v1537_v18  ;;  %v3458_v18 = vld [vmem:[%s4423_s4 + $0x30] sm:$0xff] }
 0x1a5   :  { %1871 = vmatmul.bf16.gmra.mxu3 %v3990_v58  ;;  %v1623_v38 = vpop.f32.mrf.mxu2  ;;  %2117 = vmatpush.bf16.msrb.mxu0 %v3458_v18 }
 0x1a6   :  { %v1609_v12 = vadd.f32 %v1608_v9, %v1580_v56 }
 0x1a8   :  { %v4097_v60 = vadd.f32 %v1637_v10, %v1609_v12  ;;  %v1640_v17 = vpop.f32.mrf.mxu3  ;;  %v3457_v10 = vld [vmem:[%s4423_s4 + $0x28] sm:$0xff] }
 0x1a9   :  { %2118 = vmatpush.bf16.msrb.mxu0 %v3457_v10 }
 0x1ab   :  { %v1582_v41 = vpop.f32.mrf.mxu1  ;;  %v1664_v9 = vpop.f32.mrf.mxu0 }
 0x1ac   :  { %v1583_v59 = vadd.f32 %v1582_v41, %v1554_v15  ;;  %v3456_v41 = vld [vmem:[%s4423_s4 + $0x20] sm:$0xff] }
 0x1ad   :  { %2119 = vmatpush.bf16.msrb.mxu0 %v3456_v41 }
 0x1ae   :  { %v1612_v44 = vadd.f32 %v1611_v61, %v1583_v59  ;;  %1813 = vmatmul.bf16.gmra.mxu1 %v4000_v33  ;;  %v1722_v33 = vpop.f32.mrf.mxu2  ;;  %v3464_v59 = vld [vmem:[%s4423_s4 + $0x60] sm:$0xff] }
 0x1b0   :  { %v4100_v7 = vadd.f32 %v1640_v17, %v1612_v44  ;;  %v1642_v40 = vpop.f32.mrf.mxu3 }
 0x1b3   :  { %v1584_v4 = vpop.f32.mrf.mxu1  ;;  %v4109_v47 = vpop.f32.mrf.mxu0 }
 0x1b4   :  { %v1585_v14 = vadd.f32 %v1584_v4, %v1556_v29 }
 0x1b5   :  { %1876 = vmatmul.bf16.gmra.mxu3 %v4008_v8 }
 0x1b6   :  { %v1614_v58 = vadd.f32 %v1613_v1, %v1585_v14  ;;  %v4114_v27 = vpop.f32.mrf.mxu2  ;;  %v3455_v14 = vld [vmem:[%s4423_s4 + $0x18] sm:$0xff] }
 0x1b7   :  { %2120 = vmatpush.bf16.msrb.mxu0 %v3455_v14 }
 0x1b8   :  { %v4104_v30 = vadd.f32 %v1642_v40, %v1614_v58  ;;  %v1645_v62 = vpop.f32.mrf.mxu3 }
 0x1bb   :  { %v1587_v54 = vpop.f32.mrf.mxu1 }
 0x1bc   :  { %v1588_v35 = vadd.f32 %v1587_v54, %v1559_v6 }
 0x1be   :  { %v1617_v3 = vadd.f32 %v1616_v46, %v1588_v35  ;;  %1818 = vmatmul.bf16.gmra.mxu1 %v4017_v48  ;;  %v1669_v48 = vpop.f32.mrf.mxu0  ;;  %v1727_v6 = vpop.f32.mrf.mxu2 }
 0x1c0   :  { %v4107_v63 = vadd.f32 %v1645_v62, %v1617_v3  ;;  %v1647_v15 = vpop.f32.mrf.mxu3  ;;  %v1895_v62 = vld [vmem:[%s4422_s3] sm:$0x3] }
 0x1c1   :  { %1897 = vst [vmem:[#allocation1] ss:$9 sm:$0xff] %v1895_v62 }
 0x1c3   :  { %v1589_v20 = vpop.f32.mrf.mxu1 }
 0x1c4   :  { %v1590_v61 = vadd.f32 %v1589_v20, %v1561_v25 }
 0x1c5   :  { %1881 = vmatmul.bf16.gmra.mxu3 %v4023_v36 }
 0x1c6   :  { %v1619_v8 = vadd.f32 %v1618_v16, %v1590_v61  ;;  %v4125_v43 = vpop.f32.mrf.mxu0  ;;  %v4129_v46 = vpop.f32.mrf.mxu2  ;;  %v3465_v16 = vld [vmem:[%s4423_s4 + $0x68] sm:$0xff] }
 0x1c7   :  { %2147 = vmatpush.bf16.msra.mxu1 %v3465_v16 }
 0x1c8   :  { %v4112_v21 = vadd.f32 %v1647_v15, %v1619_v8  ;;  %v1650_v53 = vpop.f32.mrf.mxu3 }
 0x1cb   :  { %v1592_v52 = vpop.f32.mrf.mxu1  ;;  %2148 = vmatpush.bf16.msra.mxu1 %v3464_v59 }
 0x1cc   :  { %v1593_v37 = vadd.f32 %v1592_v52, %v1564_v42  ;;  %v3462_v52 = vld [vmem:[%s4423_s4 + $0x50] sm:$0xff] }
 0x1ce   :  { %v1622_v50 = vadd.f32 %v1621_v0, %v1593_v37  ;;  %1823 = vmatmul.bf16.gmra.mxu1 %v4031_v32  ;;  %v1674_v5 = vpop.f32.mrf.mxu0  ;;  %v1732_v49 = vpop.f32.mrf.mxu2 }
 0x1d0   :  { %v4117_v19 = vadd.f32 %v1650_v53, %v1622_v50  ;;  %v1652_v34 = vpop.f32.mrf.mxu3  ;;  %v3454_v53 = vld [vmem:[%s4423_s4 + $0x10] sm:$0xff] }
 0x1d1   :  { %2121 = vmatpush.bf16.msrb.mxu0 %v3454_v53 }
 0x1d3   :  { %v1594_v1 = vpop.f32.mrf.mxu1 }
 0x1d4   :  { %v1595_v28 = vadd.f32 %v1594_v1, %v1566_v2  ;;  %v3461_v2 = vld [vmem:[%s4423_s4 + $0x48] sm:$0xff] }
 0x1d6   :  { %v1624_v36 = vadd.f32 %v1623_v38, %v1595_v28  ;;  %v4147_v56 = vpop.f32.mrf.mxu0  ;;  %v4159_v40 = vpop.f32.mrf.mxu2  ;;  %v3463_v38 = vld [vmem:[%s4423_s4 + $0x58] sm:$0xff] }
 0x1d7   :  { %2149 = vmatpush.bf16.msra.mxu1 %v3463_v38 }
 0x1d8   :  { %v4127_v24 = vadd.f32 %v1652_v34, %v1624_v36  ;;  %v1751_v32 = vpop.f32.mrf.mxu3  ;;  %v3453_v34 = vld [vmem:[%s4423_s4 + $0x8] sm:$0xff] }
 0x1d9   :  { %2122 = vmatpush.bf16.msrb.mxu0 %v3453_v34 }
 0x1db   :  { %v1693_v55 = vpop.f32.mrf.mxu1  ;;  %2150 = vmatpush.bf16.msra.mxu1 %v3462_v52 }
 0x1dc   :  { %v1694_v26 = vadd.f32 %v1693_v55, %v1664_v9 }
 0x1dd   :  { %2123 = vmatpush.bf16.msrb.mxu0 %v3452_v11 }
 0x1de   :  { %v1723_v39 = vadd.f32 %v1722_v33, %v1694_v26  ;;  %v1679_v4 = vpop.f32.mrf.mxu0  ;;  %v1737_v9 = vpop.f32.mrf.mxu2 }
 0x1df   :  { %2151 = vmatpush.bf16.msra.mxu1 %v3461_v2 }
 0x1e0   :  { %v4137_v31 = vpop.f32.mrf.mxu3  ;;  %v4139_v42 = vadd.f32 %v1751_v32, %v1723_v39 }
 0x1e3   :  { %v1695_v51 = vpop.f32.mrf.mxu1  ;;  %2152 = vmatpush.bf16.msra.mxu1 %v3460_v22 }
 0x1e4   :  { %v1696_v26 = vadd.f32 %v1695_v51, %v4109_v47 }
 0x1e6   :  { %v4172_v33 = vpop.f32.mrf.mxu0  ;;  %v4180_v61 = vpop.f32.mrf.mxu2  ;;  %v1725_v10 = vadd.f32 %v4114_v27, %v1696_v26 }
 0x1e8   :  { %v1756_v57 = vpop.f32.mrf.mxu3  ;;  %v1754_v41 = vadd.f32 %v4137_v31, %v1725_v10 }
 0x1eb   :  { %v1698_v12 = vpop.f32.mrf.mxu1 }
 0x1ec   :  { %v1699_v17 = vadd.f32 %v1698_v12, %v1669_v48  ;;  %v1899_v12 = vld [vmem:[#allocation1 + $0x9] sm:$0xff] }
 0x1ee   :  { %v1728_v0 = vadd.f32 %v1727_v6, %v1699_v17  ;;  %v1780_v37 = vpop.f32.mrf.mxu0  ;;  %v1838_v1 = vpop.f32.mrf.mxu2 }
 0x1ef   :  { %v1781_v23 = vadd.f32 %v1780_v37, %v4139_v42 }
 0x1f0   :  { %v4155_v44 = vpop.f32.mrf.mxu3  ;;  %v4157_v45 = vadd.f32 %v1756_v57, %v1728_v0 }
 0x1f3   :  { %v4161_v29 = vpop.f32.mrf.mxu1 }
 0x1f6   :  { %v1782_v32 = vpop.f32.mrf.mxu0  ;;  %v1840_v18 = vpop.f32.mrf.mxu2 }
 0x1f7   :  { %v1783_v38 = vadd.f32 %v1782_v32, %v1754_v41 }
 0x1f8   :  { %v1761_v58 = vpop.f32.mrf.mxu3 }
 0x1fb   :  { %v1703_v54 = vpop.f32.mrf.mxu1 }
 0x1fc   :  { %v1704_v35 = vadd.f32 %v1703_v54, %v1674_v5  ;;  %v1701_v54 = vadd.f32 %v4161_v29, %v4125_v43 }
 0x1fe   :  { %v1733_v3 = vadd.f32 %v1732_v49, %v1704_v35  ;;  %v1898_v49 = vld [vmem:[#allocation1] sm:$0xff]  ;;  %v1785_v57 = vpop.f32.mrf.mxu0  ;;  %v1843_v51 = vpop.f32.mrf.mxu2 }
 0x1ff   :  { %v1900_v0 = vpack.i.b16 %v1898_v49, %v1898_v49 }
 0x200   :  { %v4174_v15 = vpop.f32.mrf.mxu3  ;;  %v4176_v25 = vadd.f32 %v1761_v58, %v1733_v3 }
 0x201   :  { %v1902_v58 = vperm.slane %v1900_v0, 0 }
 0x203   :  { %v4178_v20 = vpop.f32.mrf.mxu1 }
 0x206   :  { %v1787_v35 = vpop.f32.mrf.mxu0  ;;  %v1845_v11 = vpop.f32.mrf.mxu2 }
 0x208   :  { %v1766_v8 = vpop.f32.mrf.mxu3 }
 0x20b   :  { %v1708_v48 = vpop.f32.mrf.mxu1 }
 0x20c   :  { %v1709_v50 = vadd.f32 %v1708_v48, %v1679_v4  ;;  %v1903_v4 = vpack.i.b16 %v1899_v12, %v1899_v12 }
 0x20e   :  { %v1738_v6 = vadd.f32 %v1737_v9, %v1709_v50  ;;  %v1905_v62 = vperm.slane %v1903_v4, 0  ;;  %v1730_v50 = vadd.f32 %v4129_v46, %v1701_v54  ;;  %v1790_v10 = vpop.f32.mrf.mxu0 }
 0x210   :  { %v4194_v28 = vpop.f32.mrf.mxu3  ;;  %v4196_v36 = vadd.f32 %v1766_v8, %v1738_v6  ;;  %v4213_v8 = vunpack.c.l.bf16 %v1902_v58  ;;  %v4215_v53 = vunpack.c.l.bf16 %v1905_v62 }
 0x213   :  { %v4204_v55 = vpop.f32.mrf.mxu1 }
 0x218   :  { %v1867_v39 = vpop.f32.mrf.mxu3 }
 0x21b   :  { %v1809_v5 = vpop.f32.mrf.mxu1 }
 0x21c   :  { %v1810_v16 = vadd.f32 %v1809_v5, %v1781_v23 }
 0x21e   :  { %v1839_v17 = vadd.f32 %v1838_v1, %v1810_v16 }
 0x220   :  { %v1868_v59 = vadd.f32 %v1867_v39, %v1839_v17  ;;  %v1869_v14 = vpop.f32.mrf.mxu3 }
 0x222   :  { %v1887_v47 = vpack.c.bf16 %v1868_v59, %v4093_v13  ;;  %v1786_v13 = vadd.f32 %v1785_v57, %v4157_v45  ;;  %v1759_v45 = vadd.f32 %v4155_v44, %v1730_v50  ;;  %v1706_v44 = vadd.f32 %v4178_v20, %v4147_v56  ;;  %v1848_v59 = vpop.f32.mrf.mxu2 }
 0x223   :  { %v1811_v42 = vpop.f32.mrf.mxu1 }
 0x224   :  { %v1812_v9 = vadd.f32 %v1811_v42, %v1783_v38  ;;  %v1906_v3 = vunpack.c.l.bf16 %v1887_v47  ;;  %v1907_v31 = vunpack.c.h.bf16 %v1887_v47  ;;  %v1788_v16 = vadd.f32 %v1787_v35, %v1759_v45  ;;  %v1792_v42 = vpop.f32.mrf.mxu0 }
 0x226   :  { %v1841_v27 = vadd.f32 %v1840_v18, %v1812_v9  ;;  %v1924_v34 = vadd.f32 %v4213_v8, %v1906_v3  ;;  %v1925_v43 = vadd.f32 %v4215_v53, %v1907_v31 }
 0x228   :  { %v1870_v52 = vadd.f32 %v1869_v14, %v1841_v27  ;;  %v1872_v37 = vpop.f32.mrf.mxu3  ;;  %v1964_v39 = vmax.f32 %v1924_v34, 0.0 }
 0x22a   :  { %v1888_v48 = vpack.c.bf16 %v1870_v52, %v4097_v60  ;;  %v1965_v60 = vmax.f32 %v1925_v43, 0.0 }
 0x22b   :  { %v1814_v2 = vpop.f32.mrf.mxu1 }
 0x22c   :  { %v1908_v29 = vunpack.c.l.bf16 %v1888_v48  ;;  %v1909_v6 = vunpack.c.h.bf16 %v1888_v48  ;;  %v1815_v1 = vadd.f32 %v1814_v2, %v1786_v13  ;;  %v1850_v48 = vpop.f32.mrf.mxu2 }
 0x22e   :  { %v1926_v22 = vadd.f32 %v4213_v8, %v1908_v29  ;;  %v1927_v32 = vadd.f32 %v4215_v53, %v1909_v6  ;;  %v1844_v26 = vadd.f32 %v1843_v51, %v1815_v1  ;;  %v1791_v51 = vadd.f32 %v1790_v10, %v4176_v25 }
 0x230   :  { %v1966_v18 = vmax.f32 %v1926_v22, 0.0  ;;  %v1967_v46 = vmax.f32 %v1927_v32, 0.0  ;;  %v1873_v23 = vadd.f32 %v1872_v37, %v1844_v26  ;;  %v1874_v5 = vpop.f32.mrf.mxu3  ;;  %v3470_v32 = vld [vmem:[%s4425_s6 + $0x10] sm:$0xff] }
 0x232   :  { %v1889_v49 = vpack.c.bf16 %v1873_v23, %v4100_v7  ;;  %v1980_v57 = vpack.c.bf16 %v1966_v18, %v1964_v39  ;;  %v1981_v12 = vpack.c.bf16 %v1967_v46, %v1965_v60  ;;  %v1735_v7 = vadd.f32 %v4159_v40, %v1706_v44  ;;  %v3469_v46 = vld [vmem:[%s4425_s6 + $0x8] sm:$0xff] }
 0x233   :  { %v1816_v17 = vpop.f32.mrf.mxu1 }
 0x234   :  { %v1817_v0 = vadd.f32 %v1816_v17, %v1788_v16  ;;  %2124 = vmatmul.bf16.vlgmr.msrb.gmra.mxu0 %v1980_v57  ;;  %2153 = vmatmul.bf16.vlgmr.msra.gmra.mxu1 %v1981_v12  ;;  %v1910_v4 = vunpack.c.l.bf16 %v1889_v49  ;;  %v1911_v38 = vunpack.c.h.bf16 %v1889_v49  ;;  %v1764_v25 = vadd.f32 %v4174_v15, %v1735_v7  ;;  %v3471_v15 = vld [vmem:[%s4425_s6 + $0x18] sm:$0xff] }
 0x235   :  { %2285 = vmatpush.bf16.msra.mxu2 %v3471_v15 }
 0x236   :  { %v1846_v41 = vadd.f32 %v1845_v11, %v1817_v0  ;;  %v1928_v9 = vadd.f32 %v4213_v8, %v1910_v4  ;;  %v1929_v56 = vadd.f32 %v4215_v53, %v1911_v38  ;;  %v1793_v50 = vadd.f32 %v1792_v42, %v1764_v25  ;;  %v1795_v11 = vpop.f32.mrf.mxu0 }
 0x237   :  { %v1796_v60 = vadd.f32 %v1795_v11, %v4196_v36 }
 0x238   :  { %v1875_v14 = vadd.f32 %v1874_v5, %v1846_v41  ;;  %v1877_v47 = vpop.f32.mrf.mxu3  ;;  %v1968_v52 = vmax.f32 %v1928_v9, 0.0  ;;  %v1969_v40 = vmax.f32 %v1929_v56, 0.0  ;;  %v1853_v5 = vpop.f32.mrf.mxu2 }
 0x239   :  { %2286 = vmatpush.bf16.msra.mxu2 %v3470_v32 }
 0x23a   :  { %v1890_v58 = vpack.c.bf16 %v1875_v14, %v4104_v30 }
 0x23b   :  { %v1819_v62 = vpop.f32.mrf.mxu1 }
 0x23c   :  { %v1820_v27 = vadd.f32 %v1819_v62, %v1791_v51  ;;  %v1912_v54 = vunpack.c.l.bf16 %v1890_v58  ;;  %v1913_v35 = vunpack.c.h.bf16 %v1890_v58 }
 0x23d   :  { %2287 = vmatpush.bf16.msra.mxu2 %v3469_v46 }
 0x23e   :  { %v1849_v20 = vadd.f32 %v1848_v59, %v1820_v27  ;;  %v1930_v3 = vadd.f32 %v4213_v8, %v1912_v54  ;;  %v1931_v31 = vadd.f32 %v4215_v53, %v1913_v35  ;;  %v1797_v41 = vpop.f32.mrf.mxu0 }
 0x240   :  { %v1878_v30 = vadd.f32 %v1877_v47, %v1849_v20  ;;  %v1970_v37 = vmax.f32 %v1930_v3, 0.0  ;;  %v1971_v13 = vmax.f32 %v1931_v31, 0.0  ;;  %v1879_v29 = vpop.f32.mrf.mxu3  ;;  %v1855_v62 = vpop.f32.mrf.mxu2 }
 0x242   :  { %v1891_v34 = vpack.c.bf16 %v1878_v30, %v4107_v63  ;;  %v1982_v2 = vpack.c.bf16 %v1970_v37, %v1968_v52  ;;  %v1983_v43 = vpack.c.bf16 %v1971_v13, %v1969_v40  ;;  %v1711_v63 = vadd.f32 %v4204_v55, %v4172_v33 }
 0x243   :  { %v1821_v6 = vpop.f32.mrf.mxu1 }
 0x244   :  { %v1822_v1 = vadd.f32 %v1821_v6, %v1793_v50  ;;  %2129 = vmatmul.bf16.gmra.mxu0 %v1982_v2  ;;  %2158 = vmatmul.bf16.gmra.mxu1 %v1983_v43  ;;  %v1914_v26 = vunpack.c.l.bf16 %v1891_v34  ;;  %v1915_v39 = vunpack.c.h.bf16 %v1891_v34  ;;  %v1740_v23 = vadd.f32 %v4180_v61, %v1711_v63  ;;  %v2182_v34 = vld [vmem:[%s4424_s5] sm:$0x1] }
 0x245   :  { %v2184_v43 = vpack.i.b16 %v2182_v34, %v2182_v34  ;;  %v3490_v34 = vld [vmem:[%s4426_s7] ss:$0 sm:$0xff]  ;;  %s3569_s7 = smov 1  }
 0x246   :  { %v1851_v22 = vadd.f32 %v1850_v48, %v1822_v1  ;;  %v1932_v16 = vadd.f32 %v4213_v8, %v1914_v26  ;;  %v1933_v57 = vadd.f32 %v4215_v53, %v1915_v39  ;;  %v1769_v0 = vadd.f32 %v4194_v28, %v1740_v23 }
 0x247   :  { %v2186_v6 = vperm.slane %v2184_v43, 0 }
 0x248   :  { %v1880_v45 = vadd.f32 %v1879_v29, %v1851_v22  ;;  %v1882_v12 = vpop.f32.mrf.mxu3  ;;  %v1972_v61 = vmax.f32 %v1932_v16, 0.0  ;;  %v1973_v4 = vmax.f32 %v1933_v57, 0.0  ;;  %v1798_v38 = vadd.f32 %v1797_v41, %v1769_v0 }
 0x249   :  { %v2195_v22 = vunpack.c.l.bf16 %v2186_v6 }
 0x24a   :  { %v1892_v18 = vpack.c.bf16 %v1880_v45, %v4112_v21 }
 0x24b   :  { %v1824_v10 = vpop.f32.mrf.mxu1 }
 0x24c   :  { %v1825_v49 = vadd.f32 %v1824_v10, %v1796_v60  ;;  %v1916_v33 = vunpack.c.l.bf16 %v1892_v18  ;;  %v1917_v55 = vunpack.c.h.bf16 %v1892_v18 }
 0x24e   :  { %v1854_v36 = vadd.f32 %v1853_v5, %v1825_v49  ;;  %v1934_v21 = vadd.f32 %v4213_v8, %v1916_v33  ;;  %v1935_v17 = vadd.f32 %v4215_v53, %v1917_v55 }
 0x250   :  { %v1883_v44 = vadd.f32 %v1882_v12, %v1854_v36  ;;  %v1974_v59 = vmax.f32 %v1934_v21, 0.0  ;;  %v1975_v14 = vmax.f32 %v1935_v17, 0.0  ;;  %v1884_v27 = vpop.f32.mrf.mxu3 }
 0x252   :  { %v1893_v47 = vpack.c.bf16 %v1883_v44, %v4117_v19  ;;  %v1984_v51 = vpack.c.bf16 %v1974_v59, %v1972_v61  ;;  %v1985_v58 = vpack.c.bf16 %v1975_v14, %v1973_v4 }
 0x253   :  { %v1826_v7 = vpop.f32.mrf.mxu1 }
 0x254   :  { %v1827_v42 = vadd.f32 %v1826_v7, %v1798_v38  ;;  %2134 = vmatmul.bf16.gmra.mxu0 %v1984_v51  ;;  %2163 = vmatmul.bf16.gmra.mxu1 %v1985_v58  ;;  %v1918_v28 = vunpack.c.l.bf16 %v1893_v47  ;;  %v1919_v35 = vunpack.c.h.bf16 %v1893_v47 }
 0x256   :  { %v1856_v9 = vadd.f32 %v1855_v62, %v1827_v42  ;;  %v1936_v3 = vadd.f32 %v4213_v8, %v1918_v28  ;;  %v1937_v19 = vadd.f32 %v4215_v53, %v1919_v35 }
 0x258   :  { %v1885_v54 = vadd.f32 %v1884_v27, %v1856_v9  ;;  %v1976_v30 = vmax.f32 %v1936_v3, 0.0  ;;  %v1977_v40 = vmax.f32 %v1937_v19, 0.0 }
 0x25a   :  { %v1894_v56 = vpack.c.bf16 %v1885_v54, %v4127_v24  ;;  %v3468_v24 = vld [vmem:[%s4425_s6] sm:$0xff] }
 0x25b   :  { %2288 = vmatpush.bf16.msra.mxu2 %v3468_v24 }
 0x25c   :  { %v1920_v20 = vunpack.c.l.bf16 %v1894_v56  ;;  %v1921_v31 = vunpack.c.h.bf16 %v1894_v56 }
 0x25e   :  { %v1938_v25 = vadd.f32 %v4213_v8, %v1920_v20  ;;  %v1939_v52 = vadd.f32 %v4215_v53, %v1921_v31 }
 0x260   :  { %v1978_v37 = vmax.f32 %v1938_v25, 0.0  ;;  %v1979_v13 = vmax.f32 %v1939_v52, 0.0 }
 0x262   :  { %v1986_v48 = vpack.c.bf16 %v1978_v37, %v1976_v30  ;;  %v1987_v50 = vpack.c.bf16 %v1979_v13, %v1977_v40 }
 0x264   :  { %2139 = vmatmul.bf16.gmra.mxu0 %v1986_v48  ;;  %2168 = vmatmul.bf16.gmra.mxu1 %v1987_v50 }
 0x2b1   :  { %v2125_v8 = vpop.f32.mrf.mxu0  ;;  %v2154_v2 = vpop.f32.mrf.mxu1 }
 0x2b2   :  { %v2155_v53 = vadd.f32 %v2154_v2, %v2125_v8 }
 0x2b4   :  { %v2174_v29 = vpack.c.bf16 %v2155_v53, %v2155_v53 }
 0x2b6   :  { %v2187_v11 = vunpack.c.l.bf16 %v2174_v29 }
 0x2b8   :  { %v2196_v26 = vadd.f32 %v2195_v22, %v2187_v11 }
 0x2b9   :  { %v2127_v1 = vpop.f32.mrf.mxu0  ;;  %v2156_v15 = vpop.f32.mrf.mxu1 }
 0x2ba   :  { %v2157_v32 = vadd.f32 %v2156_v15, %v2127_v1  ;;  %v2220_v46 = vmax.f32 %v2196_v26, 0.0 }
 0x2bc   :  { %v2175_v63 = vpack.c.bf16 %v2157_v32, %v2157_v32 }
 0x2be   :  { %v2188_v45 = vunpack.c.l.bf16 %v2175_v63 }
 0x2c0   :  { %v2197_v39 = vadd.f32 %v2195_v22, %v2188_v45 }
 0x2c1   :  { %v2130_v60 = vpop.f32.mrf.mxu0  ;;  %v2159_v18 = vpop.f32.mrf.mxu1 }
 0x2c2   :  { %v2221_v23 = vmax.f32 %v2197_v39, 0.0  ;;  %v2160_v5 = vadd.f32 %v2159_v18, %v2130_v60 }
 0x2c4   :  { %v2228_v10 = vpack.c.bf16 %v2221_v23, %v2220_v46  ;;  %v2176_v16 = vpack.c.bf16 %v2160_v5, %v2160_v5 }
 0x2c6   :  { %3292 = vmatmul.msk.bf16.vlgmr.msra.gmra.mxu2 %vm2268_vm1, %v2228_v10  ;;  %v2189_v55 = vunpack.c.l.bf16 %v2176_v16 }
 0x2c8   :  { %v2198_v36 = vadd.f32 %v2195_v22, %v2189_v55 }
 0x2c9   :  { %v2132_v49 = vpop.f32.mrf.mxu0  ;;  %v2161_v33 = vpop.f32.mrf.mxu1 }
 0x2ca   :  { %v2162_v57 = vadd.f32 %v2161_v33, %v2132_v49  ;;  %v2222_v61 = vmax.f32 %v2198_v36, 0.0 }
 0x2cc   :  { %v2177_v12 = vpack.c.bf16 %v2162_v57, %v2162_v57 }
 0x2ce   :  { %v2190_v21 = vunpack.c.l.bf16 %v2177_v12 }
 0x2d0   :  { %v2199_v17 = vadd.f32 %v2195_v22, %v2190_v21 }
 0x2d1   :  { %v2135_v0 = vpop.f32.mrf.mxu0  ;;  %v2164_v41 = vpop.f32.mrf.mxu1 }
 0x2d2   :  { %v2223_v44 = vmax.f32 %v2199_v17, 0.0  ;;  %v2165_v59 = vadd.f32 %v2164_v41, %v2135_v0 }
 0x2d4   :  { %v2229_v4 = vpack.c.bf16 %v2223_v44, %v2222_v61  ;;  %v2178_v14 = vpack.c.bf16 %v2165_v59, %v2165_v59 }
 0x2d6   :  { %3293 = vmatmul.msk.bf16.gmra.mxu2 %vm2268_vm1, %v2229_v4  ;;  %v2191_v51 = vunpack.c.l.bf16 %v2178_v14 }
 0x2d8   :  { %v2200_v42 = vadd.f32 %v2195_v22, %v2191_v51 }
 0x2d9   :  { %v2137_v38 = vpop.f32.mrf.mxu0  ;;  %v2166_v47 = vpop.f32.mrf.mxu1 }
 0x2da   :  { %v2167_v58 = vadd.f32 %v2166_v47, %v2137_v38  ;;  %v2224_v28 = vmax.f32 %v2200_v42, 0.0 }
 0x2dc   :  { %v2179_v7 = vpack.c.bf16 %v2167_v58, %v2167_v58 }
 0x2de   :  { %v2192_v62 = vunpack.c.l.bf16 %v2179_v7 }
 0x2e0   :  { %v2201_v9 = vadd.f32 %v2195_v22, %v2192_v62 }
 0x2e1   :  { %v2140_v27 = vpop.f32.mrf.mxu0  ;;  %v2169_v54 = vpop.f32.mrf.mxu1 }
 0x2e2   :  { %v2225_v35 = vmax.f32 %v2201_v9, 0.0  ;;  %v2170_v56 = vadd.f32 %v2169_v54, %v2140_v27 }
 0x2e4   :  { %v2230_v20 = vpack.c.bf16 %v2225_v35, %v2224_v28  ;;  %v2180_v3 = vpack.c.bf16 %v2170_v56, %v2170_v56 }
 0x2e6   :  { %3294 = vmatmul.msk.bf16.gmra.mxu2 %vm2268_vm1, %v2230_v20  ;;  %v2193_v25 = vunpack.c.l.bf16 %v2180_v3 }
 0x2e8   :  { %v2202_v37 = vadd.f32 %v2195_v22, %v2193_v25 }
 0x2e9   :  { %v2142_v31 = vpop.f32.mrf.mxu0  ;;  %v2171_v19 = vpop.f32.mrf.mxu1 }
 0x2ea   :  { %v2172_v52 = vadd.f32 %v2171_v19, %v2142_v31  ;;  %v2226_v48 = vmax.f32 %v2202_v37, 0.0 }
 0x2ec   :  { %v2181_v30 = vpack.c.bf16 %v2172_v52, %v2172_v52 }
 0x2ee   :  { %v2194_v40 = vunpack.c.l.bf16 %v2181_v30 }
 0x2f0   :  { %v2203_v13 = vadd.f32 %v2195_v22, %v2194_v40 }
 0x2f2   :  { %v2227_v50 = vmax.f32 %v2203_v13, 0.0 }
 0x2f4   :  { %v2231_v24 = vpack.c.bf16 %v2227_v50, %v2226_v48 }
 0x2f6   :  { %3295 = vmatmul.msk.bf16.gmra.mxu2 %vm2268_vm1, %v2231_v24 }
 0x349   :  { %v2290_v8 = vpop.f32.mrf.mxu2 }
 0x34a   :  { %v4275_v2 = vadd.f32 %v3490_v34, %v2290_v8  ;;  %v3570_v8 = vmov 0  }
 0x34b   :  { %3487 = vset.pattern.permute.xlu0 %v3570_v8  ;;  %3488 = vset.pattern.permute.xlu1 %v3570_v8 }
 0x34c   :  { %2318 = vrot.lane.b32.xlu0 %v4275_v2, %s3568_s15  ;;  %3489 = vset.pattern.permute.xlu2 %v3570_v8 }
 0x351   :  { %v2292_v53 = vpop.f32.mrf.mxu2 }
 0x352   :  { %v4279_v43 = vadd.f32 %v3490_v34, %v2292_v53 }
 0x354   :  { %2320 = vrot.lane.b32.xlu0 %v4279_v43, %s3568_s15 }
 0x359   :  { %v2295_v29 = vpop.f32.mrf.mxu2 }
 0x35a   :  { %v4283_v6 = vadd.f32 %v3490_v34, %v2295_v29 }
 0x35c   :  { %2322 = vrot.lane.b32.xlu1 %v4283_v6, %s3568_s15 }
 0x361   :  { %v2297_v1 = vpop.f32.mrf.mxu2 }
 0x362   :  { %v4287_v15 = vadd.f32 %v3490_v34, %v2297_v1 }
 0x364   :  { %2324 = vrot.lane.b32.xlu1 %v4287_v15, %s3568_s15 }
 0x369   :  { %v2300_v11 = vpop.f32.mrf.mxu2 }
 0x36a   :  { %v4291_v22 = vadd.f32 %v3490_v34, %v2300_v11 }
 0x36c   :  { %2326 = vrot.lane.b32.xlu2 %v4291_v22, %s3568_s15 }
 0x371   :  { %v2302_v32 = vpop.f32.mrf.mxu2 }
 0x372   :  { %v4295_v63 = vadd.f32 %v3490_v34, %v2302_v32 }
 0x374   :  { %2328 = vrot.lane.b32.xlu2 %v4295_v63, %s3568_s15 }
 0x379   :  { %v2305_v26 = vpop.f32.mrf.mxu2 }
 0x37a   :  { %v4299_v45 = vadd.f32 %v3490_v34, %v2305_v26 }
 0x37c   :  { %2330 = vrot.lane.b32.xlu0 %v4299_v45, %s3568_s15 }
 0x381   :  { %v2307_v39 = vpop.f32.mrf.mxu2 }
 0x382   :  { %v4303_v60 = vadd.f32 %v3490_v34, %v2307_v39 }
 0x384   :  { %2332 = vrot.lane.b32.xlu1 %v4303_v60, %s3568_s15 }
 0x3be   :  { %v2319_v18 = vpop.permute.xlu0 %2318 }
 0x3bf   :  { %v4308_v46 = vmax.f32 %v4275_v2, %v2319_v18 }
 0x3c1   :  { %2382 = vrot.lane.b32.xlu2 %v4308_v46, %s3569_s7  ;;  %v2350_v53 = vsub.f32 %v4275_v2, %v4308_v46 }
 0x3c3   :  { %v2358_v29 = vmul.f32 1.442695, %v2350_v53 }
 0x3c6   :  { %v2321_v23 = vpop.permute.xlu0 %2320  ;;  %v2327_v10 = vpop.permute.xlu2 %2326 }
 0x3c7   :  { %v4312_v5 = vmax.f32 %v4279_v43, %v2321_v23  ;;  %v4316_v49 = vmax.f32 %v4291_v22, %v2327_v10 }
 0x3c9   :  { %2384 = vrot.lane.b32.xlu0 %v4312_v5, %s3569_s7  ;;  %v2351_v1 = vsub.f32 %v4279_v43, %v4312_v5 }
 0x3cb   :  { %v2360_v11 = vmul.f32 1.442695, %v2351_v1 }
 0x3ce   :  { %v2323_v16 = vpop.permute.xlu1 %2322  ;;  %v2329_v55 = vpop.permute.xlu2 %2328 }
 0x3cf   :  { %v4319_v33 = vmax.f32 %v4283_v6, %v2323_v16  ;;  %v4324_v12 = vmax.f32 %v4295_v63, %v2329_v55 }
 0x3d1   :  { %2386 = vrot.lane.b32.xlu1 %v4319_v33, %s3569_s7  ;;  %2390 = vrot.lane.b32.xlu0 %v4316_v49, %s3569_s7 }
 0x3d6   :  { %v2325_v57 = vpop.permute.xlu1 %2324 }
 0x3d7   :  { %v4327_v36 = vmax.f32 %v4287_v15, %v2325_v57 }
 0x3d9   :  { %2388 = vrot.lane.b32.xlu2 %v4327_v36, %s3569_s7  ;;  %2392 = vrot.lane.b32.xlu1 %v4324_v12, %s3569_s7  ;;  %v2353_v55 = vsub.f32 %v4287_v15, %v4327_v36 }
 0x3ee   :  { %v2331_v21 = vpop.permute.xlu0 %2330 }
 0x3ef   :  { %v4332_v17 = vmax.f32 %v4299_v45, %v2331_v21 }
 0x3f1   :  { %2394 = vrot.lane.b32.xlu2 %v4332_v17, %s3569_s7 }
 0x3f6   :  { %v2333_v0 = vpop.permute.xlu1 %2332 }
 0x3f7   :  { %v4336_v41 = vmax.f32 %v4303_v60, %v2333_v0  ;;  %v2364_v0 = vmul.f32 1.442695, %v2353_v55 }
 0x3f9   :  { %2396 = vrot.lane.b32.xlu0 %v4336_v41, %s3569_s7 }
 0x41b   :  { %v2383_v61 = vpop.permute.xlu2 %2382 }
 0x41c   :  { %v2406_v44 = vsub.f32 %v4275_v2, %v2383_v61 }
 0x41e   :  { %v2414_v59 = vmul.f32 1.442695, %v2406_v44 }
 0x420   :  { %3491 = vpow2.f32 %v2414_v59 }
 0x426   :  { %v3492_v4 = vpop.eup %3491 }
 0x427   :  { %2438 = vrot.lane.b32.xlu1 %v3492_v4, %s3568_s15 }
 0x433   :  { %v2389_v14 = vpop.permute.xlu2 %2388 }
 0x434   :  { %v2409_v38 = vsub.f32 %v4287_v15, %v2389_v14 }
 0x436   :  { %v2420_v47 = vmul.f32 1.442695, %v2409_v38 }
 0x438   :  { %3493 = vpow2.f32 %v2420_v47  ;;  %v2352_v47 = vsub.f32 %v4283_v6, %v4319_v33 }
 0x43b   :  { %v2385_v51 = vpop.permute.xlu0 %2384 }
 0x43c   :  { %v2407_v58 = vsub.f32 %v4279_v43, %v2385_v51  ;;  %v2354_v51 = vsub.f32 %v4291_v22, %v4316_v49 }
 0x43e   :  { %v3494_v7 = vpop.eup %3493  ;;  %v2416_v42 = vmul.f32 1.442695, %v2407_v58  ;;  %v2362_v58 = vmul.f32 1.442695, %v2352_v47 }
 0x43f   :  { %2444 = vrot.lane.b32.xlu1 %v3494_v7, %s3568_s15 }
 0x440   :  { %3495 = vpow2.f32 %v2416_v42  ;;  %v2355_v42 = vsub.f32 %v4295_v63, %v4324_v12 }
 0x443   :  { %v2387_v62 = vpop.permute.xlu1 %2386  ;;  %v2391_v9 = vpop.permute.xlu0 %2390 }
 0x444   :  { %v2408_v27 = vsub.f32 %v4283_v6, %v2387_v62  ;;  %v2410_v54 = vsub.f32 %v4291_v22, %v2391_v9 }
 0x446   :  { %v3496_v28 = vpop.eup %3495  ;;  %v2418_v35 = vmul.f32 1.442695, %v2408_v27  ;;  %v2422_v56 = vmul.f32 1.442695, %v2410_v54  ;;  %v2368_v27 = vmul.f32 1.442695, %v2355_v42 }
 0x447   :  { %2440 = vrot.lane.b32.xlu2 %v3496_v28, %s3568_s15 }
 0x448   :  { %3497 = vpow2.f32 %v2418_v35 }
 0x449   :  { %3499 = vpow2.f32 %v2422_v56 }
 0x44b   :  { %v2393_v20 = vpop.permute.xlu1 %2392  ;;  %v2395_v3 = vpop.permute.xlu2 %2394 }
 0x44c   :  { %v2411_v31 = vsub.f32 %v4295_v63, %v2393_v20  ;;  %v2412_v19 = vsub.f32 %v4299_v45, %v2395_v3 }
 0x44e   :  { %v3498_v25 = vpop.eup %3497  ;;  %v2424_v52 = vmul.f32 1.442695, %v2411_v31  ;;  %v2426_v30 = vmul.f32 1.442695, %v2412_v19  ;;  %v2357_v31 = vsub.f32 %v4303_v60, %v4336_v41 }
 0x44f   :  { %v3500_v37 = vpop.eup %3499  ;;  %2442 = vrot.lane.b32.xlu0 %v3498_v25, %s3568_s15 }
 0x450   :  { %3501 = vpow2.f32 %v2424_v52  ;;  %2446 = vrot.lane.b32.xlu2 %v3500_v37, %s3568_s15  ;;  %v2372_v25 = vmul.f32 1.442695, %v2357_v31 }
 0x451   :  { %3503 = vpow2.f32 %v2426_v30 }
 0x456   :  { %v3502_v40 = vpop.eup %3501 }
 0x457   :  { %v3504_v13 = vpop.eup %3503  ;;  %2448 = vrot.lane.b32.xlu0 %v3502_v40, %s3568_s15 }
 0x458   :  { %2450 = vrot.lane.b32.xlu1 %v3504_v13, %s3568_s15 }
 0x46b   :  { %v2397_v48 = vpop.permute.xlu0 %2396 }
 0x46c   :  { %v2413_v50 = vsub.f32 %v4303_v60, %v2397_v48 }
 0x46e   :  { %v2428_v24 = vmul.f32 1.442695, %v2413_v50 }
 0x470   :  { %3505 = vpow2.f32 %v2428_v24 }
 0x471   :  { %3507 = vpow2.f32 %v2358_v29 }
 0x472   :  { %3509 = vpow2.f32 %v2360_v11 }
 0x476   :  { %v3506_v34 = vpop.eup %3505 }
 0x477   :  { %2452 = vrot.lane.b32.xlu2 %v3506_v34, %s3568_s15  ;;  %v3508_v32 = vpop.eup %3507 }
 0x478   :  { %v3510_v18 = vpop.eup %3509 }
 0x499   :  { %v2439_v26 = vpop.permute.xlu1 %2438 }
 0x49a   :  { %v2462_v39 = vadd.f32 %v3508_v32, %v2439_v26 }
 0x49c   :  { %3511 = vlog2.f32 %v2462_v39 }
 0x4a1   :  { %v2441_v23 = vpop.permute.xlu2 %2440 }
 0x4a2   :  { %v3512_v10 = vpop.eup %3511  ;;  %v2463_v16 = vadd.f32 %v3510_v18, %v2441_v23 }
 0x4a3   :  { %v2471_v57 = vmul.f32 0.6931472, %v3512_v10 }
 0x4a4   :  { %3513 = vlog2.f32 %v2463_v16 }
 0x4a5   :  { %v2486_v21 = vadd.f32 %v2471_v57, %v4308_v46  ;;  %3515 = vpow2.f32 %v2364_v0  ;;  %v2366_v46 = vmul.f32 1.442695, %v2354_v51 }
 0x4a7   :  { %2496 = vperm.xlu0 %3487, %v2486_v21  }
 0x4aa   :  { %v3514_v61 = vpop.eup %3513  ;;  %v2447_v35 = vpop.permute.xlu2 %2446 }
 0x4ab   :  { %v2473_v44 = vmul.f32 0.6931472, %v3514_v61  ;;  %v3516_v4 = vpop.eup %3515 }
 0x4ad   :  { %v2487_v59 = vadd.f32 %v2473_v44, %v4312_v5  ;;  %v2356_v5 = vsub.f32 %v4299_v45, %v4332_v17 }
 0x4af   :  { %2501 = vperm.xlu1 %3488, %v2487_v59   ;;  %v2370_v54 = vmul.f32 1.442695, %v2356_v5 }
 0x4b1   :  { %v2445_v14 = vpop.permute.xlu1 %2444 }
 0x4b2   :  { %v2465_v38 = vadd.f32 %v3516_v4, %v2445_v14 }
 0x4b4   :  { %3517 = vlog2.f32 %v2465_v38 }
 0x4b5   :  { %3519 = vpow2.f32 %v2362_v58 }
 0x4b6   :  { %3521 = vpow2.f32 %v2366_v46 }
 0x4b7   :  { %3523 = vpow2.f32 %v2368_v27 }
 0x4b8   :  { %3525 = vpow2.f32 %v2370_v54 }
 0x4ba   :  { %v3518_v7 = vpop.eup %3517 }
 0x4bb   :  { %v2477_v62 = vmul.f32 0.6931472, %v3518_v7  ;;  %v3520_v28 = vpop.eup %3519 }
 0x4bc   :  { %v3522_v3 = vpop.eup %3521 }
 0x4bd   :  { %v2489_v9 = vadd.f32 %v2477_v62, %v4327_v36  ;;  %v2466_v19 = vadd.f32 %v3522_v3, %v2447_v35  ;;  %v3524_v52 = vpop.eup %3523 }
 0x4be   :  { %v3526_v30 = vpop.eup %3525 }
 0x4bf   :  { %2511 = vperm.xlu1 %3488, %v2489_v9  }
 0x4c1   :  { %v2443_v56 = vpop.permute.xlu0 %2442 }
 0x4c2   :  { %v2464_v20 = vadd.f32 %v3520_v28, %v2443_v56 }
 0x4c4   :  { %3527 = vlog2.f32 %v2464_v20 }
 0x4c5   :  { %3529 = vlog2.f32 %v2466_v19 }
 0x4c6   :  { %3531 = vpow2.f32 %v2372_v25 }
 0x4c9   :  { %v2449_v36 = vpop.permute.xlu0 %2448 }
 0x4ca   :  { %v3528_v37 = vpop.eup %3527  ;;  %v2451_v40 = vpop.permute.xlu1 %2450  ;;  %v2467_v13 = vadd.f32 %v3524_v52, %v2449_v36 }
 0x4cb   :  { %v2475_v48 = vmul.f32 0.6931472, %v3528_v37  ;;  %v2468_v50 = vadd.f32 %v3526_v30, %v2451_v40  ;;  %v3530_v34 = vpop.eup %3529 }
 0x4cc   :  { %3533 = vlog2.f32 %v2467_v13  ;;  %v3532_v8 = vpop.eup %3531  ;;  %v2479_v53 = vmul.f32 0.6931472, %v3530_v34 }
 0x4cd   :  { %3535 = vlog2.f32 %v2468_v50  ;;  %v2488_v24 = vadd.f32 %v2475_v48, %v4319_v33 }
 0x4ce   :  { %v2490_v18 = vadd.f32 %v2479_v53, %v4316_v49 }
 0x4cf   :  { %2506 = vperm.xlu2 %3489, %v2488_v24  }
 0x4d1   :  { %v2453_v29 = vpop.permute.xlu2 %2452 }
 0x4d2   :  { %v3534_v1 = vpop.eup %3533  ;;  %v2469_v11 = vadd.f32 %v3532_v8, %v2453_v29 }
 0x4d3   :  { %v3536_v32 = vpop.eup %3535  ;;  %v2481_v26 = vmul.f32 0.6931472, %v3534_v1 }
 0x4d4   :  { %v2483_v39 = vmul.f32 0.6931472, %v3536_v32  ;;  %3537 = vlog2.f32 %v2469_v11 }
 0x4d5   :  { %v2491_v23 = vadd.f32 %v2481_v26, %v4324_v12 }
 0x4d6   :  { %v2492_v10 = vadd.f32 %v2483_v39, %v4332_v17 }
 0x4d7   :  { %2516 = vperm.xlu2 %3489, %v2490_v18   ;;  %2521 = vperm.xlu0 %3487, %v2491_v23  }
 0x4d8   :  { %2526 = vperm.xlu1 %3488, %v2492_v10  }
 0x4da   :  { %v3538_v33 = vpop.eup %3537 }
 0x4db   :  { %v2485_v16 = vmul.f32 0.6931472, %v3538_v33 }
 0x4dd   :  { %v2493_v55 = vadd.f32 %v2485_v16, %v4336_v41 }
 0x4df   :  { %2531 = vperm.xlu2 %3489, %v2493_v55  }
 0x519   :  { %v2497_v57 = vpop.permute.xlu0 %2496 }
 0x51a   :  { %v2534_v21 = vsub.f32 %v4275_v2, %v2497_v57 }
 0x51c   :  { %2543 = vst.msk [vmem:[%s4427_s8] sm:$0xff] %vm2542_vm2, %v2534_v21 }
 0x521   :  { %v2502_v49 = vpop.permute.xlu1 %2501 }
 0x522   :  { %v2535_v12 = vsub.f32 %v4279_v43, %v2502_v49 }
 0x524   :  { %2544 = vst.msk [vmem:[%s4427_s8 + $0x8] sm:$0xff] %vm2542_vm2, %v2535_v12 }
 0x529   :  { %v2507_v17 = vpop.permute.xlu2 %2506 }
 0x52a   :  { %v2536_v41 = vsub.f32 %v4283_v6, %v2507_v17 }
 0x52c   :  { %2545 = vst.msk [vmem:[%s4427_s8 + $0x10] sm:$0xff] %vm2542_vm2, %v2536_v41 }
 0x531   :  { %v2512_v2 = vpop.permute.xlu1 %2511  ;;  %v2517_v0 = vpop.permute.xlu2 %2516 }
 0x532   :  { %v2537_v61 = vsub.f32 %v4287_v15, %v2512_v2  ;;  %v2538_v44 = vsub.f32 %v4291_v22, %v2517_v0 }
 0x534   :  { %2546 = vst.msk [vmem:[%s4427_s8 + $0x18] sm:$0xff] %vm2542_vm2, %v2537_v61 }
 0x535   :  { %2547 = vst.msk [vmem:[%s4427_s8 + $0x20] sm:$0xff] %vm2542_vm2, %v2538_v44 }
 0x539   :  { %v2532_v43 = vpop.permute.xlu2 %2531 }
 0x53a   :  { %v2541_v6 = vsub.f32 %v4303_v60, %v2532_v43 }
 0x53c   :  { %2550 = vst.msk [vmem:[%s4427_s8 + $0x38] sm:$0xff] %vm2542_vm2, %v2541_v6 }
 0x549   :  { %v2522_v15 = vpop.permute.xlu0 %2521 }
 0x54a   :  { %v2527_v22 = vpop.permute.xlu1 %2526  ;;  %v2539_v59 = vsub.f32 %v4295_v63, %v2522_v15 }
 0x54b   :  { %v2540_v4 = vsub.f32 %v4299_v45, %v2527_v22 }
 0x54c   :  { %2548 = vst.msk [vmem:[%s4427_s8 + $0x28] sm:$0xff] %vm2542_vm2, %v2539_v59 }
 0x54d   :  { %2549 = vst.msk [vmem:[%s4427_s8 + $0x30] sm:$0xff] %vm2542_vm2, %v2540_v4 }
 0x54e   :  { %2555 = vsyncpa [#allocation3], 1 }

// kernel: tpu_custom_call.1
= control target key start
LH: loop header
LB: loop body
LE: loop exit
PB: predicated region body
PF: predicated region fallthrough
CT: control target
= control target key end

     0   :  { %13 = vsyncpa [#allocation3], 0  ;;  %s3565_s30 = smov [#allocation2]   ;;  %s3566_s10 = smov 128   ;;  %s4419_s0 = inlined_call_operand.vmem [shape: bf16[64,48], index: 0, kind: input, shape index: {}]   ;;  %s4420_s1 = inlined_call_operand.vmem [shape: bf16[48,1024], index: 1, kind: input, shape index: {}]   ;;  %s4421_s2 = inlined_call_operand.hbm [shape: bf16[1024,256], index: 2, kind: input, shape index: {}]   ;;  %s4422_s3 = inlined_call_operand.vmem [shape: bf16[1,256], index: 3, kind: input, shape index: {}]   ;;  %s4423_s4 = inlined_call_operand.vmem [shape: bf16[256,64], index: 4, kind: input, shape index: {}]   ;;  %s4424_s5 = inlined_call_operand.vmem [shape: bf16[1,64], index: 5, kind: input, shape index: {}]   ;;  %s4425_s6 = inlined_call_operand.vmem [shape: bf16[64,2], index: 6, kind: input, shape index: {}]   ;;  %s4426_s7 = inlined_call_operand.vmem [shape: f32[1,2], index: 7, kind: input, shape index: {}]   ;;  %s4427_s8 = inlined_call_operand.vmem [shape: f32[64,2], index: 8, kind: output, shape index: {}]  }
   0x1   :  { %s22_s29 = sshll.u32 %s4421_s2, 4  ;;  %s24_s9 = sshll.u32 %s3565_s30, 4  ;;  %s23_s29 = int_to_ptr.hbm [resolvable:$true] %s22_s29  ;;  %s25_s9 = int_to_ptr.vmem [resolvable:$true] %s24_s9 }
   0x2   :  { %s3567_s11 = smov 8  }
   0x3   :  { %30 = dma.hbm_to_vmem [thread:$0]  %s23_s29, 16384, %s25_s9, [#allocation3], %s3566_s10, %s3566_s10, %s3567_s11  }
   0x4   :  { %3563 = dma.done.wait [#allocation3], 16384  }
   0x5   :  { %3564 = vsyncadd [#allocation3], 4294950912  ;;  %v2638_v0 = vld [vmem:[%s4420_s1 + $0x80] sm:$0xf]  ;;  %v2646_v2 = vld [vmem:[%s4420_s1 + $0x88] sm:$0xf] }
   0x6   :  { %v3320_v1 = vld [vmem:[%s4420_s1 + $0x9c] sm:$0xf0]  ;;  %v3321_v4 = vld [vmem:[%s4420_s1 + $0xa4] sm:$0xf0]  ;;  %v3316_v14 = vld [vmem:[%s4420_s1 + $0x84] sm:$0xf] }
   0x7   :  { %v2639_v3 = vor.u32 %v3320_v1, %v2638_v0  ;;  %v2606_v5 = vld [vmem:[%s4420_s1 + $0x40] sm:$0xf]  ;;  %v2647_v7 = vor.u32 %v3321_v4, %v2646_v2  ;;  %v2614_v8 = vld [vmem:[%s4420_s1 + $0x48] sm:$0xf]  ;;  %v2640_v15 = vld [vmem:[%s4420_s1 + $0xa0] sm:$0xf0] }
   0x8   :  { %v3312_v6 = vld [vmem:[%s4420_s1 + $0x5c] sm:$0xf0]  ;;  %v3313_v9 = vld [vmem:[%s4420_s1 + $0x64] sm:$0xf0]  ;;  %v2643_v18 = vor.u32 %v3316_v14, %v2640_v15  ;;  %v3317_v19 = vld [vmem:[%s4420_s1 + $0x8c] sm:$0xf] }
   0x9   :  { %236 = vmatpush.bf16.msra.mxu0 %v2639_v3  ;;  %v2607_v10 = vor.u32 %v3312_v6, %v2606_v5  ;;  %v2574_v11 = vld [vmem:[%s4420_s1] sm:$0xf]  ;;  %294 = vmatpush.bf16.msra.mxu2 %v2647_v7  ;;  %v2615_v12 = vor.u32 %v3313_v9, %v2614_v8  ;;  %v2582_v16 = vld [vmem:[%s4420_s1 + $0x8] sm:$0xf]  ;;  %v2648_v20 = vld [vmem:[%s4420_s1 + $0xa8] sm:$0xf0] }
   0xa   :  { %3475 = vmatpush.bf16.msra.mxu3 %v2647_v7  ;;  %v3304_v13 = vld [vmem:[%s4420_s1 + $0x1c] sm:$0xf0]  ;;  %v3305_v17 = vld [vmem:[%s4420_s1 + $0x24] sm:$0xf0]  ;;  %v3308_v22 = vld [vmem:[%s4420_s1 + $0x44] sm:$0xf]  ;;  %3472 = vmatpush.bf16.msra.mxu1 %v2643_v18  ;;  %v2651_v25 = vor.u32 %v3317_v19, %v2648_v20 }
   0xb   :  { %v2575_v21 = vor.u32 %v3304_v13, %v2574_v11  ;;  %v2583_v23 = vor.u32 %v3305_v17, %v2582_v16  ;;  %v2608_v24 = vld [vmem:[%s4420_s1 + $0x60] sm:$0xf0]  ;;  %v3309_v28 = vld [vmem:[%s4420_s1 + $0x4c] sm:$0xf]  ;;  %vm218_vm0 = vcmask 392192   ;;  %v3687_v30 = vld [vmem:[%s4419_s0 + $0x18] sm:$0xff] }
   0xc   :  { %v2611_v26 = vor.u32 %v3308_v22, %v2608_v24  ;;  %v3676_v27 = vld [vmem:[%s4419_s0] sm:$0xff]  ;;  %v2616_v29 = vld [vmem:[%s4420_s1 + $0x68] sm:$0xf0]  ;;  %v2654_v34 = vld [vmem:[%s4420_s1 + $0x90] sm:$0xf]  ;;  %vm2268_vm1 = vcmask 523264  }
   0xd   :  { %237 = vmatpush.bf16.msra.mxu0 %v2607_v10  ;;  %295 = vmatpush.bf16.msra.mxu2 %v2615_v12  ;;  %v2619_v31 = vor.u32 %v3309_v28, %v2616_v29  ;;  %v3301_v32 = vld [vmem:[%s4420_s1 + $0xc] sm:$0xf]  ;;  %v3322_v35 = vld [vmem:[%s4420_s1 + $0xac] sm:$0xf0]  ;;  %v3300_v36 = vld [vmem:[%s4420_s1 + $0x4] sm:$0xf] }
   0xe   :  { %3476 = vmatpush.bf16.msra.mxu3 %v2615_v12  ;;  %3473 = vmatpush.bf16.msra.mxu1 %v2611_v26  ;;  %v2584_v33 = vld [vmem:[%s4420_s1 + $0x28] sm:$0xf0]  ;;  %v2576_v37 = vld [vmem:[%s4420_s1 + $0x20] sm:$0xf0]  ;;  %v2655_v40 = vor.u32 %v3322_v35, %v2654_v34  ;;  %v2622_v41 = vld [vmem:[%s4420_s1 + $0x50] sm:$0xf] }
   0xf   :  { %v2579_v38 = vor.u32 %v3300_v36, %v2576_v37  ;;  %v2587_v39 = vor.u32 %v3301_v32, %v2584_v33  ;;  %v3314_v42 = vld [vmem:[%s4420_s1 + $0x6c] sm:$0xf0]  ;;  %v3722_v43 = vld [vmem:[%s4419_s0 + $0x8] sm:$0xff]  ;;  %v2662_v45 = vld [vmem:[%s4420_s1 + $0x98] sm:$0xf]  ;;  %s3568_s15 = smov 127  }
  0x10   :  { %v2623_v44 = vor.u32 %v3314_v42, %v2622_v41  ;;  %v3323_v46 = vld [vmem:[%s4420_s1 + $0xb4] sm:$0xf0]  ;;  %v3753_v53 = vld [vmem:[%s4419_s0 + $0x10] sm:$0xff]  ;;  %v3319_v60 = vld [vmem:[%s4420_s1 + $0x9c] sm:$0xf]  ;;  %vm2542_vm2 = vcmask 15360  }
  0x11   :  { %238 = vmatpush.bf16.msra.mxu0 %v2575_v21  ;;  %296 = vmatpush.bf16.msra.mxu2 %v2583_v23  ;;  %v2630_v47 = vld [vmem:[%s4420_s1 + $0x58] sm:$0xf]  ;;  %v2663_v48 = vor.u32 %v3323_v46, %v2662_v45  ;;  %v2590_v55 = vld [vmem:[%s4420_s1 + $0x10] sm:$0xf]  ;;  %v3318_v58 = vld [vmem:[%s4420_s1 + $0x94] sm:$0xf] }
  0x12   :  { %3477 = vmatpush.bf16.msra.mxu3 %v2583_v23  ;;  %3474 = vmatpush.bf16.msra.mxu1 %v2579_v38  ;;  %v3315_v49 = vld [vmem:[%s4420_s1 + $0x74] sm:$0xf0]  ;;  %v3306_v56 = vld [vmem:[%s4420_s1 + $0x2c] sm:$0xf0]  ;;  %v2656_v59 = vld [vmem:[%s4420_s1 + $0xb0] sm:$0xf0] }
  0x13   :  { %v2631_v50 = vor.u32 %v3315_v49, %v2630_v47  ;;  %v2598_v51 = vld [vmem:[%s4420_s1 + $0x18] sm:$0xf]  ;;  %v2591_v57 = vor.u32 %v3306_v56, %v2590_v55  ;;  %v2659_v61 = vor.u32 %v3318_v58, %v2656_v59  ;;  %v2664_v62 = vld [vmem:[%s4420_s1 + $0xb8] sm:$0xf0]  ;;  %v3310_v0 = vld [vmem:[%s4420_s1 + $0x54] sm:$0xf] }
  0x14   :  { %2668 = vmatmul.msk.bf16.vlgmr.msra.gmra.mxu0 %vm218_vm0, %v3676_v27  ;;  %2676 = vmatmul.msk.bf16.vlgmr.msra.gmra.mxu2 %vm218_vm0, %v3676_v27  ;;  %v3307_v52 = vld [vmem:[%s4420_s1 + $0x34] sm:$0xf0]  ;;  %v2667_v63 = vor.u32 %v3319_v60, %v2664_v62  ;;  %v2624_v1 = vld [vmem:[%s4420_s1 + $0x70] sm:$0xf0]  ;;  %v3311_v2 = vld [vmem:[%s4420_s1 + $0x5c] sm:$0xf] }
  0x15   :  { %265 = vmatpush.bf16.msrb.mxu0 %v2643_v18  ;;  %2679 = vmatmul.msk.bf16.vlgmr.msra.gmra.mxu3 %vm218_vm0, %v3687_v30  ;;  %v2599_v54 = vor.u32 %v3307_v52, %v2598_v51  ;;  %v2627_v3 = vor.u32 %v3310_v0, %v2624_v1  ;;  %v2632_v4 = vld [vmem:[%s4420_s1 + $0x78] sm:$0xf0]  ;;  %v2758_v5 = vld [vmem:[#allocation2 + $0x70] sm:$0xf]  ;;  %v3339_v6 = vld [vmem:[#allocation2 + $0x74] sm:$0xf0] }
  0x16   :  { %323 = vmatpush.bf16.msrb.mxu3 %v2651_v25  ;;  %2673 = vmatmul.msk.bf16.vlgmr.msra.gmra.mxu1 %vm218_vm0, %v3722_v43  ;;  %v2635_v7 = vor.u32 %v3311_v2, %v2632_v4  ;;  %v2759_v8 = vor.u32 %v3339_v6, %v2758_v5  ;;  %v3303_v9 = vld [vmem:[%s4420_s1 + $0x1c] sm:$0xf]  ;;  %v2750_v11 = vld [vmem:[#allocation2 + $0x60] sm:$0xf]  ;;  %v3337_v12 = vld [vmem:[#allocation2 + $0x64] sm:$0xf0] }
  0x17   :  { %410 = vmatpush.bf16.msrb.mxu2 %v2663_v48  ;;  %381 = vmatpush.bf16.msrb.mxu1 %v2659_v61  ;;  %v2600_v10 = vld [vmem:[%s4420_s1 + $0x38] sm:$0xf0]  ;;  %v3302_v13 = vld [vmem:[%s4420_s1 + $0x14] sm:$0xf]  ;;  %v2751_v16 = vor.u32 %v3337_v12, %v2750_v11  ;;  %v2886_v18 = vld [vmem:[#allocation2 + $0x170] sm:$0xf] }
  0x18   :  { %v2592_v14 = vld [vmem:[%s4420_s1 + $0x30] sm:$0xf0]  ;;  %v2603_v15 = vor.u32 %v3303_v9, %v2600_v10  ;;  %v3371_v19 = vld [vmem:[#allocation2 + $0x174] sm:$0xf0]  ;;  %v2742_v21 = vld [vmem:[#allocation2 + $0x50] sm:$0xf] }
  0x19   :  { %266 = vmatpush.bf16.msrb.mxu0 %v2611_v26  ;;  %v2595_v17 = vor.u32 %v3302_v13, %v2592_v14  ;;  %v2887_v20 = vor.u32 %v3371_v19, %v2886_v18  ;;  %v3335_v22 = vld [vmem:[#allocation2 + $0x54] sm:$0xf0]  ;;  %v2878_v23 = vld [vmem:[#allocation2 + $0x160] sm:$0xf]  ;;  %v3369_v25 = vld [vmem:[#allocation2 + $0x164] sm:$0xf0] }
  0x1a   :  { %324 = vmatpush.bf16.msrb.mxu3 %v2619_v31  ;;  %v2743_v24 = vor.u32 %v3335_v22, %v2742_v21  ;;  %v2734_v26 = vld [vmem:[#allocation2 + $0x40] sm:$0xf]  ;;  %v3333_v28 = vld [vmem:[#allocation2 + $0x44] sm:$0xf0]  ;;  %v2879_v29 = vor.u32 %v3369_v25, %v2878_v23  ;;  %v2870_v31 = vld [vmem:[#allocation2 + $0x150] sm:$0xf] }
  0x1b   :  { %411 = vmatpush.bf16.msrb.mxu2 %v2631_v50  ;;  %382 = vmatpush.bf16.msrb.mxu1 %v2627_v3  ;;  %v3367_v32 = vld [vmem:[#allocation2 + $0x154] sm:$0xf0]  ;;  %v2735_v33 = vor.u32 %v3333_v28, %v2734_v26  ;;  %v2726_v34 = vld [vmem:[#allocation2 + $0x30] sm:$0xf]  ;;  %v2718_v41 = vld [vmem:[#allocation2 + $0x20] sm:$0xf] }
  0x1c   :  { %v3331_v35 = vld [vmem:[#allocation2 + $0x34] sm:$0xf0]  ;;  %v2871_v36 = vor.u32 %v3367_v32, %v2870_v31  ;;  %v3329_v42 = vld [vmem:[#allocation2 + $0x24] sm:$0xf0]  ;;  %v2854_v45 = vld [vmem:[#allocation2 + $0x130] sm:$0xf] }
  0x1d   :  { %267 = vmatpush.bf16.msrb.mxu0 %v2579_v38  ;;  %v2727_v37 = vor.u32 %v3331_v35, %v2726_v34  ;;  %v2862_v38 = vld [vmem:[#allocation2 + $0x140] sm:$0xf]  ;;  %v3363_v46 = vld [vmem:[#allocation2 + $0x134] sm:$0xf0]  ;;  %v2710_v48 = vld [vmem:[#allocation2 + $0x10] sm:$0xf] }
  0x1e   :  { %325 = vmatpush.bf16.msrb.mxu3 %v2587_v39  ;;  %v3365_v39 = vld [vmem:[#allocation2 + $0x144] sm:$0xf0]  ;;  %v2855_v47 = vor.u32 %v3363_v46, %v2854_v45  ;;  %v3327_v49 = vld [vmem:[#allocation2 + $0x14] sm:$0xf0]  ;;  %v2846_v51 = vld [vmem:[#allocation2 + $0x120] sm:$0xf] }
  0x1f   :  { %412 = vmatpush.bf16.msrb.mxu2 %v2599_v54  ;;  %383 = vmatpush.bf16.msrb.mxu1 %v2595_v17  ;;  %v2711_v50 = vor.u32 %v3327_v49, %v2710_v48  ;;  %v3361_v52 = vld [vmem:[#allocation2 + $0x124] sm:$0xf0]  ;;  %v2702_v55 = vld [vmem:[#allocation2] sm:$0xf]  ;;  %v2838_v58 = vld [vmem:[#allocation2 + $0x110] sm:$0xf] }
  0x20   :  { %v2847_v54 = vor.u32 %v3361_v52, %v2846_v51  ;;  %v3325_v56 = vld [vmem:[#allocation2 + $0x4] sm:$0xf0]  ;;  %v3359_v59 = vld [vmem:[#allocation2 + $0x114] sm:$0xf0]  ;;  %v2950_v60 = vld [vmem:[#allocation2 + $0x1f0] sm:$0xf] }
  0x21   :  { %352 = vmatpush.bf16.msra.mxu0 %v2655_v40  ;;  %v3387_v61 = vld [vmem:[#allocation2 + $0x1f4] sm:$0xf0]  ;;  %v2839_v62 = vor.u32 %v3359_v59, %v2838_v58  ;;  %v2822_v0 = vld [vmem:[#allocation2 + $0xf0] sm:$0xf]  ;;  %v2830_v3 = vld [vmem:[#allocation2 + $0x100] sm:$0xf] }
  0x22   :  { %3478 = vmatpush.bf16.msra.mxu3 %v2655_v40  ;;  %v2863_v40 = vor.u32 %v3365_v39, %v2862_v38  ;;  %v3355_v1 = vld [vmem:[#allocation2 + $0xf4] sm:$0xf0]  ;;  %v3357_v4 = vld [vmem:[#allocation2 + $0x104] sm:$0xf0]  ;;  %v2942_v6 = vld [vmem:[#allocation2 + $0x1e0] sm:$0xf] }
  0x23   :  { %1481 = vmatpush.bf16.msra.mxu2 %v2887_v20  ;;  %v2823_v2 = vor.u32 %v3355_v1, %v2822_v0  ;;  %v2831_v5 = vor.u32 %v3357_v4, %v2830_v3  ;;  %v3353_v10 = vld [vmem:[#allocation2 + $0xe4] sm:$0xf0]  ;;  %v2934_v12 = vld [vmem:[#allocation2 + $0x1d0] sm:$0xf]  ;;  %v3383_v13 = vld [vmem:[#allocation2 + $0x1d4] sm:$0xf0] }
  0x24   :  { %2669 = vmatmul.msk.bf16.gmra.mxu0 %vm218_vm0, %v3722_v43  ;;  %2677 = vmatmul.msk.bf16.gmra.mxu2 %vm218_vm0, %v3722_v43  ;;  %v2935_v14 = vor.u32 %v3383_v13, %v2934_v12  ;;  %v2926_v18 = vld [vmem:[#allocation2 + $0x1c0] sm:$0xf]  ;;  %v3381_v19 = vld [vmem:[#allocation2 + $0x1c4] sm:$0xf0]  ;;  %v2918_v21 = vld [vmem:[#allocation2 + $0x1b0] sm:$0xf] }
  0x25   :  { %353 = vmatpush.bf16.msra.mxu0 %v2623_v44  ;;  %2680 = vmatmul.msk.bf16.vlgmr.msrb.gmra.mxu3 %vm218_vm0, %v3676_v27  ;;  %v3379_v22 = vld [vmem:[#allocation2 + $0x1b4] sm:$0xf0]  ;;  %v3349_v25 = vld [vmem:[#allocation2 + $0xc4] sm:$0xf0]  ;;  %v2910_v28 = vld [vmem:[#allocation2 + $0x1a0] sm:$0xf] }
  0x26   :  { %3479 = vmatpush.bf16.msra.mxu3 %v2623_v44  ;;  %2674 = vmatmul.msk.bf16.gmra.mxu1 %vm218_vm0, %v3753_v53  ;;  %v2719_v44 = vor.u32 %v3329_v42, %v2718_v41  ;;  %v2919_v23 = vor.u32 %v3379_v22, %v2918_v21  ;;  %v3375_v38 = vld [vmem:[#allocation2 + $0x194] sm:$0xf0]  ;;  %v2894_v45 = vld [vmem:[#allocation2 + $0x180] sm:$0xf]  ;;  %v3373_v46 = vld [vmem:[#allocation2 + $0x184] sm:$0xf0] }
  0x27   :  { %1482 = vmatpush.bf16.msra.mxu2 %v2879_v29  ;;  %1452 = vmatpush.bf16.msra.mxu1 %v2823_v2  ;;  %v3377_v29 = vld [vmem:[#allocation2 + $0x1a4] sm:$0xf0]  ;;  %v3347_v41 = vld [vmem:[#allocation2 + $0xb4] sm:$0xf0]  ;;  %v2895_v49 = vor.u32 %v3373_v46, %v2894_v45  ;;  %v3126_v4 = vld [vmem:[#allocation2 + $0x350] sm:$0xf] }
  0x28   :  { %v3345_v58 = vld [vmem:[#allocation2 + $0xa4] sm:$0xf0] }
  0x29   :  { %354 = vmatpush.bf16.msra.mxu0 %v2591_v57  ;;  %v3401_v21 = vld [vmem:[#allocation2 + $0x264] sm:$0xf0] }
  0x2a   :  { %3480 = vmatpush.bf16.msra.mxu3 %v2591_v57  ;;  %v2703_v57 = vor.u32 %v3325_v56, %v2702_v55  ;;  %v3435_v55 = vld [vmem:[#allocation2 + $0x374] sm:$0xf0] }
  0x2b   :  { %1483 = vmatpush.bf16.msra.mxu2 %v2871_v36 }
  0x2e   :  { %439 = vmatpush.bf16.msrb.mxu3 %v2667_v63  ;;  %v2951_v63 = vor.u32 %v3387_v61, %v2950_v60  ;;  %v3134_v60 = vld [vmem:[#allocation2 + $0x360] sm:$0xf]  ;;  %v3433_v61 = vld [vmem:[#allocation2 + $0x364] sm:$0xf0] }
  0x2f   :  { %1484 = vmatpush.bf16.msra.mxu2 %v2863_v40  ;;  %v3135_v0 = vor.u32 %v3433_v61, %v3134_v60  ;;  %v3078_v60 = vld [vmem:[#allocation2 + $0x2f0] sm:$0xf]  ;;  %v3419_v61 = vld [vmem:[#allocation2 + $0x2f4] sm:$0xf0] }
  0x32   :  { %440 = vmatpush.bf16.msrb.mxu3 %v2635_v7  ;;  %v3385_v7 = vld [vmem:[#allocation2 + $0x1e4] sm:$0xf0] }
  0x33   :  { %1485 = vmatpush.bf16.msra.mxu2 %v2855_v47  ;;  %v2943_v9 = vor.u32 %v3385_v7, %v2942_v6  ;;  %v3014_v7 = vld [vmem:[#allocation2 + $0x270] sm:$0xf] }
  0x34   :  { %2670 = vmatmul.msk.bf16.gmra.mxu0 %vm218_vm0, %v3753_v53  ;;  %2678 = vmatmul.msk.bf16.gmra.mxu2 %vm218_vm0, %v3753_v53 }
  0x35   :  { %2681 = vmatmul.msk.bf16.gmra.mxu3 %vm218_vm0, %v3722_v43 }
  0x36   :  { %2675 = vmatmul.msk.bf16.gmra.mxu1 %vm218_vm0, %v3687_v30  ;;  %441 = vmatpush.bf16.msrb.mxu3 %v2603_v15  ;;  %v2806_v15 = vld [vmem:[#allocation2 + $0xd0] sm:$0xf] }
  0x37   :  { %1486 = vmatpush.bf16.msra.mxu2 %v2847_v54  ;;  %v3142_v54 = vld [vmem:[#allocation2 + $0x370] sm:$0xf] }
  0x38   :  { %v3143_v56 = vor.u32 %v3435_v55, %v3142_v54  ;;  %v3451_v54 = vld [vmem:[#allocation2 + $0x3f4] sm:$0xf0] }
  0x3b   :  { %1487 = vmatpush.bf16.msra.mxu2 %v2839_v62 }
  0x3f   :  { %1488 = vmatpush.bf16.msra.mxu2 %v2831_v5  ;;  %v3431_v5 = vld [vmem:[#allocation2 + $0x354] sm:$0xf0] }
  0x44   :  { %2671 = vmatmul.msk.bf16.gmra.mxu0 %vm218_vm0, %v3687_v30  ;;  %2692 = vmatmul.msk.bf16.vlgmr.msrb.gmra.mxu2 %vm218_vm0, %v3676_v27 }
  0x45   :  { %2682 = vmatmul.msk.bf16.gmra.mxu3 %vm218_vm0, %v3753_v53  ;;  %1597 = vmatpush.bf16.msrb.mxu2 %v3143_v56 }
  0x46   :  { %2688 = vmatmul.msk.bf16.vlgmr.msrb.gmra.mxu1 %vm218_vm0, %v3676_v27 }
  0x49   :  { %1598 = vmatpush.bf16.msrb.mxu2 %v3135_v0 }
  0x54   :  { %2672 = vmatmul.msk.bf16.vlgmr.msrb.gmra.mxu0 %vm218_vm0, %v3676_v27  ;;  %2693 = vmatmul.msk.bf16.gmra.mxu2 %vm218_vm0, %v3722_v43 }
  0x55   :  { %2683 = vmatmul.msk.bf16.gmra.mxu3 %vm218_vm0, %v3687_v30  ;;  %1423 = vmatpush.bf16.msrb.mxu0 %v2759_v8  ;;  %v2814_v8 = vld [vmem:[#allocation2 + $0xe0] sm:$0xf] }
  0x56   :  { %2689 = vmatmul.msk.bf16.gmra.mxu1 %vm218_vm0, %v3722_v43  ;;  %v2815_v11 = vor.u32 %v3353_v10, %v2814_v8  ;;  %v3403_v8 = vld [vmem:[#allocation2 + $0x274] sm:$0xf0] }
  0x57   :  { %v3343_v10 = vld [vmem:[#allocation2 + $0x94] sm:$0xf0] }
  0x58   :  { %1453 = vmatpush.bf16.msra.mxu1 %v2815_v11  ;;  %v3015_v11 = vor.u32 %v3403_v8, %v3014_v7 }
  0x59   :  { %1424 = vmatpush.bf16.msrb.mxu0 %v2751_v16  ;;  %v3351_v16 = vld [vmem:[#allocation2 + $0xd4] sm:$0xf0] }
  0x5a   :  { %v2807_v17 = vor.u32 %v3351_v16, %v2806_v15  ;;  %v3429_v15 = vld [vmem:[#allocation2 + $0x344] sm:$0xf0] }
  0x5c   :  { %1454 = vmatpush.bf16.msra.mxu1 %v2807_v17 }
  0x5d   :  { %1425 = vmatpush.bf16.msrb.mxu0 %v2743_v24  ;;  %v2798_v24 = vld [vmem:[#allocation2 + $0xc0] sm:$0xf] }
  0x5e   :  { %v2799_v26 = vor.u32 %v3349_v25, %v2798_v24  ;;  %v3110_v24 = vld [vmem:[#allocation2 + $0x330] sm:$0xf]  ;;  %v3427_v25 = vld [vmem:[#allocation2 + $0x334] sm:$0xf0] }
  0x60   :  { %1455 = vmatpush.bf16.msra.mxu1 %v2799_v26  ;;  %v3111_v26 = vor.u32 %v3427_v25, %v3110_v24 }
  0x61   :  { %1426 = vmatpush.bf16.msrb.mxu0 %v2735_v33  ;;  %v2911_v33 = vor.u32 %v3377_v29, %v2910_v28  ;;  %v2766_v28 = vld [vmem:[#allocation2 + $0x80] sm:$0xf]  ;;  %v3341_v29 = vld [vmem:[#allocation2 + $0x84] sm:$0xf0] }
  0x64   :  { %2684 = vmatmul.msk.bf16.vlgmr.msra.gmra.mxu0 %vm218_vm0, %v3676_v27  ;;  %2694 = vmatmul.msk.bf16.gmra.mxu2 %vm218_vm0, %v3753_v53 }
  0x65   :  { %2686 = vmatmul.msk.bf16.vlgmr.msra.gmra.mxu3 %vm218_vm0, %v3753_v53  ;;  %1427 = vmatpush.bf16.msrb.mxu0 %v2727_v37  ;;  %v2902_v37 = vld [vmem:[#allocation2 + $0x190] sm:$0xf] }
  0x66   :  { %1510 = vmatpush.bf16.msra.mxu3 %v2951_v63  ;;  %2690 = vmatmul.msk.bf16.gmra.mxu1 %vm218_vm0, %v3753_v53  ;;  %v2903_v39 = vor.u32 %v3375_v38, %v2902_v37  ;;  %v3425_v37 = vld [vmem:[#allocation2 + $0x324] sm:$0xf0] }
  0x69   :  { %1428 = vmatpush.bf16.msrb.mxu0 %v2719_v44 }
  0x6a   :  { %1511 = vmatpush.bf16.msra.mxu3 %v2943_v9  ;;  %v2774_v9 = vld [vmem:[#allocation2 + $0x90] sm:$0xf] }
  0x6b   :  { %v2775_v13 = vor.u32 %v3343_v10, %v2774_v9  ;;  %v3393_v10 = vld [vmem:[#allocation2 + $0x224] sm:$0xf0] }
  0x6d   :  { %1429 = vmatpush.bf16.msrb.mxu0 %v2711_v50 }
  0x6e   :  { %1512 = vmatpush.bf16.msra.mxu3 %v2935_v14  ;;  %v3118_v14 = vld [vmem:[#allocation2 + $0x340] sm:$0xf] }
  0x71   :  { %1430 = vmatpush.bf16.msrb.mxu0 %v2703_v57  ;;  %v2782_v57 = vld [vmem:[#allocation2 + $0xa0] sm:$0xf] }
  0x72   :  { %v2783_v59 = vor.u32 %v3345_v58, %v2782_v57  ;;  %v2982_v57 = vld [vmem:[#allocation2 + $0x230] sm:$0xf]  ;;  %v3395_v58 = vld [vmem:[#allocation2 + $0x234] sm:$0xf0] }
  0x74   :  { %2685 = vmatmul.msk.bf16.gmra.mxu0 %vm218_vm0, %v3722_v43  ;;  %2695 = vmatmul.msk.bf16.gmra.mxu2 %vm218_vm0, %v3687_v30 }
  0x75   :  { %2687 = vmatmul.msk.bf16.gmra.mxu3 %vm218_vm0, %v3687_v30  ;;  %1539 = vmatpush.bf16.msra.mxu0 %v3015_v11 }
  0x76   :  { %2691 = vmatmul.msk.bf16.gmra.mxu1 %vm218_vm0, %v3687_v30 }
  0x85   :  { %2696 = vmatmul.msk.bf16.vlgmr.msrb.gmra.mxu3 %vm218_vm0, %v3676_v27  ;;  %v2927_v27 = vor.u32 %v3381_v19, %v2926_v18  ;;  %v3119_v18 = vor.u32 %v3429_v15, %v3118_v14  ;;  %v3198_v15 = vld [vmem:[#allocation2 + $0x3e0] sm:$0xf] }
  0x87   :  { %1513 = vmatpush.bf16.msra.mxu3 %v2927_v27 }
  0x8b   :  { %1514 = vmatpush.bf16.msra.mxu3 %v2919_v23 }
  0x8f   :  { %1515 = vmatpush.bf16.msra.mxu3 %v2911_v33  ;;  %v2767_v33 = vor.u32 %v3341_v29, %v2766_v28  ;;  %v2958_v28 = vld [vmem:[#allocation2 + $0x200] sm:$0xf]  ;;  %v3389_v29 = vld [vmem:[#allocation2 + $0x204] sm:$0xf0] }
  0x91   :  { %v240_v20 = vpop.f32.mrf.mxu0 }
  0x92   :  { %v559_v35 = vmax.f32 %v240_v20, 0.0  ;;  %v3006_v20 = vld [vmem:[#allocation2 + $0x260] sm:$0xf] }
  0x93   :  { %1516 = vmatpush.bf16.msra.mxu3 %v2903_v39  ;;  %v3007_v22 = vor.u32 %v3401_v21, %v3006_v20  ;;  %v3878_v14 = vpop.f32.mrf.mxu1  ;;  %v3391_v20 = vld [vmem:[#allocation2 + $0x214] sm:$0xf0] }
  0x95   :  { %2697 = vmatmul.msk.bf16.gmra.mxu3 %vm218_vm0, %v3722_v43  ;;  %v2790_v43 = vld [vmem:[#allocation2 + $0xb0] sm:$0xf]  ;;  %1540 = vmatpush.bf16.msra.mxu0 %v3007_v22 }
  0x96   :  { %v2791_v44 = vor.u32 %v3347_v41, %v2790_v43 }
  0x97   :  { %v298_v31 = vpop.f32.mrf.mxu2  ;;  %1517 = vmatpush.bf16.msra.mxu3 %v2895_v49  ;;  %v3423_v49 = vld [vmem:[#allocation2 + $0x314] sm:$0xf0] }
  0x98   :  { %v3843_v32 = vpop.f32.mrf.mxu3  ;;  %v561_v42 = vmax.f32 %v298_v31, 0.0  ;;  %1456 = vmatpush.bf16.msra.mxu1 %v2791_v44  ;;  %v2998_v31 = vld [vmem:[#allocation2 + $0x250] sm:$0xf] }
  0x99   :  { %v242_v34 = vpop.f32.mrf.mxu0 }
  0x9a   :  { %v567_v36 = vmax.f32 %v242_v34, 0.0  ;;  %v3399_v34 = vld [vmem:[#allocation2 + $0x254] sm:$0xf0] }
  0x9c   :  { %v3845_v40 = vpack.c.bf16 %v567_v36, %v559_v35  ;;  %1457 = vmatpush.bf16.msra.mxu1 %v2783_v59  ;;  %v2999_v35 = vor.u32 %v3399_v34, %v2998_v31  ;;  %v3102_v36 = vld [vmem:[#allocation2 + $0x320] sm:$0xf]  ;;  %v2959_v34 = vor.u32 %v3389_v29, %v2958_v28 }
  0x9d   :  { %v3103_v43 = vor.u32 %v3425_v37, %v3102_v36  ;;  %v3190_v36 = vld [vmem:[#allocation2 + $0x3d0] sm:$0xf]  ;;  %v3447_v37 = vld [vmem:[#allocation2 + $0x3d4] sm:$0xf0]  ;;  %v3038_v28 = vld [vmem:[#allocation2 + $0x2a0] sm:$0xf] }
  0x9e   :  { %1431 = vmatmul.bf16.vlgmr.msrb.gmra.mxu0 %v3845_v40 }
  0x9f   :  { %v300_v47 = vpop.f32.mrf.mxu2  ;;  %1541 = vmatpush.bf16.msra.mxu0 %v2999_v35 }
  0xa0   :  { %v3848_v48 = vpop.f32.mrf.mxu3  ;;  %v569_v50 = vmax.f32 %v300_v47, 0.0  ;;  %1458 = vmatpush.bf16.msra.mxu1 %v2775_v13  ;;  %v3094_v47 = vld [vmem:[#allocation2 + $0x310] sm:$0xf] }
  0xa1   :  { %v245_v51 = vpop.f32.mrf.mxu0  ;;  %v3095_v55 = vor.u32 %v3423_v49, %v3094_v47 }
  0xa2   :  { %v3850_v52 = vpack.c.bf16 %v569_v50, %v561_v42  ;;  %v575_v2 = vmax.f32 %v245_v51, 0.0  ;;  %v2990_v42 = vld [vmem:[#allocation2 + $0x240] sm:$0xf]  ;;  %v3206_v51 = vld [vmem:[#allocation2 + $0x3f0] sm:$0xf] }
  0xa3   :  { %v3207_v56 = vor.u32 %v3451_v54, %v3206_v51 }
  0xa4   :  { %1489 = vmatmul.bf16.vlgmr.msra.gmra.mxu2 %v3850_v52  ;;  %1459 = vmatpush.bf16.msra.mxu1 %v2767_v33 }
  0xa5   :  { %2698 = vmatmul.msk.bf16.gmra.mxu3 %vm218_vm0, %v3753_v53  ;;  %v3127_v53 = vor.u32 %v3431_v5, %v3126_v4  ;;  %v3421_v4 = vld [vmem:[#allocation2 + $0x304] sm:$0xf0] }
  0xa6   :  { %1626 = vmatpush.bf16.msrb.mxu3 %v3207_v56 }
  0xa7   :  { %v303_v62 = vpop.f32.mrf.mxu2  ;;  %1599 = vmatpush.bf16.msrb.mxu2 %v3127_v53 }
  0xa8   :  { %v3855_v63 = vpop.f32.mrf.mxu3  ;;  %v577_v12 = vmax.f32 %v303_v62, 0.0  ;;  %v2983_v62 = vor.u32 %v3395_v58, %v2982_v57  ;;  %v3054_v57 = vld [vmem:[#allocation2 + $0x2c0] sm:$0xf]  ;;  %v3413_v58 = vld [vmem:[#allocation2 + $0x2c4] sm:$0xf0] }
  0xa9   :  { %v247_v1 = vpop.f32.mrf.mxu0  ;;  %v562_v59 = vmax.f32 %v3855_v63, 0.0  ;;  %v2974_v63 = vld [vmem:[#allocation2 + $0x220] sm:$0xf] }
  0xaa   :  { %v583_v3 = vmax.f32 %v247_v1, 0.0  ;;  %v2975_v11 = vor.u32 %v3393_v10, %v2974_v63  ;;  %v3411_v63 = vld [vmem:[#allocation2 + $0x2b4] sm:$0xf0] }
  0xab   :  { %1600 = vmatpush.bf16.msrb.mxu2 %v3119_v18 }
  0xac   :  { %v3857_v6 = vpack.c.bf16 %v583_v3, %v575_v2  ;;  %v3079_v2 = vor.u32 %v3419_v61, %v3078_v60  ;;  %v3086_v3 = vld [vmem:[#allocation2 + $0x300] sm:$0xf]  ;;  %v3055_v60 = vor.u32 %v3413_v58, %v3054_v57 }
  0xad   :  { %v3087_v7 = vor.u32 %v3421_v4, %v3086_v3  ;;  %v3174_v4 = vld [vmem:[#allocation2 + $0x3b0] sm:$0xf] }
  0xae   :  { %1436 = vmatmul.bf16.gmra.mxu0 %v3857_v6  ;;  %1568 = vmatpush.bf16.msrb.mxu1 %v3079_v2 }
  0xaf   :  { %v305_v16 = vpop.f32.mrf.mxu2  ;;  %1601 = vmatpush.bf16.msrb.mxu2 %v3111_v26 }
  0xb0   :  { %v3860_v17 = vpop.f32.mrf.mxu3  ;;  %v585_v19 = vmax.f32 %v305_v16, 0.0  ;;  %v3449_v16 = vld [vmem:[#allocation2 + $0x3e4] sm:$0xf0] }
  0xb1   :  { %v250_v27 = vpop.f32.mrf.mxu0  ;;  %v570_v0 = vmax.f32 %v3860_v17, 0.0  ;;  %v3070_v17 = vld [vmem:[#allocation2 + $0x2e0] sm:$0xf]  ;;  %v3199_v18 = vor.u32 %v3449_v16, %v3198_v15 }
  0xb2   :  { %v3862_v23 = vpack.c.bf16 %v585_v19, %v577_v12  ;;  %v591_v44 = vmax.f32 %v250_v27, 0.0  ;;  %v3417_v19 = vld [vmem:[#allocation2 + $0x2e4] sm:$0xf0]  ;;  %v2966_v27 = vld [vmem:[#allocation2 + $0x210] sm:$0xf] }
  0xb3   :  { %1602 = vmatpush.bf16.msrb.mxu2 %v3103_v43  ;;  %v3874_v12 = vpack.c.bf16 %v570_v0, %v562_v59  ;;  %v3071_v21 = vor.u32 %v3417_v19, %v3070_v17  ;;  %v2967_v22 = vor.u32 %v3391_v20, %v2966_v27  ;;  %1627 = vmatpush.bf16.msrb.mxu3 %v3199_v18 }
  0xb4   :  { %1494 = vmatmul.bf16.gmra.mxu2 %v3862_v23  ;;  %v3191_v43 = vor.u32 %v3447_v37, %v3190_v36  ;;  %v2880_v36 = vld [vmem:[#allocation2 + $0x168] sm:$0xf0]  ;;  %v576_v37 = vmax.f32 %v3878_v14, 0.0 }
  0xb5   :  { %2699 = vmatmul.msk.bf16.gmra.mxu3 %vm218_vm0, %v3687_v30  ;;  %v3397_v30 = vld [vmem:[#allocation2 + $0x244] sm:$0xf0]  ;;  %1569 = vmatpush.bf16.msrb.mxu1 %v3071_v21  ;;  %v3370_v21 = vld [vmem:[#allocation2 + $0x174] sm:$0xf] }
  0xb6   :  { %v2991_v46 = vor.u32 %v3397_v30, %v2990_v42  ;;  %v3062_v42 = vld [vmem:[#allocation2 + $0x2d0] sm:$0xf]  ;;  %v3415_v30 = vld [vmem:[#allocation2 + $0x2d4] sm:$0xf0] }
  0xb7   :  { %v308_v38 = vpop.f32.mrf.mxu2  ;;  %1603 = vmatpush.bf16.msrb.mxu2 %v3095_v55  ;;  %1628 = vmatpush.bf16.msrb.mxu3 %v3191_v43  ;;  %v3063_v47 = vor.u32 %v3415_v30, %v3062_v42 }
  0xb8   :  { %v3867_v39 = vpop.f32.mrf.mxu3  ;;  %1542 = vmatpush.bf16.msra.mxu0 %v2991_v46  ;;  %v593_v1 = vmax.f32 %v308_v38, 0.0  ;;  %v3886_v38 = vpop.f32.mrf.mxu1 }
  0xb9   :  { %v252_v41 = vpop.f32.mrf.mxu0  ;;  %1570 = vmatpush.bf16.msrb.mxu1 %v3063_v47  ;;  %v584_v43 = vmax.f32 %v3886_v38, 0.0 }
  0xba   :  { %v599_v45 = vmax.f32 %v252_v41, 0.0  ;;  %v609_v41 = vmax.f32 %v3843_v32, 0.0  ;;  %v3182_v32 = vld [vmem:[#allocation2 + $0x3c0] sm:$0xf] }
  0xbb   :  { %1604 = vmatpush.bf16.msrb.mxu2 %v3087_v7  ;;  %v3926_v38 = vpack.c.bf16 %v584_v43, %v576_v37  ;;  %v2744_v37 = vld [vmem:[#allocation2 + $0x58] sm:$0xf0] }
  0xbc   :  { %v3869_v50 = vpack.c.bf16 %v599_v45, %v591_v44  ;;  %1543 = vmatpush.bf16.msra.mxu0 %v2983_v62  ;;  %v617_v44 = vmax.f32 %v3848_v48, 0.0  ;;  %v578_v45 = vmax.f32 %v3867_v39, 0.0  ;;  %v3445_v48 = vld [vmem:[#allocation2 + $0x3c4] sm:$0xf0] }
  0xbd   :  { %v3183_v39 = vor.u32 %v3445_v48, %v3182_v32  ;;  %1571 = vmatpush.bf16.msrb.mxu1 %v3055_v60  ;;  %v3338_v60 = vld [vmem:[#allocation2 + $0x74] sm:$0xf] }
  0xbe   :  { %1441 = vmatmul.bf16.gmra.mxu0 %v3869_v50  ;;  %v3894_v56 = vpack.c.bf16 %v617_v44, %v609_v41 }
  0xbf   :  { %v310_v5 = vpop.f32.mrf.mxu2  ;;  %1629 = vmatpush.bf16.msrb.mxu3 %v3183_v39 }
  0xc0   :  { %v334_v53 = vpop.f32.mrf.mxu3  ;;  %v601_v8 = vmax.f32 %v310_v5, 0.0  ;;  %1544 = vmatpush.bf16.msra.mxu0 %v2975_v11  ;;  %v3898_v59 = vpop.f32.mrf.mxu1  ;;  %v3443_v5 = vld [vmem:[#allocation2 + $0x3b4] sm:$0xf0] }
  0xc1   :  { %v255_v9 = vpop.f32.mrf.mxu0  ;;  %v586_v46 = vmax.f32 %v334_v53, 0.0 }
  0xc2   :  { %v3876_v13 = vpack.c.bf16 %v601_v8, %v593_v1  ;;  %v607_v31 = vmax.f32 %v255_v9, 0.0  ;;  %v3175_v8 = vor.u32 %v3443_v5, %v3174_v4  ;;  %v3046_v9 = vld [vmem:[#allocation2 + $0x2b0] sm:$0xf]  ;;  %v3407_v5 = vld [vmem:[#allocation2 + $0x294] sm:$0xf0] }
  0xc3   :  { %v3892_v55 = vpack.c.bf16 %v586_v46, %v578_v45  ;;  %v3047_v15 = vor.u32 %v3411_v63, %v3046_v9  ;;  %v3158_v45 = vld [vmem:[#allocation2 + $0x390] sm:$0xf]  ;;  %v3439_v46 = vld [vmem:[#allocation2 + $0x394] sm:$0xf0]  ;;  %v3437_v9 = vld [vmem:[#allocation2 + $0x384] sm:$0xf0] }
  0xc4   :  { %1499 = vmatmul.bf16.gmra.mxu2 %v3876_v13  ;;  %1545 = vmatpush.bf16.msra.mxu0 %v2967_v22  ;;  %v2888_v22 = vld [vmem:[#allocation2 + $0x178] sm:$0xf0]  ;;  %v3030_v4 = vld [vmem:[#allocation2 + $0x290] sm:$0xf]  ;;  %v3364_v63 = vld [vmem:[#allocation2 + $0x144] sm:$0xf] }
  0xc5   :  { %1518 = vmatmul.bf16.vlgmr.msra.gmra.mxu3 %v3874_v12  ;;  %1572 = vmatpush.bf16.msrb.mxu1 %v3047_v15 }
  0xc6   :  { %1630 = vmatpush.bf16.msrb.mxu3 %v3175_v8  ;;  %v3150_v8 = vld [vmem:[#allocation2 + $0x380] sm:$0xf] }
  0xc7   :  { %v414_v25 = vpop.f32.mrf.mxu2 }
  0xc8   :  { %v3882_v24 = vpop.f32.mrf.mxu3  ;;  %1546 = vmatpush.bf16.msra.mxu0 %v2959_v34  ;;  %v565_v53 = vmax.f32 %v414_v25, 0.0  ;;  %v3912_v19 = vpop.f32.mrf.mxu1  ;;  %v2891_v25 = vor.u32 %v3370_v21, %v2888_v22  ;;  %v3368_v34 = vld [vmem:[#allocation2 + $0x164] sm:$0xf] }
  0xc9   :  { %v257_v26 = vpop.f32.mrf.mxu0  ;;  %v594_v10 = vmax.f32 %v3882_v24, 0.0  ;;  %v3166_v24 = vld [vmem:[#allocation2 + $0x3a0] sm:$0xf]  ;;  %v2883_v30 = vor.u32 %v3368_v34, %v2880_v36 }
  0xca   :  { %v615_v33 = vmax.f32 %v257_v26, 0.0  ;;  %v3441_v26 = vld [vmem:[#allocation2 + $0x3a4] sm:$0xf0]  ;;  %1713 = vmatpush.bf16.msra.mxu2 %v2891_v25  ;;  %v3362_v25 = vld [vmem:[#allocation2 + $0x134] sm:$0xf] }
  0xcb   :  { %v3167_v29 = vor.u32 %v3441_v26, %v3166_v24  ;;  %v2856_v24 = vld [vmem:[#allocation2 + $0x138] sm:$0xf0] }
  0xcc   :  { %v3884_v35 = vpack.c.bf16 %v615_v33, %v607_v31  ;;  %v3409_v31 = vld [vmem:[#allocation2 + $0x2a4] sm:$0xf0]  ;;  %v2859_v26 = vor.u32 %v3362_v25, %v2856_v24 }
  0xcd   :  { %v3039_v33 = vor.u32 %v3409_v31, %v3038_v28  ;;  %1631 = vmatpush.bf16.msrb.mxu3 %v3167_v29  ;;  %v3022_v29 = vld [vmem:[#allocation2 + $0x280] sm:$0xf]  ;;  %v3405_v31 = vld [vmem:[#allocation2 + $0x284] sm:$0xf0] }
  0xce   :  { %1446 = vmatmul.bf16.gmra.mxu0 %v3884_v35  ;;  %1714 = vmatpush.bf16.msra.mxu2 %v2883_v30  ;;  %v3023_v36 = vor.u32 %v3405_v31, %v3022_v29  ;;  %v2848_v30 = vld [vmem:[#allocation2 + $0x128] sm:$0xf0] }
  0xcf   :  { %v416_v51 = vpop.f32.mrf.mxu2  ;;  %1573 = vmatpush.bf16.msrb.mxu1 %v3039_v33  ;;  %v3334_v33 = vld [vmem:[#allocation2 + $0x54] sm:$0xf]  ;;  %v2720_v29 = vld [vmem:[#allocation2 + $0x28] sm:$0xf0] }
  0xd0   :  { %v339_v49 = vpop.f32.mrf.mxu3  ;;  %v573_v7 = vmax.f32 %v416_v51, 0.0  ;;  %v3366_v51 = vld [vmem:[#allocation2 + $0x154] sm:$0xf]  ;;  %v3922_v32 = vpop.f32.mrf.mxu1  ;;  %v2747_v43 = vor.u32 %v3334_v33, %v2744_v37  ;;  %v3384_v33 = vld [vmem:[#allocation2 + $0x1e4] sm:$0xf] }
  0xd1   :  { %v269_v54 = vpop.f32.mrf.mxu0  ;;  %v602_v11 = vmax.f32 %v339_v49, 0.0  ;;  %v3159_v49 = vor.u32 %v3439_v46, %v3158_v45  ;;  %v600_v45 = vmax.f32 %v3912_v19, 0.0  ;;  %v3358_v19 = vld [vmem:[#allocation2 + $0x114] sm:$0xf] }
  0xd2   :  { %v560_v1 = vmax.f32 %v269_v54, 0.0  ;;  %v3910_v17 = vpack.c.bf16 %v573_v7, %v565_v53  ;;  %v2872_v54 = vld [vmem:[#allocation2 + $0x158] sm:$0xf0]  ;;  %v3031_v7 = vor.u32 %v3407_v5, %v3030_v4 }
  0xd3   :  { %v3914_v20 = vpack.c.bf16 %v602_v11, %v594_v10  ;;  %v2875_v48 = vor.u32 %v3366_v51, %v2872_v54  ;;  %1632 = vmatpush.bf16.msrb.mxu3 %v3159_v49  ;;  %v3151_v10 = vor.u32 %v3437_v9, %v3150_v8  ;;  %v2864_v11 = vld [vmem:[#allocation2 + $0x148] sm:$0xf0]  ;;  %v3332_v54 = vld [vmem:[#allocation2 + $0x44] sm:$0xf]  ;;  %v2840_v4 = vld [vmem:[#allocation2 + $0x118] sm:$0xf0] }
  0xd4   :  { %1504 = vmatmul.bf16.gmra.mxu2 %v3894_v56  ;;  %1574 = vmatpush.bf16.msrb.mxu1 %v3031_v7  ;;  %v2843_v7 = vor.u32 %v3358_v19, %v2840_v4  ;;  %v3330_v8 = vld [vmem:[#allocation2 + $0x34] sm:$0xf]  ;;  %v2728_v9 = vld [vmem:[#allocation2 + $0x38] sm:$0xf0] }
  0xd5   :  { %1523 = vmatmul.bf16.gmra.mxu3 %v3892_v55  ;;  %1715 = vmatpush.bf16.msra.mxu2 %v2875_v48  ;;  %v2736_v48 = vld [vmem:[#allocation2 + $0x48] sm:$0xf0]  ;;  %v3382_v19 = vld [vmem:[#allocation2 + $0x1d4] sm:$0xf]  ;;  %v2936_v4 = vld [vmem:[#allocation2 + $0x1d8] sm:$0xf0] }
  0xd7   :  { %v3902_v62 = vpop.f32.mrf.mxu2  ;;  %1633 = vmatpush.bf16.msrb.mxu3 %v3151_v10  ;;  %v2824_v10 = vld [vmem:[#allocation2 + $0xf8] sm:$0xf0] }
  0xd8   :  { %v3900_v61 = vpop.f32.mrf.mxu3  ;;  %v581_v39 = vmax.f32 %v3902_v62, 0.0  ;;  %v3943_v28 = vpop.f32.mrf.mxu1  ;;  %1575 = vmatpush.bf16.msrb.mxu1 %v3023_v36  ;;  %v3352_v36 = vld [vmem:[#allocation2 + $0xe4] sm:$0xf] }
  0xd9   :  { %v271_v0 = vpop.f32.mrf.mxu0 }
  0xda   :  { %v568_v2 = vmax.f32 %v271_v0, 0.0  ;;  %v2760_v0 = vld [vmem:[#allocation2 + $0x78] sm:$0xf0] }
  0xdb   :  { %v2763_v53 = vor.u32 %v3338_v60, %v2760_v0  ;;  %v3386_v60 = vld [vmem:[#allocation2 + $0x1f4] sm:$0xf]  ;;  %v2952_v0 = vld [vmem:[#allocation2 + $0x1f8] sm:$0xf0] }
  0xdc   :  { %v3904_v3 = vpack.c.bf16 %v568_v2, %v560_v1  ;;  %v610_v1 = vmax.f32 %v3900_v61, 0.0 }
  0xdd   :  { %1655 = vmatpush.bf16.msrb.mxu0 %v2763_v53 }
  0xde   :  { %1460 = vmatmul.bf16.vlgmr.msra.gmra.mxu1 %v3904_v3 }
  0xdf   :  { %v421_v27 = vpop.f32.mrf.mxu2 }
  0xe0   :  { %v3908_v16 = vpop.f32.mrf.mxu3  ;;  %v589_v58 = vmax.f32 %v421_v27, 0.0  ;;  %v2752_v27 = vld [vmem:[#allocation2 + $0x68] sm:$0xf0] }
  0xe1   :  { %v356_v18 = vpop.f32.mrf.mxu0  ;;  %v618_v2 = vmax.f32 %v3908_v16, 0.0  ;;  %v2867_v16 = vor.u32 %v3364_v63, %v2864_v11  ;;  %v3354_v63 = vld [vmem:[#allocation2 + $0xf4] sm:$0xf]  ;;  %v2731_v11 = vor.u32 %v3330_v8, %v2728_v9 }
  0xe2   :  { %v563_v41 = vmax.f32 %v356_v18, 0.0  ;;  %v3937_v61 = vpack.c.bf16 %v589_v58, %v581_v39  ;;  %v3336_v18 = vld [vmem:[#allocation2 + $0x64] sm:$0xf]  ;;  %v2739_v58 = vor.u32 %v3332_v54, %v2736_v48  ;;  %v616_v54 = vmax.f32 %v3943_v28, 0.0  ;;  %v3350_v28 = vld [vmem:[#allocation2 + $0xd4] sm:$0xf] }
  0xe3   :  { %v2755_v21 = vor.u32 %v3336_v18, %v2752_v27  ;;  %v3939_v22 = vpack.c.bf16 %v618_v2, %v610_v1  ;;  %1716 = vmatpush.bf16.msra.mxu2 %v2867_v16  ;;  %v2827_v16 = vor.u32 %v3354_v63, %v2824_v10  ;;  %v3356_v18 = vld [vmem:[#allocation2 + $0x104] sm:$0xf]  ;;  %v2832_v27 = vld [vmem:[#allocation2 + $0x108] sm:$0xf0] }
  0xe4   :  { %1605 = vmatmul.bf16.vlgmr.msrb.gmra.mxu2 %v3910_v17  ;;  %v2835_v25 = vor.u32 %v3356_v18, %v2832_v27  ;;  %v3380_v27 = vld [vmem:[#allocation2 + $0x1c4] sm:$0xf] }
  0xe5   :  { %1528 = vmatmul.bf16.gmra.mxu3 %v3914_v20  ;;  %1656 = vmatpush.bf16.msrb.mxu0 %v2755_v21 }
  0xe6   :  { %1684 = vmatpush.bf16.msra.mxu1 %v2827_v16 }
  0xe7   :  { %v3928_v57 = vpop.f32.mrf.mxu2  ;;  %1717 = vmatpush.bf16.msra.mxu2 %v2859_v26  ;;  %v3328_v26 = vld [vmem:[#allocation2 + $0x24] sm:$0xf] }
  0xe8   :  { %v3920_v42 = vpop.f32.mrf.mxu3  ;;  %v597_v5 = vmax.f32 %v3928_v57, 0.0  ;;  %v2723_v31 = vor.u32 %v3328_v26, %v2720_v29  ;;  %v2800_v29 = vld [vmem:[#allocation2 + $0xc8] sm:$0xf0] }
  0xe9   :  { %v358_v44 = vpop.f32.mrf.mxu0  ;;  %1657 = vmatpush.bf16.msrb.mxu0 %v2747_v43  ;;  %v2816_v43 = vld [vmem:[#allocation2 + $0xe8] sm:$0xf0] }
  0xea   :  { %v571_v47 = vmax.f32 %v358_v44, 0.0  ;;  %v592_v44 = vmax.f32 %v3898_v59, 0.0  ;;  %v2955_v59 = vor.u32 %v3386_v60, %v2952_v0  ;;  %v2704_v60 = vld [vmem:[#allocation2 + $0x8] sm:$0xf0] }
  0xec   :  { %v3924_v14 = vpack.c.bf16 %v571_v47, %v563_v41  ;;  %v3360_v41 = vld [vmem:[#allocation2 + $0x124] sm:$0xf]  ;;  %v3951_v2 = vpack.c.bf16 %v600_v45, %v592_v44  ;;  %1742 = vmatpush.bf16.msra.mxu3 %v2955_v59  ;;  %v2819_v44 = vor.u32 %v3352_v36, %v2816_v43 }
  0xed   :  { %v2851_v49 = vor.u32 %v3360_v41, %v2848_v30  ;;  %1658 = vmatpush.bf16.msrb.mxu0 %v2739_v58  ;;  %v3326_v41 = vld [vmem:[#allocation2 + $0x14] sm:$0xf]  ;;  %v2712_v30 = vld [vmem:[#allocation2 + $0x18] sm:$0xf0]  ;;  %v3324_v58 = vld [vmem:[#allocation2 + $0x4] sm:$0xf] }
  0xee   :  { %1465 = vmatmul.bf16.gmra.mxu1 %v3926_v38  ;;  %1547 = vmatmul.bf16.vlgmr.msra.gmra.mxu0 %v3924_v14  ;;  %v2715_v45 = vor.u32 %v3326_v41, %v2712_v30  ;;  %v2707_v59 = vor.u32 %v3324_v58, %v2704_v60  ;;  %v3378_v41 = vld [vmem:[#allocation2 + $0x1b4] sm:$0xf]  ;;  %v2920_v30 = vld [vmem:[#allocation2 + $0x1b8] sm:$0xf0] }
  0xef   :  { %v426_v34 = vpop.f32.mrf.mxu2  ;;  %1718 = vmatpush.bf16.msra.mxu2 %v2851_v49  ;;  %1685 = vmatpush.bf16.msra.mxu1 %v2819_v44  ;;  %v3434_v60 = vld [vmem:[#allocation2 + $0x374] sm:$0xf] }
  0xf0   :  { %v3935_v62 = vpop.f32.mrf.mxu3  ;;  %v605_v53 = vmax.f32 %v426_v34, 0.0  ;;  %v2944_v34 = vld [vmem:[#allocation2 + $0x1e8] sm:$0xf0] }
  0xf1   :  { %v361_v15 = vpop.f32.mrf.mxu0  ;;  %1659 = vmatpush.bf16.msrb.mxu0 %v2731_v11  ;;  %v2947_v37 = vor.u32 %v3384_v33, %v2944_v34  ;;  %v603_v49 = vmax.f32 %v3935_v62, 0.0  ;;  %v2939_v62 = vor.u32 %v3382_v19, %v2936_v4  ;;  %v3376_v19 = vld [vmem:[#allocation2 + $0x1a4] sm:$0xf]  ;;  %v2912_v4 = vld [vmem:[#allocation2 + $0x1a8] sm:$0xf0] }
  0xf2   :  { %v579_v46 = vmax.f32 %v361_v15, 0.0  ;;  %v3956_v15 = vpop.f32.mrf.mxu1  ;;  %v3960_v24 = vpack.c.bf16 %v605_v53, %v597_v5 }
  0xf3   :  { %1719 = vmatpush.bf16.msra.mxu2 %v2843_v7  ;;  %1743 = vmatpush.bf16.msra.mxu3 %v2947_v37  ;;  %v2808_v7 = vld [vmem:[#allocation2 + $0xd8] sm:$0xf0]  ;;  %v564_v36 = vmax.f32 %v3956_v15, 0.0 }
  0xf4   :  { %1610 = vmatmul.bf16.gmra.mxu2 %v3937_v61  ;;  %v2811_v9 = vor.u32 %v3350_v28, %v2808_v7  ;;  %v2792_v15 = vld [vmem:[#allocation2 + $0xb8] sm:$0xf0] }
  0xf5   :  { %1533 = vmatmul.bf16.gmra.mxu3 %v3939_v22  ;;  %1660 = vmatpush.bf16.msrb.mxu0 %v2723_v31 }
  0xf6   :  { %1686 = vmatpush.bf16.msra.mxu1 %v2811_v9  ;;  %v3432_v9 = vld [vmem:[#allocation2 + $0x364] sm:$0xf] }
  0xf7   :  { %v429_v21 = vpop.f32.mrf.mxu2  ;;  %1720 = vmatpush.bf16.msra.mxu2 %v2835_v25  ;;  %1744 = vmatpush.bf16.msra.mxu3 %v2939_v62  ;;  %v3348_v25 = vld [vmem:[#allocation2 + $0xc4] sm:$0xf] }
  0xf8   :  { %v3947_v47 = vpop.f32.mrf.mxu3  ;;  %v613_v53 = vmax.f32 %v429_v21, 0.0  ;;  %v2928_v21 = vld [vmem:[#allocation2 + $0x1c8] sm:$0xf0]  ;;  %v2803_v31 = vor.u32 %v3348_v25, %v2800_v29  ;;  %v3344_v62 = vld [vmem:[#allocation2 + $0xa4] sm:$0xf] }
  0xf9   :  { %v363_v51 = vpop.f32.mrf.mxu0  ;;  %1661 = vmatpush.bf16.msrb.mxu0 %v2715_v45  ;;  %v2931_v26 = vor.u32 %v3380_v27, %v2928_v21  ;;  %v611_v33 = vmax.f32 %v3947_v47, 0.0  ;;  %v3346_v47 = vld [vmem:[#allocation2 + $0xb4] sm:$0xf]  ;;  %v2904_v29 = vld [vmem:[#allocation2 + $0x198] sm:$0xf0] }
  0xfa   :  { %v587_v39 = vmax.f32 %v363_v51, 0.0  ;;  %v608_v51 = vmax.f32 %v3922_v32, 0.0  ;;  %1687 = vmatpush.bf16.msra.mxu1 %v2803_v31  ;;  %v3430_v31 = vld [vmem:[#allocation2 + $0x354] sm:$0xf] }
  0xfb   :  { %1745 = vmatpush.bf16.msra.mxu3 %v2931_v26  ;;  %v3374_v26 = vld [vmem:[#allocation2 + $0x194] sm:$0xf] }
  0xfc   :  { %v3949_v1 = vpack.c.bf16 %v587_v39, %v579_v46  ;;  %v595_v46 = vmax.f32 %v3920_v42, 0.0  ;;  %v387_v39 = vpop.f32.mrf.mxu1  ;;  %v3969_v42 = vpack.c.bf16 %v616_v54, %v608_v51  ;;  %v2795_v54 = vor.u32 %v3346_v47, %v2792_v15  ;;  %v3372_v15 = vld [vmem:[#allocation2 + $0x184] sm:$0xf] }
  0xfd   :  { %1662 = vmatpush.bf16.msrb.mxu0 %v2707_v59  ;;  %v572_v37 = vmax.f32 %v387_v39, 0.0 }
  0xfe   :  { %1470 = vmatmul.bf16.gmra.mxu1 %v3951_v2  ;;  %1552 = vmatmul.bf16.gmra.mxu0 %v3949_v1  ;;  %v3967_v5 = vpack.c.bf16 %v603_v49, %v595_v46  ;;  %v2923_v46 = vor.u32 %v3378_v41, %v2920_v30  ;;  %v3016_v41 = vld [vmem:[#allocation2 + $0x278] sm:$0xf0] }
  0xff   :  { %v431_v0 = vpop.f32.mrf.mxu2  ;;  %v3984_v45 = vpack.c.bf16 %v572_v37, %v564_v36  ;;  %1688 = vmatpush.bf16.msra.mxu1 %v2795_v54  ;;  %v3128_v36 = vld [vmem:[#allocation2 + $0x358] sm:$0xf0]  ;;  %v3428_v54 = vld [vmem:[#allocation2 + $0x344] sm:$0xf] }
 0x100   :  { %v3958_v57 = vpop.f32.mrf.mxu3  ;;  %v621_v32 = vmax.f32 %v431_v0, 0.0  ;;  %1746 = vmatpush.bf16.msra.mxu3 %v2923_v46  ;;  %v3144_v0 = vld [vmem:[#allocation2 + $0x378] sm:$0xf0]  ;;  %v3131_v37 = vor.u32 %v3430_v31, %v3128_v36  ;;  %v3104_v36 = vld [vmem:[#allocation2 + $0x328] sm:$0xf0] }
 0x101   :  { %v619_v34 = vmax.f32 %v3958_v57, 0.0  ;;  %v3147_v59 = vor.u32 %v3434_v60, %v3144_v0  ;;  %v2776_v46 = vld [vmem:[#allocation2 + $0x98] sm:$0xf0]  ;;  %v3120_v0 = vld [vmem:[#allocation2 + $0x348] sm:$0xf0] }
 0x102   :  { %v3973_v10 = vpack.c.bf16 %v621_v32, %v613_v53  ;;  %v2915_v53 = vor.u32 %v3376_v19, %v2912_v4  ;;  %v2784_v32 = vld [vmem:[#allocation2 + $0xa8] sm:$0xf0] }
 0x103   :  { %v3982_v44 = vpack.c.bf16 %v619_v34, %v611_v33  ;;  %1829 = vmatpush.bf16.msrb.mxu2 %v3147_v59  ;;  %v2907_v34 = vor.u32 %v3374_v26, %v2904_v29  ;;  %v3000_v29 = vld [vmem:[#allocation2 + $0x258] sm:$0xf0] }
 0x104   :  { %1615 = vmatmul.bf16.gmra.mxu2 %v3960_v24  ;;  %v390_v18 = vpop.f32.mrf.mxu1  ;;  %1747 = vmatpush.bf16.msra.mxu3 %v2915_v53  ;;  %v3008_v53 = vld [vmem:[#allocation2 + $0x268] sm:$0xf0] }
 0x108   :  { %v443_v48 = vpop.f32.mrf.mxu3  ;;  %1748 = vmatpush.bf16.msra.mxu3 %v2907_v34  ;;  %v3424_v34 = vld [vmem:[#allocation2 + $0x324] sm:$0xf] }
 0x109   :  { %v566_v8 = vmax.f32 %v443_v48, 0.0 }
 0x10c   :  { %v392_v51 = vpop.f32.mrf.mxu1 }
 0x10d   :  { %v588_v27 = vmax.f32 %v392_v51, 0.0 }
 0x10e   :  { %1475 = vmatmul.bf16.gmra.mxu1 %v3969_v42  ;;  %1557 = vmatmul.bf16.gmra.mxu0 %v3967_v5 }
 0x110   :  { %v445_v63 = vpop.f32.mrf.mxu3 }
 0x111   :  { %v574_v11 = vmax.f32 %v445_v63, 0.0  ;;  %v3136_v63 = vld [vmem:[#allocation2 + $0x368] sm:$0xf0] }
 0x113   :  { %v3975_v16 = vpack.c.bf16 %v574_v11, %v566_v8  ;;  %v2787_v8 = vor.u32 %v3344_v62, %v2784_v32  ;;  %v580_v11 = vmax.f32 %v390_v18, 0.0  ;;  %v3342_v18 = vld [vmem:[#allocation2 + $0x94] sm:$0xf]  ;;  %v3400_v62 = vld [vmem:[#allocation2 + $0x264] sm:$0xf] }
 0x114   :  { %1620 = vmatmul.bf16.gmra.mxu2 %v3973_v10  ;;  %v3996_v7 = vpop.f32.mrf.mxu1  ;;  %v2779_v47 = vor.u32 %v3342_v18, %v2776_v46  ;;  %v3011_v32 = vor.u32 %v3400_v62, %v3008_v53  ;;  %v3107_v18 = vor.u32 %v3424_v34, %v3104_v36  ;;  %v3396_v46 = vld [vmem:[#allocation2 + $0x244] sm:$0xf]  ;;  %v3418_v62 = vld [vmem:[#allocation2 + $0x2f4] sm:$0xf]  ;;  %v2976_v34 = vld [vmem:[#allocation2 + $0x228] sm:$0xf0] }
 0x115   :  { %1634 = vmatmul.bf16.vlgmr.msrb.gmra.mxu3 %v3975_v16  ;;  %1689 = vmatpush.bf16.msra.mxu1 %v2787_v8  ;;  %v4000_v33 = vpack.c.bf16 %v588_v27, %v580_v11  ;;  %v3340_v27 = vld [vmem:[#allocation2 + $0x84] sm:$0xf] }
 0x118   :  { %v448_v43 = vpop.f32.mrf.mxu3 }
 0x119   :  { %v582_v57 = vmax.f32 %v448_v43, 0.0  ;;  %v3402_v43 = vld [vmem:[#allocation2 + $0x274] sm:$0xf]  ;;  %1690 = vmatpush.bf16.msra.mxu1 %v2779_v47 }
 0x11a   :  { %v3019_v51 = vor.u32 %v3402_v43, %v3016_v41 }
 0x11b   :  { %v3986_v49 = vpop.f32.mrf.mxu0 }
 0x11c   :  { %1771 = vmatpush.bf16.msra.mxu0 %v3019_v51  ;;  %v397_v4 = vpop.f32.mrf.mxu1 }
 0x11d   :  { %v604_v43 = vmax.f32 %v397_v4, 0.0  ;;  %v3450_v4 = vld [vmem:[#allocation2 + $0x3f4] sm:$0xf] }
 0x11e   :  { %1562 = vmatmul.bf16.gmra.mxu0 %v3982_v44  ;;  %1576 = vmatmul.bf16.vlgmr.msrb.gmra.mxu1 %v3984_v45 }
 0x120   :  { %v450_v48 = vpop.f32.mrf.mxu3  ;;  %1772 = vmatpush.bf16.msra.mxu0 %v3011_v32 }
 0x121   :  { %v590_v39 = vmax.f32 %v450_v48, 0.0 }
 0x123   :  { %v3990_v58 = vpack.c.bf16 %v590_v39, %v582_v57  ;;  %v3994_v28 = vpop.f32.mrf.mxu0  ;;  %v2896_v57 = vld [vmem:[#allocation2 + $0x188] sm:$0xf0] }
 0x124   :  { %1721 = vmatmul.bf16.vlgmr.msra.gmra.mxu2 %v3850_v52  ;;  %v3139_v52 = vor.u32 %v3432_v9, %v3136_v63  ;;  %v2899_v60 = vor.u32 %v3372_v15, %v2896_v57  ;;  %v3426_v9 = vld [vmem:[#allocation2 + $0x334] sm:$0xf]  ;;  %v3112_v63 = vld [vmem:[#allocation2 + $0x338] sm:$0xf0]  ;;  %v400_v15 = vpop.f32.mrf.mxu1 }
 0x125   :  { %1639 = vmatmul.bf16.gmra.mxu3 %v3990_v58  ;;  %v3115_v11 = vor.u32 %v3426_v9, %v3112_v63  ;;  %v3422_v57 = vld [vmem:[#allocation2 + $0x314] sm:$0xf]  ;;  %v3080_v9 = vld [vmem:[#allocation2 + $0x2f8] sm:$0xf0]  ;;  %v3420_v63 = vld [vmem:[#allocation2 + $0x304] sm:$0xf] }
 0x126   :  { %1830 = vmatpush.bf16.msrb.mxu2 %v3139_v52  ;;  %1749 = vmatpush.bf16.msra.mxu3 %v2899_v60  ;;  %v3398_v52 = vld [vmem:[#allocation2 + $0x254] sm:$0xf] }
 0x127   :  { %v3998_v25 = vpop.f32.mrf.mxu2  ;;  %v3003_v31 = vor.u32 %v3398_v52, %v3000_v29  ;;  %v3083_v52 = vor.u32 %v3418_v62, %v3080_v9  ;;  %v2960_v62 = vld [vmem:[#allocation2 + $0x208] sm:$0xf0]  ;;  %v3446_v9 = vld [vmem:[#allocation2 + $0x3d4] sm:$0xf] }
 0x128   :  { %v453_v21 = vpop.f32.mrf.mxu3 }
 0x129   :  { %v598_v30 = vmax.f32 %v453_v21, 0.0  ;;  %v2768_v21 = vld [vmem:[#allocation2 + $0x88] sm:$0xf0]  ;;  %1773 = vmatpush.bf16.msra.mxu0 %v3003_v31  ;;  %v3392_v31 = vld [vmem:[#allocation2 + $0x224] sm:$0xf] }
 0x12a   :  { %1831 = vmatpush.bf16.msrb.mxu2 %v3131_v37  ;;  %v2771_v26 = vor.u32 %v3340_v27, %v2768_v21  ;;  %v596_v37 = vmax.f32 %v3996_v7, 0.0 }
 0x12b   :  { %v4006_v59 = vpop.f32.mrf.mxu0 }
 0x12c   :  { %1691 = vmatpush.bf16.msra.mxu1 %v2771_v26 }
 0x12e   :  { %1581 = vmatmul.bf16.gmra.mxu1 %v4000_v33  ;;  %1663 = vmatmul.bf16.vlgmr.msrb.gmra.mxu0 %v3845_v40  ;;  %v3123_v40 = vor.u32 %v3428_v54, %v3120_v0  ;;  %v3096_v54 = vld [vmem:[#allocation2 + $0x318] sm:$0xf0]  ;;  %v3394_v0 = vld [vmem:[#allocation2 + $0x234] sm:$0xf] }
 0x12f   :  { %v4004_v39 = vpop.f32.mrf.mxu2  ;;  %v3099_v60 = vor.u32 %v3422_v57, %v3096_v54 }
 0x130   :  { %v455_v48 = vpop.f32.mrf.mxu3  ;;  %1832 = vmatpush.bf16.msrb.mxu2 %v3123_v40  ;;  %v3208_v40 = vld [vmem:[#allocation2 + $0x3f8] sm:$0xf0]  ;;  %1800 = vmatpush.bf16.msrb.mxu1 %v3083_v52 }
 0x131   :  { %v606_v19 = vmax.f32 %v455_v48, 0.0  ;;  %v4017_v48 = vpack.c.bf16 %v604_v43, %v596_v37  ;;  %v3211_v32 = vor.u32 %v3450_v4, %v3208_v40  ;;  %v402_v43 = vpop.f32.mrf.mxu1  ;;  %v3388_v40 = vld [vmem:[#allocation2 + $0x204] sm:$0xf]  ;;  %v3064_v52 = vld [vmem:[#allocation2 + $0x2d8] sm:$0xf0] }
 0x133   :  { %v4008_v8 = vpack.c.bf16 %v606_v19, %v598_v30  ;;  %v4015_v47 = vpop.f32.mrf.mxu0  ;;  %v2984_v19 = vld [vmem:[#allocation2 + $0x238] sm:$0xf0]  ;;  %1858 = vmatpush.bf16.msrb.mxu3 %v3211_v32 }
 0x134   :  { %1726 = vmatmul.bf16.gmra.mxu2 %v3862_v23  ;;  %v2992_v23 = vld [vmem:[#allocation2 + $0x248] sm:$0xf0]  ;;  %v2987_v53 = vor.u32 %v3394_v0, %v2984_v19  ;;  %v612_v0 = vmax.f32 %v400_v15, 0.0  ;;  %v3414_v15 = vld [vmem:[#allocation2 + $0x2d4] sm:$0xf] }
 0x135   :  { %1644 = vmatmul.bf16.gmra.mxu3 %v4008_v8  ;;  %1833 = vmatpush.bf16.msrb.mxu2 %v3115_v11  ;;  %v2995_v51 = vor.u32 %v3396_v46, %v2992_v23  ;;  %v3088_v11 = vld [vmem:[#allocation2 + $0x308] sm:$0xf0]  ;;  %v3448_v46 = vld [vmem:[#allocation2 + $0x3e4] sm:$0xf] }
 0x136   :  { %v3091_v26 = vor.u32 %v3420_v63, %v3088_v11  ;;  %v3200_v23 = vld [vmem:[#allocation2 + $0x3e8] sm:$0xf0]  ;;  %v3192_v63 = vld [vmem:[#allocation2 + $0x3d8] sm:$0xf0] }
 0x137   :  { %v4013_v30 = vpop.f32.mrf.mxu2  ;;  %1774 = vmatpush.bf16.msra.mxu0 %v2995_v51  ;;  %v3416_v51 = vld [vmem:[#allocation2 + $0x2e4] sm:$0xf]  ;;  %v3203_v54 = vor.u32 %v3448_v46, %v3200_v23 }
 0x138   :  { %v458_v41 = vpop.f32.mrf.mxu3 }
 0x139   :  { %1834 = vmatpush.bf16.msrb.mxu2 %v3107_v18  ;;  %v614_v7 = vmax.f32 %v458_v41, 0.0  ;;  %v3390_v41 = vld [vmem:[#allocation2 + $0x214] sm:$0xf]  ;;  %v2968_v18 = vld [vmem:[#allocation2 + $0x218] sm:$0xf0]  ;;  %1859 = vmatpush.bf16.msrb.mxu3 %v3203_v54 }
 0x13a   :  { %v2971_v57 = vor.u32 %v3390_v41, %v2968_v18  ;;  %v3056_v41 = vld [vmem:[#allocation2 + $0x2c8] sm:$0xf0] }
 0x13b   :  { %1775 = vmatpush.bf16.msra.mxu0 %v2987_v53  ;;  %v4025_v37 = vpop.f32.mrf.mxu0 }
 0x13d   :  { %1835 = vmatpush.bf16.msrb.mxu2 %v3099_v60  ;;  %v3072_v60 = vld [vmem:[#allocation2 + $0x2e8] sm:$0xf0] }
 0x13e   :  { %1586 = vmatmul.bf16.gmra.mxu1 %v4017_v48  ;;  %1668 = vmatmul.bf16.gmra.mxu0 %v3857_v6  ;;  %v2979_v6 = vor.u32 %v3392_v31, %v2976_v34  ;;  %v3075_v4 = vor.u32 %v3416_v51, %v3072_v60  ;;  %v3444_v34 = vld [vmem:[#allocation2 + $0x3c4] sm:$0xf]  ;;  %v3176_v60 = vld [vmem:[#allocation2 + $0x3b8] sm:$0xf0] }
 0x13f   :  { %v4021_v21 = vpop.f32.mrf.mxu2 }
 0x140   :  { %v460_v27 = vpop.f32.mrf.mxu3  ;;  %1776 = vmatpush.bf16.msra.mxu0 %v2979_v6  ;;  %1801 = vmatpush.bf16.msrb.mxu1 %v3075_v4  ;;  %v3412_v6 = vld [vmem:[#allocation2 + $0x2c4] sm:$0xf]  ;;  %v3048_v4 = vld [vmem:[#allocation2 + $0x2b8] sm:$0xf0] }
 0x141   :  { %v622_v29 = vmax.f32 %v460_v27, 0.0  ;;  %1836 = vmatpush.bf16.msrb.mxu2 %v3091_v26  ;;  %v3195_v27 = vor.u32 %v3446_v9, %v3192_v63  ;;  %v3059_v18 = vor.u32 %v3412_v6, %v3056_v41  ;;  %v3168_v63 = vld [vmem:[#allocation2 + $0x3a8] sm:$0xf0] }
 0x143   :  { %v4023_v36 = vpack.c.bf16 %v622_v29, %v614_v7  ;;  %v620_v7 = vmax.f32 %v402_v43, 0.0  ;;  %v4035_v11 = vpop.f32.mrf.mxu0  ;;  %v3067_v29 = vor.u32 %v3414_v15, %v3064_v52  ;;  %1860 = vmatpush.bf16.msrb.mxu3 %v3195_v27  ;;  %v3408_v15 = vld [vmem:[#allocation2 + $0x2a4] sm:$0xf]  ;;  %v3040_v27 = vld [vmem:[#allocation2 + $0x2a8] sm:$0xf0] }
 0x144   :  { %1731 = vmatmul.bf16.gmra.mxu2 %v3876_v13  ;;  %1777 = vmatpush.bf16.msra.mxu0 %v2971_v57  ;;  %v2963_v13 = vor.u32 %v3388_v40, %v2960_v62 }
 0x145   :  { %1649 = vmatmul.bf16.gmra.mxu3 %v4023_v36  ;;  %v4031_v32 = vpack.c.bf16 %v620_v7, %v612_v0  ;;  %1802 = vmatpush.bf16.msrb.mxu1 %v3067_v29  ;;  %v3410_v0 = vld [vmem:[#allocation2 + $0x2b4] sm:$0xf] }
 0x146   :  { %v3051_v62 = vor.u32 %v3410_v0, %v3048_v4 }
 0x147   :  { %v4029_v19 = vpop.f32.mrf.mxu2 }
 0x148   :  { %v1519_v53 = vpop.f32.mrf.mxu3  ;;  %1778 = vmatpush.bf16.msra.mxu0 %v2963_v13 }
 0x149   :  { %1803 = vmatpush.bf16.msrb.mxu1 %v3059_v18 }
 0x14b   :  { %v4041_v46 = vpop.f32.mrf.mxu0 }
 0x14d   :  { %1804 = vmatpush.bf16.msrb.mxu1 %v3051_v62 }
 0x14e   :  { %1591 = vmatmul.bf16.gmra.mxu1 %v4031_v32  ;;  %1673 = vmatmul.bf16.gmra.mxu0 %v3869_v50  ;;  %v3184_v50 = vld [vmem:[#allocation2 + $0x3c8] sm:$0xf0] }
 0x14f   :  { %v4037_v26 = vpop.f32.mrf.mxu2  ;;  %v3187_v43 = vor.u32 %v3444_v34, %v3184_v50  ;;  %v3043_v34 = vor.u32 %v3408_v15, %v3040_v27 }
 0x150   :  { %v1521_v31 = vpop.f32.mrf.mxu3 }
 0x151   :  { %1861 = vmatpush.bf16.msrb.mxu3 %v3187_v43  ;;  %1805 = vmatpush.bf16.msrb.mxu1 %v3043_v34  ;;  %v3160_v43 = vld [vmem:[#allocation2 + $0x398] sm:$0xf0] }
 0x153   :  { %v4049_v13 = vpop.f32.mrf.mxu0 }
 0x154   :  { %1736 = vmatmul.bf16.gmra.mxu2 %v3894_v56 }
 0x155   :  { %1750 = vmatmul.bf16.vlgmr.msra.gmra.mxu3 %v3874_v12  ;;  %v3442_v12 = vld [vmem:[#allocation2 + $0x3b4] sm:$0xf] }
 0x156   :  { %v3179_v7 = vor.u32 %v3442_v12, %v3176_v60  ;;  %v3152_v12 = vld [vmem:[#allocation2 + $0x388] sm:$0xf0] }
 0x157   :  { %v4043_v23 = vpop.f32.mrf.mxu2 }
 0x158   :  { %v1524_v54 = vpop.f32.mrf.mxu3  ;;  %1862 = vmatpush.bf16.msrb.mxu3 %v3179_v7 }
 0x15b   :  { %v1461_v51 = vpop.f32.mrf.mxu1 }
 0x15c   :  { %v1462_v57 = vadd.f32 %v1461_v51, %v3986_v49  ;;  %v3032_v51 = vld [vmem:[#allocation2 + $0x298] sm:$0xf0] }
 0x15e   :  { %v1491_v56 = vadd.f32 %v3998_v25, %v1462_v57  ;;  %1678 = vmatmul.bf16.gmra.mxu0 %v3884_v35  ;;  %1692 = vmatmul.bf16.vlgmr.msra.gmra.mxu1 %v3904_v3  ;;  %v3440_v3 = vld [vmem:[#allocation2 + $0x3a4] sm:$0xf] }
 0x15f   :  { %v4051_v49 = vpop.f32.mrf.mxu2 }
 0x160   :  { %v1520_v40 = vadd.f32 %v1519_v53, %v1491_v56  ;;  %v3171_v53 = vor.u32 %v3440_v3, %v3168_v63  ;;  %v1526_v52 = vpop.f32.mrf.mxu3  ;;  %v3436_v56 = vld [vmem:[#allocation2 + $0x384] sm:$0xf] }
 0x161   :  { %v3155_v0 = vor.u32 %v3436_v56, %v3152_v12 }
 0x162   :  { %1863 = vmatpush.bf16.msrb.mxu3 %v3171_v53 }
 0x163   :  { %v1463_v9 = vpop.f32.mrf.mxu1 }
 0x164   :  { %v1464_v25 = vadd.f32 %v1463_v9, %v3994_v28  ;;  %1837 = vmatmul.bf16.vlgmr.msrb.gmra.mxu2 %v3910_v17  ;;  %v3438_v28 = vld [vmem:[#allocation2 + $0x394] sm:$0xf] }
 0x165   :  { %1755 = vmatmul.bf16.gmra.mxu3 %v3892_v55 }
 0x166   :  { %v1493_v35 = vadd.f32 %v4004_v39, %v1464_v25  ;;  %v3163_v39 = vor.u32 %v3438_v28, %v3160_v43 }
 0x167   :  { %v4062_v41 = vpop.f32.mrf.mxu2 }
 0x168   :  { %v4057_v29 = vadd.f32 %v1521_v31, %v1493_v35  ;;  %v3406_v31 = vld [vmem:[#allocation2 + $0x294] sm:$0xf]  ;;  %1864 = vmatpush.bf16.msrb.mxu3 %v3163_v39 }
 0x169   :  { %v3035_v57 = vor.u32 %v3406_v31, %v3032_v51 }
 0x16b   :  { %v1466_v50 = vpop.f32.mrf.mxu1  ;;  %v1548_v6 = vpop.f32.mrf.mxu0  ;;  %1806 = vmatpush.bf16.msrb.mxu1 %v3035_v57 }
 0x16c   :  { %v1467_v55 = vadd.f32 %v1466_v50, %v4006_v59  ;;  %v4060_v17 = vadd.f32 %v1548_v6, %v1520_v40  ;;  %v1529_v59 = vpop.f32.mrf.mxu3  ;;  %1865 = vmatpush.bf16.msrb.mxu3 %v3155_v0 }
 0x16e   :  { %v1496_v18 = vadd.f32 %v4013_v30, %v1467_v55  ;;  %1697 = vmatmul.bf16.gmra.mxu1 %v3926_v38  ;;  %1779 = vmatmul.bf16.vlgmr.msra.gmra.mxu0 %v3924_v14  ;;  %v3404_v38 = vld [vmem:[#allocation2 + $0x284] sm:$0xf]  ;;  %v3024_v30 = vld [vmem:[#allocation2 + $0x288] sm:$0xf0] }
 0x16f   :  { %v3027_v62 = vor.u32 %v3404_v38, %v3024_v30  ;;  %v1608_v9 = vpop.f32.mrf.mxu2 }
 0x170   :  { %v1525_v60 = vadd.f32 %v1524_v54, %v1496_v18 }
 0x171   :  { %1807 = vmatpush.bf16.msrb.mxu1 %v3027_v62 }
 0x173   :  { %v1468_v7 = vpop.f32.mrf.mxu1  ;;  %v1550_v4 = vpop.f32.mrf.mxu0 }
 0x174   :  { %v1469_v40 = vadd.f32 %v1468_v7, %v4015_v47  ;;  %1842 = vmatmul.bf16.gmra.mxu2 %v3937_v61  ;;  %v1531_v3 = vpop.f32.mrf.mxu3 }
 0x175   :  { %1760 = vmatmul.bf16.gmra.mxu3 %v3914_v20 }
 0x176   :  { %v1498_v14 = vadd.f32 %v4021_v21, %v1469_v40 }
 0x177   :  { %v1611_v61 = vpop.f32.mrf.mxu2 }
 0x178   :  { %v4071_v25 = vadd.f32 %v1526_v52, %v1498_v14 }
 0x17b   :  { %v1471_v54 = vpop.f32.mrf.mxu1  ;;  %v1553_v35 = vpop.f32.mrf.mxu0 }
 0x17c   :  { %v1472_v63 = vadd.f32 %v1471_v54, %v4025_v37  ;;  %v1554_v15 = vadd.f32 %v1553_v35, %v1525_v60  ;;  %v1534_v52 = vpop.f32.mrf.mxu3 }
 0x17e   :  { %v1501_v47 = vadd.f32 %v4029_v19, %v1472_v63  ;;  %1702 = vmatmul.bf16.gmra.mxu1 %v3951_v2  ;;  %1784 = vmatmul.bf16.gmra.mxu0 %v3949_v1 }
 0x17f   :  { %v1613_v1 = vpop.f32.mrf.mxu2 }
 0x180   :  { %v1530_v20 = vadd.f32 %v1529_v59, %v1501_v47 }
 0x183   :  { %v1473_v21 = vpop.f32.mrf.mxu1  ;;  %v1555_v53 = vpop.f32.mrf.mxu0 }
 0x184   :  { %v1474_v27 = vadd.f32 %v1473_v21, %v4035_v11  ;;  %1847 = vmatmul.bf16.gmra.mxu2 %v3960_v24  ;;  %v1536_v11 = vpop.f32.mrf.mxu3 }
 0x185   :  { %1765 = vmatmul.bf16.gmra.mxu3 %v3939_v22 }
 0x186   :  { %v1503_v37 = vadd.f32 %v4037_v26, %v1474_v27 }
 0x188   :  { %v1532_v34 = vadd.f32 %v1531_v3, %v1503_v37 }
 0x18b   :  { %v1476_v50 = vpop.f32.mrf.mxu1  ;;  %v1558_v19 = vpop.f32.mrf.mxu0 }
 0x18c   :  { %v1477_v2 = vadd.f32 %v1476_v50, %v4041_v46  ;;  %v1559_v6 = vadd.f32 %v1558_v19, %v1530_v20  ;;  %v1616_v46 = vpop.f32.mrf.mxu2 }
 0x18e   :  { %v1506_v28 = vadd.f32 %v4043_v23, %v1477_v2  ;;  %1707 = vmatmul.bf16.gmra.mxu1 %v3969_v42  ;;  %1789 = vmatmul.bf16.gmra.mxu0 %v3967_v5 }
 0x190   :  { %v1535_v22 = vadd.f32 %v1534_v52, %v1506_v28 }
 0x193   :  { %v1478_v43 = vpop.f32.mrf.mxu1  ;;  %v1560_v24 = vpop.f32.mrf.mxu0 }
 0x194   :  { %v1479_v55 = vadd.f32 %v1478_v43, %v4049_v13  ;;  %1852 = vmatmul.bf16.gmra.mxu2 %v3973_v10 }
 0x195   :  { %1866 = vmatmul.bf16.vlgmr.msrb.gmra.mxu3 %v3975_v16  ;;  %v1618_v16 = vpop.f32.mrf.mxu2 }
 0x196   :  { %v1508_v26 = vadd.f32 %v4051_v49, %v1479_v55  ;;  %v1551_v49 = vadd.f32 %v1550_v4, %v4057_v29  ;;  %v1556_v29 = vadd.f32 %v1555_v53, %v4071_v25  ;;  %v1561_v25 = vadd.f32 %v1560_v24, %v1532_v34 }
 0x198   :  { %v1635_v39 = vpop.f32.mrf.mxu3  ;;  %v1537_v18 = vadd.f32 %v1536_v11, %v1508_v26  ;;  %v3459_v11 = vld [vmem:[%s4423_s4 + $0x38] sm:$0xff] }
 0x199   :  { %2116 = vmatpush.bf16.msrb.mxu0 %v3459_v11  ;;  %v3452_v11 = vld [vmem:[%s4423_s4] sm:$0xff] }
 0x19b   :  { %v1563_v23 = vpop.f32.mrf.mxu0  ;;  %v1577_v31 = vpop.f32.mrf.mxu1 }
 0x19c   :  { %v1564_v42 = vadd.f32 %v1563_v23, %v1535_v22  ;;  %v1578_v5 = vadd.f32 %v1577_v31, %v4060_v17  ;;  %v3467_v22 = vld [vmem:[%s4423_s4 + $0x78] sm:$0xff]  ;;  %v3466_v23 = vld [vmem:[%s4423_s4 + $0x70] sm:$0xff] }
 0x19d   :  { %v1621_v0 = vpop.f32.mrf.mxu2  ;;  %2145 = vmatpush.bf16.msra.mxu1 %v3467_v22  ;;  %v3460_v22 = vld [vmem:[%s4423_s4 + $0x40] sm:$0xff] }
 0x19e   :  { %v1607_v51 = vadd.f32 %v4062_v41, %v1578_v5  ;;  %1794 = vmatmul.bf16.gmra.mxu0 %v3982_v44  ;;  %1808 = vmatmul.bf16.vlgmr.msrb.gmra.mxu1 %v3984_v45 }
 0x1a0   :  { %v4093_v13 = vadd.f32 %v1635_v39, %v1607_v51  ;;  %v1637_v10 = vpop.f32.mrf.mxu3 }
 0x1a1   :  { %2146 = vmatpush.bf16.msra.mxu1 %v3466_v23 }
 0x1a3   :  { %v1579_v57 = vpop.f32.mrf.mxu1  ;;  %v1565_v45 = vpop.f32.mrf.mxu0 }
 0x1a4   :  { %v1580_v56 = vadd.f32 %v1579_v57, %v1551_v49  ;;  %v1566_v2 = vadd.f32 %v1565_v45, %v1537_v18  ;;  %v3458_v18 = vld [vmem:[%s4423_s4 + $0x30] sm:$0xff] }
 0x1a5   :  { %1871 = vmatmul.bf16.gmra.mxu3 %v3990_v58  ;;  %v1623_v38 = vpop.f32.mrf.mxu2  ;;  %2117 = vmatpush.bf16.msrb.mxu0 %v3458_v18 }
 0x1a6   :  { %v1609_v12 = vadd.f32 %v1608_v9, %v1580_v56 }
 0x1a8   :  { %v4097_v60 = vadd.f32 %v1637_v10, %v1609_v12  ;;  %v1640_v17 = vpop.f32.mrf.mxu3  ;;  %v3457_v10 = vld [vmem:[%s4423_s4 + $0x28] sm:$0xff] }
 0x1a9   :  { %2118 = vmatpush.bf16.msrb.mxu0 %v3457_v10 }
 0x1ab   :  { %v1582_v41 = vpop.f32.mrf.mxu1  ;;  %v1664_v9 = vpop.f32.mrf.mxu0 }
 0x1ac   :  { %v1583_v59 = vadd.f32 %v1582_v41, %v1554_v15  ;;  %v3456_v41 = vld [vmem:[%s4423_s4 + $0x20] sm:$0xff] }
 0x1ad   :  { %2119 = vmatpush.bf16.msrb.mxu0 %v3456_v41 }
 0x1ae   :  { %v1612_v44 = vadd.f32 %v1611_v61, %v1583_v59  ;;  %1813 = vmatmul.bf16.gmra.mxu1 %v4000_v33  ;;  %v1722_v33 = vpop.f32.mrf.mxu2  ;;  %v3464_v59 = vld [vmem:[%s4423_s4 + $0x60] sm:$0xff] }
 0x1b0   :  { %v4100_v7 = vadd.f32 %v1640_v17, %v1612_v44  ;;  %v1642_v40 = vpop.f32.mrf.mxu3 }
 0x1b3   :  { %v1584_v4 = vpop.f32.mrf.mxu1  ;;  %v4109_v47 = vpop.f32.mrf.mxu0 }
 0x1b4   :  { %v1585_v14 = vadd.f32 %v1584_v4, %v1556_v29 }
 0x1b5   :  { %1876 = vmatmul.bf16.gmra.mxu3 %v4008_v8 }
 0x1b6   :  { %v1614_v58 = vadd.f32 %v1613_v1, %v1585_v14  ;;  %v4114_v27 = vpop.f32.mrf.mxu2  ;;  %v3455_v14 = vld [vmem:[%s4423_s4 + $0x18] sm:$0xff] }
 0x1b7   :  { %2120 = vmatpush.bf16.msrb.mxu0 %v3455_v14 }
 0x1b8   :  { %v4104_v30 = vadd.f32 %v1642_v40, %v1614_v58  ;;  %v1645_v62 = vpop.f32.mrf.mxu3 }
 0x1bb   :  { %v1587_v54 = vpop.f32.mrf.mxu1 }
 0x1bc   :  { %v1588_v35 = vadd.f32 %v1587_v54, %v1559_v6 }
 0x1be   :  { %v1617_v3 = vadd.f32 %v1616_v46, %v1588_v35  ;;  %1818 = vmatmul.bf16.gmra.mxu1 %v4017_v48  ;;  %v1669_v48 = vpop.f32.mrf.mxu0  ;;  %v1727_v6 = vpop.f32.mrf.mxu2 }
 0x1c0   :  { %v4107_v63 = vadd.f32 %v1645_v62, %v1617_v3  ;;  %v1647_v15 = vpop.f32.mrf.mxu3  ;;  %v1895_v62 = vld [vmem:[%s4422_s3] sm:$0x3] }
 0x1c1   :  { %1897 = vst [vmem:[#allocation1] ss:$9 sm:$0xff] %v1895_v62 }
 0x1c3   :  { %v1589_v20 = vpop.f32.mrf.mxu1 }
 0x1c4   :  { %v1590_v61 = vadd.f32 %v1589_v20, %v1561_v25 }
 0x1c5   :  { %1881 = vmatmul.bf16.gmra.mxu3 %v4023_v36 }
 0x1c6   :  { %v1619_v8 = vadd.f32 %v1618_v16, %v1590_v61  ;;  %v4125_v43 = vpop.f32.mrf.mxu0  ;;  %v4129_v46 = vpop.f32.mrf.mxu2  ;;  %v3465_v16 = vld [vmem:[%s4423_s4 + $0x68] sm:$0xff] }
 0x1c7   :  { %2147 = vmatpush.bf16.msra.mxu1 %v3465_v16 }
 0x1c8   :  { %v4112_v21 = vadd.f32 %v1647_v15, %v1619_v8  ;;  %v1650_v53 = vpop.f32.mrf.mxu3 }
 0x1cb   :  { %v1592_v52 = vpop.f32.mrf.mxu1  ;;  %2148 = vmatpush.bf16.msra.mxu1 %v3464_v59 }
 0x1cc   :  { %v1593_v37 = vadd.f32 %v1592_v52, %v1564_v42  ;;  %v3462_v52 = vld [vmem:[%s4423_s4 + $0x50] sm:$0xff] }
 0x1ce   :  { %v1622_v50 = vadd.f32 %v1621_v0, %v1593_v37  ;;  %1823 = vmatmul.bf16.gmra.mxu1 %v4031_v32  ;;  %v1674_v5 = vpop.f32.mrf.mxu0  ;;  %v1732_v49 = vpop.f32.mrf.mxu2 }
 0x1d0   :  { %v4117_v19 = vadd.f32 %v1650_v53, %v1622_v50  ;;  %v1652_v34 = vpop.f32.mrf.mxu3  ;;  %v3454_v53 = vld [vmem:[%s4423_s4 + $0x10] sm:$0xff] }
 0x1d1   :  { %2121 = vmatpush.bf16.msrb.mxu0 %v3454_v53 }
 0x1d3   :  { %v1594_v1 = vpop.f32.mrf.mxu1 }
 0x1d4   :  { %v1595_v28 = vadd.f32 %v1594_v1, %v1566_v2  ;;  %v3461_v2 = vld [vmem:[%s4423_s4 + $0x48] sm:$0xff] }
 0x1d6   :  { %v1624_v36 = vadd.f32 %v1623_v38, %v1595_v28  ;;  %v4147_v56 = vpop.f32.mrf.mxu0  ;;  %v4159_v40 = vpop.f32.mrf.mxu2  ;;  %v3463_v38 = vld [vmem:[%s4423_s4 + $0x58] sm:$0xff] }
 0x1d7   :  { %2149 = vmatpush.bf16.msra.mxu1 %v3463_v38 }
 0x1d8   :  { %v4127_v24 = vadd.f32 %v1652_v34, %v1624_v36  ;;  %v1751_v32 = vpop.f32.mrf.mxu3  ;;  %v3453_v34 = vld [vmem:[%s4423_s4 + $0x8] sm:$0xff] }
 0x1d9   :  { %2122 = vmatpush.bf16.msrb.mxu0 %v3453_v34 }
 0x1db   :  { %v1693_v55 = vpop.f32.mrf.mxu1  ;;  %2150 = vmatpush.bf16.msra.mxu1 %v3462_v52 }
 0x1dc   :  { %v1694_v26 = vadd.f32 %v1693_v55, %v1664_v9 }
 0x1dd   :  { %2123 = vmatpush.bf16.msrb.mxu0 %v3452_v11 }
 0x1de   :  { %v1723_v39 = vadd.f32 %v1722_v33, %v1694_v26  ;;  %v1679_v4 = vpop.f32.mrf.mxu0  ;;  %v1737_v9 = vpop.f32.mrf.mxu2 }
 0x1df   :  { %2151 = vmatpush.bf16.msra.mxu1 %v3461_v2 }
 0x1e0   :  { %v4137_v31 = vpop.f32.mrf.mxu3  ;;  %v4139_v42 = vadd.f32 %v1751_v32, %v1723_v39 }
 0x1e3   :  { %v1695_v51 = vpop.f32.mrf.mxu1  ;;  %2152 = vmatpush.bf16.msra.mxu1 %v3460_v22 }
 0x1e4   :  { %v1696_v26 = vadd.f32 %v1695_v51, %v4109_v47 }
 0x1e6   :  { %v4172_v33 = vpop.f32.mrf.mxu0  ;;  %v4180_v61 = vpop.f32.mrf.mxu2  ;;  %v1725_v10 = vadd.f32 %v4114_v27, %v1696_v26 }
 0x1e8   :  { %v1756_v57 = vpop.f32.mrf.mxu3  ;;  %v1754_v41 = vadd.f32 %v4137_v31, %v1725_v10 }
 0x1eb   :  { %v1698_v12 = vpop.f32.mrf.mxu1 }
 0x1ec   :  { %v1699_v17 = vadd.f32 %v1698_v12, %v1669_v48  ;;  %v1899_v12 = vld [vmem:[#allocation1 + $0x9] sm:$0xff] }
 0x1ee   :  { %v1728_v0 = vadd.f32 %v1727_v6, %v1699_v17  ;;  %v1780_v37 = vpop.f32.mrf.mxu0  ;;  %v1838_v1 = vpop.f32.mrf.mxu2 }
 0x1ef   :  { %v1781_v23 = vadd.f32 %v1780_v37, %v4139_v42 }
 0x1f0   :  { %v4155_v44 = vpop.f32.mrf.mxu3  ;;  %v4157_v45 = vadd.f32 %v1756_v57, %v1728_v0 }
 0x1f3   :  { %v4161_v29 = vpop.f32.mrf.mxu1 }
 0x1f6   :  { %v1782_v32 = vpop.f32.mrf.mxu0  ;;  %v1840_v18 = vpop.f32.mrf.mxu2 }
 0x1f7   :  { %v1783_v38 = vadd.f32 %v1782_v32, %v1754_v41 }
 0x1f8   :  { %v1761_v58 = vpop.f32.mrf.mxu3 }
 0x1fb   :  { %v1703_v54 = vpop.f32.mrf.mxu1 }
 0x1fc   :  { %v1704_v35 = vadd.f32 %v1703_v54, %v1674_v5  ;;  %v1701_v54 = vadd.f32 %v4161_v29, %v4125_v43 }
 0x1fe   :  { %v1733_v3 = vadd.f32 %v1732_v49, %v1704_v35  ;;  %v1898_v49 = vld [vmem:[#allocation1] sm:$0xff]  ;;  %v1785_v57 = vpop.f32.mrf.mxu0  ;;  %v1843_v51 = vpop.f32.mrf.mxu2 }
 0x1ff   :  { %v1900_v0 = vpack.i.b16 %v1898_v49, %v1898_v49 }
 0x200   :  { %v4174_v15 = vpop.f32.mrf.mxu3  ;;  %v4176_v25 = vadd.f32 %v1761_v58, %v1733_v3 }
 0x201   :  { %v1902_v58 = vperm.slane %v1900_v0, 0 }
 0x203   :  { %v4178_v20 = vpop.f32.mrf.mxu1 }
 0x206   :  { %v1787_v35 = vpop.f32.mrf.mxu0  ;;  %v1845_v11 = vpop.f32.mrf.mxu2 }
 0x208   :  { %v1766_v8 = vpop.f32.mrf.mxu3 }
 0x20b   :  { %v1708_v48 = vpop.f32.mrf.mxu1 }
 0x20c   :  { %v1709_v50 = vadd.f32 %v1708_v48, %v1679_v4  ;;  %v1903_v4 = vpack.i.b16 %v1899_v12, %v1899_v12 }
 0x20e   :  { %v1738_v6 = vadd.f32 %v1737_v9, %v1709_v50  ;;  %v1905_v62 = vperm.slane %v1903_v4, 0  ;;  %v1730_v50 = vadd.f32 %v4129_v46, %v1701_v54  ;;  %v1790_v10 = vpop.f32.mrf.mxu0 }
 0x210   :  { %v4194_v28 = vpop.f32.mrf.mxu3  ;;  %v4196_v36 = vadd.f32 %v1766_v8, %v1738_v6  ;;  %v4213_v8 = vunpack.c.l.bf16 %v1902_v58  ;;  %v4215_v53 = vunpack.c.l.bf16 %v1905_v62 }
 0x213   :  { %v4204_v55 = vpop.f32.mrf.mxu1 }
 0x218   :  { %v1867_v39 = vpop.f32.mrf.mxu3 }
 0x21b   :  { %v1809_v5 = vpop.f32.mrf.mxu1 }
 0x21c   :  { %v1810_v16 = vadd.f32 %v1809_v5, %v1781_v23 }
 0x21e   :  { %v1839_v17 = vadd.f32 %v1838_v1, %v1810_v16 }
 0x220   :  { %v1868_v59 = vadd.f32 %v1867_v39, %v1839_v17  ;;  %v1869_v14 = vpop.f32.mrf.mxu3 }
 0x222   :  { %v1887_v47 = vpack.c.bf16 %v1868_v59, %v4093_v13  ;;  %v1786_v13 = vadd.f32 %v1785_v57, %v4157_v45  ;;  %v1759_v45 = vadd.f32 %v4155_v44, %v1730_v50  ;;  %v1706_v44 = vadd.f32 %v4178_v20, %v4147_v56  ;;  %v1848_v59 = vpop.f32.mrf.mxu2 }
 0x223   :  { %v1811_v42 = vpop.f32.mrf.mxu1 }
 0x224   :  { %v1812_v9 = vadd.f32 %v1811_v42, %v1783_v38  ;;  %v1906_v3 = vunpack.c.l.bf16 %v1887_v47  ;;  %v1907_v31 = vunpack.c.h.bf16 %v1887_v47  ;;  %v1788_v16 = vadd.f32 %v1787_v35, %v1759_v45  ;;  %v1792_v42 = vpop.f32.mrf.mxu0 }
 0x226   :  { %v1841_v27 = vadd.f32 %v1840_v18, %v1812_v9  ;;  %v1924_v34 = vadd.f32 %v4213_v8, %v1906_v3  ;;  %v1925_v43 = vadd.f32 %v4215_v53, %v1907_v31 }
 0x228   :  { %v1870_v52 = vadd.f32 %v1869_v14, %v1841_v27  ;;  %v1872_v37 = vpop.f32.mrf.mxu3  ;;  %v1964_v39 = vmax.f32 %v1924_v34, 0.0 }
 0x22a   :  { %v1888_v48 = vpack.c.bf16 %v1870_v52, %v4097_v60  ;;  %v1965_v60 = vmax.f32 %v1925_v43, 0.0 }
 0x22b   :  { %v1814_v2 = vpop.f32.mrf.mxu1 }
 0x22c   :  { %v1908_v29 = vunpack.c.l.bf16 %v1888_v48  ;;  %v1909_v6 = vunpack.c.h.bf16 %v1888_v48  ;;  %v1815_v1 = vadd.f32 %v1814_v2, %v1786_v13  ;;  %v1850_v48 = vpop.f32.mrf.mxu2 }
 0x22e   :  { %v1926_v22 = vadd.f32 %v4213_v8, %v1908_v29  ;;  %v1927_v32 = vadd.f32 %v4215_v53, %v1909_v6  ;;  %v1844_v26 = vadd.f32 %v1843_v51, %v1815_v1  ;;  %v1791_v51 = vadd.f32 %v1790_v10, %v4176_v25 }
 0x230   :  { %v1966_v18 = vmax.f32 %v1926_v22, 0.0  ;;  %v1967_v46 = vmax.f32 %v1927_v32, 0.0  ;;  %v1873_v23 = vadd.f32 %v1872_v37, %v1844_v26  ;;  %v1874_v5 = vpop.f32.mrf.mxu3  ;;  %v3470_v32 = vld [vmem:[%s4425_s6 + $0x10] sm:$0xff] }
 0x232   :  { %v1889_v49 = vpack.c.bf16 %v1873_v23, %v4100_v7  ;;  %v1980_v57 = vpack.c.bf16 %v1966_v18, %v1964_v39  ;;  %v1981_v12 = vpack.c.bf16 %v1967_v46, %v1965_v60  ;;  %v1735_v7 = vadd.f32 %v4159_v40, %v1706_v44  ;;  %v3469_v46 = vld [vmem:[%s4425_s6 + $0x8] sm:$0xff] }
 0x233   :  { %v1816_v17 = vpop.f32.mrf.mxu1 }
 0x234   :  { %v1817_v0 = vadd.f32 %v1816_v17, %v1788_v16  ;;  %2124 = vmatmul.bf16.vlgmr.msrb.gmra.mxu0 %v1980_v57  ;;  %2153 = vmatmul.bf16.vlgmr.msra.gmra.mxu1 %v1981_v12  ;;  %v1910_v4 = vunpack.c.l.bf16 %v1889_v49  ;;  %v1911_v38 = vunpack.c.h.bf16 %v1889_v49  ;;  %v1764_v25 = vadd.f32 %v4174_v15, %v1735_v7  ;;  %v3471_v15 = vld [vmem:[%s4425_s6 + $0x18] sm:$0xff] }
 0x235   :  { %2285 = vmatpush.bf16.msra.mxu2 %v3471_v15 }
 0x236   :  { %v1846_v41 = vadd.f32 %v1845_v11, %v1817_v0  ;;  %v1928_v9 = vadd.f32 %v4213_v8, %v1910_v4  ;;  %v1929_v56 = vadd.f32 %v4215_v53, %v1911_v38  ;;  %v1793_v50 = vadd.f32 %v1792_v42, %v1764_v25  ;;  %v1795_v11 = vpop.f32.mrf.mxu0 }
 0x237   :  { %v1796_v60 = vadd.f32 %v1795_v11, %v4196_v36 }
 0x238   :  { %v1875_v14 = vadd.f32 %v1874_v5, %v1846_v41  ;;  %v1877_v47 = vpop.f32.mrf.mxu3  ;;  %v1968_v52 = vmax.f32 %v1928_v9, 0.0  ;;  %v1969_v40 = vmax.f32 %v1929_v56, 0.0  ;;  %v1853_v5 = vpop.f32.mrf.mxu2 }
 0x239   :  { %2286 = vmatpush.bf16.msra.mxu2 %v3470_v32 }
 0x23a   :  { %v1890_v58 = vpack.c.bf16 %v1875_v14, %v4104_v30 }
 0x23b   :  { %v1819_v62 = vpop.f32.mrf.mxu1 }
 0x23c   :  { %v1820_v27 = vadd.f32 %v1819_v62, %v1791_v51  ;;  %v1912_v54 = vunpack.c.l.bf16 %v1890_v58  ;;  %v1913_v35 = vunpack.c.h.bf16 %v1890_v58 }
 0x23d   :  { %2287 = vmatpush.bf16.msra.mxu2 %v3469_v46 }
 0x23e   :  { %v1849_v20 = vadd.f32 %v1848_v59, %v1820_v27  ;;  %v1930_v3 = vadd.f32 %v4213_v8, %v1912_v54  ;;  %v1931_v31 = vadd.f32 %v4215_v53, %v1913_v35  ;;  %v1797_v41 = vpop.f32.mrf.mxu0 }
 0x240   :  { %v1878_v30 = vadd.f32 %v1877_v47, %v1849_v20  ;;  %v1970_v37 = vmax.f32 %v1930_v3, 0.0  ;;  %v1971_v13 = vmax.f32 %v1931_v31, 0.0  ;;  %v1879_v29 = vpop.f32.mrf.mxu3  ;;  %v1855_v62 = vpop.f32.mrf.mxu2 }
 0x242   :  { %v1891_v34 = vpack.c.bf16 %v1878_v30, %v4107_v63  ;;  %v1982_v2 = vpack.c.bf16 %v1970_v37, %v1968_v52  ;;  %v1983_v43 = vpack.c.bf16 %v1971_v13, %v1969_v40  ;;  %v1711_v63 = vadd.f32 %v4204_v55, %v4172_v33 }
 0x243   :  { %v1821_v6 = vpop.f32.mrf.mxu1 }
 0x244   :  { %v1822_v1 = vadd.f32 %v1821_v6, %v1793_v50  ;;  %2129 = vmatmul.bf16.gmra.mxu0 %v1982_v2  ;;  %2158 = vmatmul.bf16.gmra.mxu1 %v1983_v43  ;;  %v1914_v26 = vunpack.c.l.bf16 %v1891_v34  ;;  %v1915_v39 = vunpack.c.h.bf16 %v1891_v34  ;;  %v1740_v23 = vadd.f32 %v4180_v61, %v1711_v63  ;;  %v2182_v34 = vld [vmem:[%s4424_s5] sm:$0x1] }
 0x245   :  { %v2184_v43 = vpack.i.b16 %v2182_v34, %v2182_v34  ;;  %v3490_v34 = vld [vmem:[%s4426_s7] ss:$0 sm:$0xff]  ;;  %s3569_s7 = smov 1  }
 0x246   :  { %v1851_v22 = vadd.f32 %v1850_v48, %v1822_v1  ;;  %v1932_v16 = vadd.f32 %v4213_v8, %v1914_v26  ;;  %v1933_v57 = vadd.f32 %v4215_v53, %v1915_v39  ;;  %v1769_v0 = vadd.f32 %v4194_v28, %v1740_v23 }
 0x247   :  { %v2186_v6 = vperm.slane %v2184_v43, 0 }
 0x248   :  { %v1880_v45 = vadd.f32 %v1879_v29, %v1851_v22  ;;  %v1882_v12 = vpop.f32.mrf.mxu3  ;;  %v1972_v61 = vmax.f32 %v1932_v16, 0.0  ;;  %v1973_v4 = vmax.f32 %v1933_v57, 0.0  ;;  %v1798_v38 = vadd.f32 %v1797_v41, %v1769_v0 }
 0x249   :  { %v2195_v22 = vunpack.c.l.bf16 %v2186_v6 }
 0x24a   :  { %v1892_v18 = vpack.c.bf16 %v1880_v45, %v4112_v21 }
 0x24b   :  { %v1824_v10 = vpop.f32.mrf.mxu1 }
 0x24c   :  { %v1825_v49 = vadd.f32 %v1824_v10, %v1796_v60  ;;  %v1916_v33 = vunpack.c.l.bf16 %v1892_v18  ;;  %v1917_v55 = vunpack.c.h.bf16 %v1892_v18 }
 0x24e   :  { %v1854_v36 = vadd.f32 %v1853_v5, %v1825_v49  ;;  %v1934_v21 = vadd.f32 %v4213_v8, %v1916_v33  ;;  %v1935_v17 = vadd.f32 %v4215_v53, %v1917_v55 }
 0x250   :  { %v1883_v44 = vadd.f32 %v1882_v12, %v1854_v36  ;;  %v1974_v59 = vmax.f32 %v1934_v21, 0.0  ;;  %v1975_v14 = vmax.f32 %v1935_v17, 0.0  ;;  %v1884_v27 = vpop.f32.mrf.mxu3 }
 0x252   :  { %v1893_v47 = vpack.c.bf16 %v1883_v44, %v4117_v19  ;;  %v1984_v51 = vpack.c.bf16 %v1974_v59, %v1972_v61  ;;  %v1985_v58 = vpack.c.bf16 %v1975_v14, %v1973_v4 }
 0x253   :  { %v1826_v7 = vpop.f32.mrf.mxu1 }
 0x254   :  { %v1827_v42 = vadd.f32 %v1826_v7, %v1798_v38  ;;  %2134 = vmatmul.bf16.gmra.mxu0 %v1984_v51  ;;  %2163 = vmatmul.bf16.gmra.mxu1 %v1985_v58  ;;  %v1918_v28 = vunpack.c.l.bf16 %v1893_v47  ;;  %v1919_v35 = vunpack.c.h.bf16 %v1893_v47 }
 0x256   :  { %v1856_v9 = vadd.f32 %v1855_v62, %v1827_v42  ;;  %v1936_v3 = vadd.f32 %v4213_v8, %v1918_v28  ;;  %v1937_v19 = vadd.f32 %v4215_v53, %v1919_v35 }
 0x258   :  { %v1885_v54 = vadd.f32 %v1884_v27, %v1856_v9  ;;  %v1976_v30 = vmax.f32 %v1936_v3, 0.0  ;;  %v1977_v40 = vmax.f32 %v1937_v19, 0.0 }
 0x25a   :  { %v1894_v56 = vpack.c.bf16 %v1885_v54, %v4127_v24  ;;  %v3468_v24 = vld [vmem:[%s4425_s6] sm:$0xff] }
 0x25b   :  { %2288 = vmatpush.bf16.msra.mxu2 %v3468_v24 }
 0x25c   :  { %v1920_v20 = vunpack.c.l.bf16 %v1894_v56  ;;  %v1921_v31 = vunpack.c.h.bf16 %v1894_v56 }
 0x25e   :  { %v1938_v25 = vadd.f32 %v4213_v8, %v1920_v20  ;;  %v1939_v52 = vadd.f32 %v4215_v53, %v1921_v31 }
 0x260   :  { %v1978_v37 = vmax.f32 %v1938_v25, 0.0  ;;  %v1979_v13 = vmax.f32 %v1939_v52, 0.0 }
 0x262   :  { %v1986_v48 = vpack.c.bf16 %v1978_v37, %v1976_v30  ;;  %v1987_v50 = vpack.c.bf16 %v1979_v13, %v1977_v40 }
 0x264   :  { %2139 = vmatmul.bf16.gmra.mxu0 %v1986_v48  ;;  %2168 = vmatmul.bf16.gmra.mxu1 %v1987_v50 }
 0x2b1   :  { %v2125_v8 = vpop.f32.mrf.mxu0  ;;  %v2154_v2 = vpop.f32.mrf.mxu1 }
 0x2b2   :  { %v2155_v53 = vadd.f32 %v2154_v2, %v2125_v8 }
 0x2b4   :  { %v2174_v29 = vpack.c.bf16 %v2155_v53, %v2155_v53 }
 0x2b6   :  { %v2187_v11 = vunpack.c.l.bf16 %v2174_v29 }
 0x2b8   :  { %v2196_v26 = vadd.f32 %v2195_v22, %v2187_v11 }
 0x2b9   :  { %v2127_v1 = vpop.f32.mrf.mxu0  ;;  %v2156_v15 = vpop.f32.mrf.mxu1 }
 0x2ba   :  { %v2157_v32 = vadd.f32 %v2156_v15, %v2127_v1  ;;  %v2220_v46 = vmax.f32 %v2196_v26, 0.0 }
 0x2bc   :  { %v2175_v63 = vpack.c.bf16 %v2157_v32, %v2157_v32 }
 0x2be   :  { %v2188_v45 = vunpack.c.l.bf16 %v2175_v63 }
 0x2c0   :  { %v2197_v39 = vadd.f32 %v2195_v22, %v2188_v45 }
 0x2c1   :  { %v2130_v60 = vpop.f32.mrf.mxu0  ;;  %v2159_v18 = vpop.f32.mrf.mxu1 }
 0x2c2   :  { %v2221_v23 = vmax.f32 %v2197_v39, 0.0  ;;  %v2160_v5 = vadd.f32 %v2159_v18, %v2130_v60 }
 0x2c4   :  { %v2228_v10 = vpack.c.bf16 %v2221_v23, %v2220_v46  ;;  %v2176_v16 = vpack.c.bf16 %v2160_v5, %v2160_v5 }
 0x2c6   :  { %3292 = vmatmul.msk.bf16.vlgmr.msra.gmra.mxu2 %vm2268_vm1, %v2228_v10  ;;  %v2189_v55 = vunpack.c.l.bf16 %v2176_v16 }
 0x2c8   :  { %v2198_v36 = vadd.f32 %v2195_v22, %v2189_v55 }
 0x2c9   :  { %v2132_v49 = vpop.f32.mrf.mxu0  ;;  %v2161_v33 = vpop.f32.mrf.mxu1 }
 0x2ca   :  { %v2162_v57 = vadd.f32 %v2161_v33, %v2132_v49  ;;  %v2222_v61 = vmax.f32 %v2198_v36, 0.0 }
 0x2cc   :  { %v2177_v12 = vpack.c.bf16 %v2162_v57, %v2162_v57 }
 0x2ce   :  { %v2190_v21 = vunpack.c.l.bf16 %v2177_v12 }
 0x2d0   :  { %v2199_v17 = vadd.f32 %v2195_v22, %v2190_v21 }
 0x2d1   :  { %v2135_v0 = vpop.f32.mrf.mxu0  ;;  %v2164_v41 = vpop.f32.mrf.mxu1 }
 0x2d2   :  { %v2223_v44 = vmax.f32 %v2199_v17, 0.0  ;;  %v2165_v59 = vadd.f32 %v2164_v41, %v2135_v0 }
 0x2d4   :  { %v2229_v4 = vpack.c.bf16 %v2223_v44, %v2222_v61  ;;  %v2178_v14 = vpack.c.bf16 %v2165_v59, %v2165_v59 }
 0x2d6   :  { %3293 = vmatmul.msk.bf16.gmra.mxu2 %vm2268_vm1, %v2229_v4  ;;  %v2191_v51 = vunpack.c.l.bf16 %v2178_v14 }
 0x2d8   :  { %v2200_v42 = vadd.f32 %v2195_v22, %v2191_v51 }
 0x2d9   :  { %v2137_v38 = vpop.f32.mrf.mxu0  ;;  %v2166_v47 = vpop.f32.mrf.mxu1 }
 0x2da   :  { %v2167_v58 = vadd.f32 %v2166_v47, %v2137_v38  ;;  %v2224_v28 = vmax.f32 %v2200_v42, 0.0 }
 0x2dc   :  { %v2179_v7 = vpack.c.bf16 %v2167_v58, %v2167_v58 }
 0x2de   :  { %v2192_v62 = vunpack.c.l.bf16 %v2179_v7 }
 0x2e0   :  { %v2201_v9 = vadd.f32 %v2195_v22, %v2192_v62 }
 0x2e1   :  { %v2140_v27 = vpop.f32.mrf.mxu0  ;;  %v2169_v54 = vpop.f32.mrf.mxu1 }
 0x2e2   :  { %v2225_v35 = vmax.f32 %v2201_v9, 0.0  ;;  %v2170_v56 = vadd.f32 %v2169_v54, %v2140_v27 }
 0x2e4   :  { %v2230_v20 = vpack.c.bf16 %v2225_v35, %v2224_v28  ;;  %v2180_v3 = vpack.c.bf16 %v2170_v56, %v2170_v56 }
 0x2e6   :  { %3294 = vmatmul.msk.bf16.gmra.mxu2 %vm2268_vm1, %v2230_v20  ;;  %v2193_v25 = vunpack.c.l.bf16 %v2180_v3 }
 0x2e8   :  { %v2202_v37 = vadd.f32 %v2195_v22, %v2193_v25 }
 0x2e9   :  { %v2142_v31 = vpop.f32.mrf.mxu0  ;;  %v2171_v19 = vpop.f32.mrf.mxu1 }
 0x2ea   :  { %v2172_v52 = vadd.f32 %v2171_v19, %v2142_v31  ;;  %v2226_v48 = vmax.f32 %v2202_v37, 0.0 }
 0x2ec   :  { %v2181_v30 = vpack.c.bf16 %v2172_v52, %v2172_v52 }
 0x2ee   :  { %v2194_v40 = vunpack.c.l.bf16 %v2181_v30 }
 0x2f0   :  { %v2203_v13 = vadd.f32 %v2195_v22, %v2194_v40 }
 0x2f2   :  { %v2227_v50 = vmax.f32 %v2203_v13, 0.0 }
 0x2f4   :  { %v2231_v24 = vpack.c.bf16 %v2227_v50, %v2226_v48 }
 0x2f6   :  { %3295 = vmatmul.msk.bf16.gmra.mxu2 %vm2268_vm1, %v2231_v24 }
 0x349   :  { %v2290_v8 = vpop.f32.mrf.mxu2 }
 0x34a   :  { %v4275_v2 = vadd.f32 %v3490_v34, %v2290_v8  ;;  %v3570_v8 = vmov 0  }
 0x34b   :  { %3487 = vset.pattern.permute.xlu0 %v3570_v8  ;;  %3488 = vset.pattern.permute.xlu1 %v3570_v8 }
 0x34c   :  { %2318 = vrot.lane.b32.xlu0 %v4275_v2, %s3568_s15  ;;  %3489 = vset.pattern.permute.xlu2 %v3570_v8 }
 0x351   :  { %v2292_v53 = vpop.f32.mrf.mxu2 }
 0x352   :  { %v4279_v43 = vadd.f32 %v3490_v34, %v2292_v53 }
 0x354   :  { %2320 = vrot.lane.b32.xlu0 %v4279_v43, %s3568_s15 }
 0x359   :  { %v2295_v29 = vpop.f32.mrf.mxu2 }
 0x35a   :  { %v4283_v6 = vadd.f32 %v3490_v34, %v2295_v29 }
 0x35c   :  { %2322 = vrot.lane.b32.xlu1 %v4283_v6, %s3568_s15 }
 0x361   :  { %v2297_v1 = vpop.f32.mrf.mxu2 }
 0x362   :  { %v4287_v15 = vadd.f32 %v3490_v34, %v2297_v1 }
 0x364   :  { %2324 = vrot.lane.b32.xlu1 %v4287_v15, %s3568_s15 }
 0x369   :  { %v2300_v11 = vpop.f32.mrf.mxu2 }
 0x36a   :  { %v4291_v22 = vadd.f32 %v3490_v34, %v2300_v11 }
 0x36c   :  { %2326 = vrot.lane.b32.xlu2 %v4291_v22, %s3568_s15 }
 0x371   :  { %v2302_v32 = vpop.f32.mrf.mxu2 }
 0x372   :  { %v4295_v63 = vadd.f32 %v3490_v34, %v2302_v32 }
 0x374   :  { %2328 = vrot.lane.b32.xlu2 %v4295_v63, %s3568_s15 }
 0x379   :  { %v2305_v26 = vpop.f32.mrf.mxu2 }
 0x37a   :  { %v4299_v45 = vadd.f32 %v3490_v34, %v2305_v26 }
 0x37c   :  { %2330 = vrot.lane.b32.xlu0 %v4299_v45, %s3568_s15 }
 0x381   :  { %v2307_v39 = vpop.f32.mrf.mxu2 }
 0x382   :  { %v4303_v60 = vadd.f32 %v3490_v34, %v2307_v39 }
 0x384   :  { %2332 = vrot.lane.b32.xlu1 %v4303_v60, %s3568_s15 }
 0x3be   :  { %v2319_v18 = vpop.permute.xlu0 %2318 }
 0x3bf   :  { %v4308_v46 = vmax.f32 %v4275_v2, %v2319_v18 }
 0x3c1   :  { %2382 = vrot.lane.b32.xlu2 %v4308_v46, %s3569_s7  ;;  %v2350_v53 = vsub.f32 %v4275_v2, %v4308_v46 }
 0x3c3   :  { %v2358_v29 = vmul.f32 1.442695, %v2350_v53 }
 0x3c6   :  { %v2321_v23 = vpop.permute.xlu0 %2320  ;;  %v2327_v10 = vpop.permute.xlu2 %2326 }
 0x3c7   :  { %v4312_v5 = vmax.f32 %v4279_v43, %v2321_v23  ;;  %v4316_v49 = vmax.f32 %v4291_v22, %v2327_v10 }
 0x3c9   :  { %2384 = vrot.lane.b32.xlu0 %v4312_v5, %s3569_s7  ;;  %v2351_v1 = vsub.f32 %v4279_v43, %v4312_v5 }
 0x3cb   :  { %v2360_v11 = vmul.f32 1.442695, %v2351_v1 }
 0x3ce   :  { %v2323_v16 = vpop.permute.xlu1 %2322  ;;  %v2329_v55 = vpop.permute.xlu2 %2328 }
 0x3cf   :  { %v4319_v33 = vmax.f32 %v4283_v6, %v2323_v16  ;;  %v4324_v12 = vmax.f32 %v4295_v63, %v2329_v55 }
 0x3d1   :  { %2386 = vrot.lane.b32.xlu1 %v4319_v33, %s3569_s7  ;;  %2390 = vrot.lane.b32.xlu0 %v4316_v49, %s3569_s7 }
 0x3d6   :  { %v2325_v57 = vpop.permute.xlu1 %2324 }
 0x3d7   :  { %v4327_v36 = vmax.f32 %v4287_v15, %v2325_v57 }
 0x3d9   :  { %2388 = vrot.lane.b32.xlu2 %v4327_v36, %s3569_s7  ;;  %2392 = vrot.lane.b32.xlu1 %v4324_v12, %s3569_s7  ;;  %v2353_v55 = vsub.f32 %v4287_v15, %v4327_v36 }
 0x3ee   :  { %v2331_v21 = vpop.permute.xlu0 %2330 }
 0x3ef   :  { %v4332_v17 = vmax.f32 %v4299_v45, %v2331_v21 }
 0x3f1   :  { %2394 = vrot.lane.b32.xlu2 %v4332_v17, %s3569_s7 }
 0x3f6   :  { %v2333_v0 = vpop.permute.xlu1 %2332 }
 0x3f7   :  { %v4336_v41 = vmax.f32 %v4303_v60, %v2333_v0  ;;  %v2364_v0 = vmul.f32 1.442695, %v2353_v55 }
 0x3f9   :  { %2396 = vrot.lane.b32.xlu0 %v4336_v41, %s3569_s7 }
 0x41b   :  { %v2383_v61 = vpop.permute.xlu2 %2382 }
 0x41c   :  { %v2406_v44 = vsub.f32 %v4275_v2, %v2383_v61 }
 0x41e   :  { %v2414_v59 = vmul.f32 1.442695, %v2406_v44 }
 0x420   :  { %3491 = vpow2.f32 %v2414_v59 }
 0x426   :  { %v3492_v4 = vpop.eup %3491 }
 0x427   :  { %2438 = vrot.lane.b32.xlu1 %v3492_v4, %s3568_s15 }
 0x433   :  { %v2389_v14 = vpop.permute.xlu2 %2388 }
 0x434   :  { %v2409_v38 = vsub.f32 %v4287_v15, %v2389_v14 }
 0x436   :  { %v2420_v47 = vmul.f32 1.442695, %v2409_v38 }
 0x438   :  { %3493 = vpow2.f32 %v2420_v47  ;;  %v2352_v47 = vsub.f32 %v4283_v6, %v4319_v33 }
 0x43b   :  { %v2385_v51 = vpop.permute.xlu0 %2384 }
 0x43c   :  { %v2407_v58 = vsub.f32 %v4279_v43, %v2385_v51  ;;  %v2354_v51 = vsub.f32 %v4291_v22, %v4316_v49 }
 0x43e   :  { %v3494_v7 = vpop.eup %3493  ;;  %v2416_v42 = vmul.f32 1.442695, %v2407_v58  ;;  %v2362_v58 = vmul.f32 1.442695, %v2352_v47 }
 0x43f   :  { %2444 = vrot.lane.b32.xlu1 %v3494_v7, %s3568_s15 }
 0x440   :  { %3495 = vpow2.f32 %v2416_v42  ;;  %v2355_v42 = vsub.f32 %v4295_v63, %v4324_v12 }
 0x443   :  { %v2387_v62 = vpop.permute.xlu1 %2386  ;;  %v2391_v9 = vpop.permute.xlu0 %2390 }
 0x444   :  { %v2408_v27 = vsub.f32 %v4283_v6, %v2387_v62  ;;  %v2410_v54 = vsub.f32 %v4291_v22, %v2391_v9 }
 0x446   :  { %v3496_v28 = vpop.eup %3495  ;;  %v2418_v35 = vmul.f32 1.442695, %v2408_v27  ;;  %v2422_v56 = vmul.f32 1.442695, %v2410_v54  ;;  %v2368_v27 = vmul.f32 1.442695, %v2355_v42 }
 0x447   :  { %2440 = vrot.lane.b32.xlu2 %v3496_v28, %s3568_s15 }
 0x448   :  { %3497 = vpow2.f32 %v2418_v35 }
 0x449   :  { %3499 = vpow2.f32 %v2422_v56 }
 0x44b   :  { %v2393_v20 = vpop.permute.xlu1 %2392  ;;  %v2395_v3 = vpop.permute.xlu2 %2394 }
 0x44c   :  { %v2411_v31 = vsub.f32 %v4295_v63, %v2393_v20  ;;  %v2412_v19 = vsub.f32 %v4299_v45, %v2395_v3 }
 0x44e   :  { %v3498_v25 = vpop.eup %3497  ;;  %v2424_v52 = vmul.f32 1.442695, %v2411_v31  ;;  %v2426_v30 = vmul.f32 1.442695, %v2412_v19  ;;  %v2357_v31 = vsub.f32 %v4303_v60, %v4336_v41 }
 0x44f   :  { %v3500_v37 = vpop.eup %3499  ;;  %2442 = vrot.lane.b32.xlu0 %v3498_v25, %s3568_s15 }
 0x450   :  { %3501 = vpow2.f32 %v2424_v52  ;;  %2446 = vrot.lane.b32.xlu2 %v3500_v37, %s3568_s15  ;;  %v2372_v25 = vmul.f32 1.442695, %v2357_v31 }
 0x451   :  { %3503 = vpow2.f32 %v2426_v30 }
 0x456   :  { %v3502_v40 = vpop.eup %3501 }
 0x457   :  { %v3504_v13 = vpop.eup %3503  ;;  %2448 = vrot.lane.b32.xlu0 %v3502_v40, %s3568_s15 }
 0x458   :  { %2450 = vrot.lane.b32.xlu1 %v3504_v13, %s3568_s15 }
 0x46b   :  { %v2397_v48 = vpop.permute.xlu0 %2396 }
 0x46c   :  { %v2413_v50 = vsub.f32 %v4303_v60, %v2397_v48 }
 0x46e   :  { %v2428_v24 = vmul.f32 1.442695, %v2413_v50 }
 0x470   :  { %3505 = vpow2.f32 %v2428_v24 }
 0x471   :  { %3507 = vpow2.f32 %v2358_v29 }
 0x472   :  { %3509 = vpow2.f32 %v2360_v11 }
 0x476   :  { %v3506_v34 = vpop.eup %3505 }
 0x477   :  { %2452 = vrot.lane.b32.xlu2 %v3506_v34, %s3568_s15  ;;  %v3508_v32 = vpop.eup %3507 }
 0x478   :  { %v3510_v18 = vpop.eup %3509 }
 0x499   :  { %v2439_v26 = vpop.permute.xlu1 %2438 }
 0x49a   :  { %v2462_v39 = vadd.f32 %v3508_v32, %v2439_v26 }
 0x49c   :  { %3511 = vlog2.f32 %v2462_v39 }
 0x4a1   :  { %v2441_v23 = vpop.permute.xlu2 %2440 }
 0x4a2   :  { %v3512_v10 = vpop.eup %3511  ;;  %v2463_v16 = vadd.f32 %v3510_v18, %v2441_v23 }
 0x4a3   :  { %v2471_v57 = vmul.f32 0.6931472, %v3512_v10 }
 0x4a4   :  { %3513 = vlog2.f32 %v2463_v16 }
 0x4a5   :  { %v2486_v21 = vadd.f32 %v2471_v57, %v4308_v46  ;;  %3515 = vpow2.f32 %v2364_v0  ;;  %v2366_v46 = vmul.f32 1.442695, %v2354_v51 }
 0x4a7   :  { %2496 = vperm.xlu0 %3487, %v2486_v21  }
 0x4aa   :  { %v3514_v61 = vpop.eup %3513  ;;  %v2447_v35 = vpop.permute.xlu2 %2446 }
 0x4ab   :  { %v2473_v44 = vmul.f32 0.6931472, %v3514_v61  ;;  %v3516_v4 = vpop.eup %3515 }
 0x4ad   :  { %v2487_v59 = vadd.f32 %v2473_v44, %v4312_v5  ;;  %v2356_v5 = vsub.f32 %v4299_v45, %v4332_v17 }
 0x4af   :  { %2501 = vperm.xlu1 %3488, %v2487_v59   ;;  %v2370_v54 = vmul.f32 1.442695, %v2356_v5 }
 0x4b1   :  { %v2445_v14 = vpop.permute.xlu1 %2444 }
 0x4b2   :  { %v2465_v38 = vadd.f32 %v3516_v4, %v2445_v14 }
 0x4b4   :  { %3517 = vlog2.f32 %v2465_v38 }
 0x4b5   :  { %3519 = vpow2.f32 %v2362_v58 }
 0x4b6   :  { %3521 = vpow2.f32 %v2366_v46 }
 0x4b7   :  { %3523 = vpow2.f32 %v2368_v27 }
 0x4b8   :  { %3525 = vpow2.f32 %v2370_v54 }
 0x4ba   :  { %v3518_v7 = vpop.eup %3517 }
 0x4bb   :  { %v2477_v62 = vmul.f32 0.6931472, %v3518_v7  ;;  %v3520_v28 = vpop.eup %3519 }
 0x4bc   :  { %v3522_v3 = vpop.eup %3521 }
 0x4bd   :  { %v2489_v9 = vadd.f32 %v2477_v62, %v4327_v36  ;;  %v2466_v19 = vadd.f32 %v3522_v3, %v2447_v35  ;;  %v3524_v52 = vpop.eup %3523 }
 0x4be   :  { %v3526_v30 = vpop.eup %3525 }
 0x4bf   :  { %2511 = vperm.xlu1 %3488, %v2489_v9  }
 0x4c1   :  { %v2443_v56 = vpop.permute.xlu0 %2442 }
 0x4c2   :  { %v2464_v20 = vadd.f32 %v3520_v28, %v2443_v56 }
 0x4c4   :  { %3527 = vlog2.f32 %v2464_v20 }
 0x4c5   :  { %3529 = vlog2.f32 %v2466_v19 }
 0x4c6   :  { %3531 = vpow2.f32 %v2372_v25 }
 0x4c9   :  { %v2449_v36 = vpop.permute.xlu0 %2448 }
 0x4ca   :  { %v3528_v37 = vpop.eup %3527  ;;  %v2451_v40 = vpop.permute.xlu1 %2450  ;;  %v2467_v13 = vadd.f32 %v3524_v52, %v2449_v36 }
 0x4cb   :  { %v2475_v48 = vmul.f32 0.6931472, %v3528_v37  ;;  %v2468_v50 = vadd.f32 %v3526_v30, %v2451_v40  ;;  %v3530_v34 = vpop.eup %3529 }
 0x4cc   :  { %3533 = vlog2.f32 %v2467_v13  ;;  %v3532_v8 = vpop.eup %3531  ;;  %v2479_v53 = vmul.f32 0.6931472, %v3530_v34 }
 0x4cd   :  { %3535 = vlog2.f32 %v2468_v50  ;;  %v2488_v24 = vadd.f32 %v2475_v48, %v4319_v33 }
 0x4ce   :  { %v2490_v18 = vadd.f32 %v2479_v53, %v4316_v49 }
 0x4cf   :  { %2506 = vperm.xlu2 %3489, %v2488_v24  }
 0x4d1   :  { %v2453_v29 = vpop.permute.xlu2 %2452 }
 0x4d2   :  { %v3534_v1 = vpop.eup %3533  ;;  %v2469_v11 = vadd.f32 %v3532_v8, %v2453_v29 }
 0x4d3   :  { %v3536_v32 = vpop.eup %3535  ;;  %v2481_v26 = vmul.f32 0.6931472, %v3534_v1 }
 0x4d4   :  { %v2483_v39 = vmul.f32 0.6931472, %v3536_v32  ;;  %3537 = vlog2.f32 %v2469_v11 }
 0x4d5   :  { %v2491_v23 = vadd.f32 %v2481_v26, %v4324_v12 }
 0x4d6   :  { %v2492_v10 = vadd.f32 %v2483_v39, %v4332_v17 }
 0x4d7   :  { %2516 = vperm.xlu2 %3489, %v2490_v18   ;;  %2521 = vperm.xlu0 %3487, %v2491_v23  }
 0x4d8   :  { %2526 = vperm.xlu1 %3488, %v2492_v10  }
 0x4da   :  { %v3538_v33 = vpop.eup %3537 }
 0x4db   :  { %v2485_v16 = vmul.f32 0.6931472, %v3538_v33 }
 0x4dd   :  { %v2493_v55 = vadd.f32 %v2485_v16, %v4336_v41 }
 0x4df   :  { %2531 = vperm.xlu2 %3489, %v2493_v55  }
 0x519   :  { %v2497_v57 = vpop.permute.xlu0 %2496 }
 0x51a   :  { %v2534_v21 = vsub.f32 %v4275_v2, %v2497_v57 }
 0x51c   :  { %2543 = vst.msk [vmem:[%s4427_s8] sm:$0xff] %vm2542_vm2, %v2534_v21 }
 0x521   :  { %v2502_v49 = vpop.permute.xlu1 %2501 }
 0x522   :  { %v2535_v12 = vsub.f32 %v4279_v43, %v2502_v49 }
 0x524   :  { %2544 = vst.msk [vmem:[%s4427_s8 + $0x8] sm:$0xff] %vm2542_vm2, %v2535_v12 }
 0x529   :  { %v2507_v17 = vpop.permute.xlu2 %2506 }
 0x52a   :  { %v2536_v41 = vsub.f32 %v4283_v6, %v2507_v17 }
 0x52c   :  { %2545 = vst.msk [vmem:[%s4427_s8 + $0x10] sm:$0xff] %vm2542_vm2, %v2536_v41 }
 0x531   :  { %v2512_v2 = vpop.permute.xlu1 %2511  ;;  %v2517_v0 = vpop.permute.xlu2 %2516 }
 0x532   :  { %v2537_v61 = vsub.f32 %v4287_v15, %v2512_v2  ;;  %v2538_v44 = vsub.f32 %v4291_v22, %v2517_v0 }
 0x534   :  { %2546 = vst.msk [vmem:[%s4427_s8 + $0x18] sm:$0xff] %vm2542_vm2, %v2537_v61 }
 0x535   :  { %2547 = vst.msk [vmem:[%s4427_s8 + $0x20] sm:$0xff] %vm2542_vm2, %v2538_v44 }
 0x539   :  { %v2532_v43 = vpop.permute.xlu2 %2531 }
 0x53a   :  { %v2541_v6 = vsub.f32 %v4303_v60, %v2532_v43 }
 0x53c   :  { %2550 = vst.msk [vmem:[%s4427_s8 + $0x38] sm:$0xff] %vm2542_vm2, %v2541_v6 }
 0x549   :  { %v2522_v15 = vpop.permute.xlu0 %2521 }
 0x54a   :  { %v2527_v22 = vpop.permute.xlu1 %2526  ;;  %v2539_v59 = vsub.f32 %v4295_v63, %v2522_v15 }
 0x54b   :  { %v2540_v4 = vsub.f32 %v4299_v45, %v2527_v22 }
 0x54c   :  { %2548 = vst.msk [vmem:[%s4427_s8 + $0x28] sm:$0xff] %vm2542_vm2, %v2539_v59 }
 0x54d   :  { %2549 = vst.msk [vmem:[%s4427_s8 + $0x30] sm:$0xff] %vm2542_vm2, %v2540_v4 }
 0x54e   :  { %2555 = vsyncpa [#allocation3], 1 }

</bundles_post_ra>
